<compile_context>
chip_gen: v7x
topology: tpu7x:2x2x1
jax: 0.10.0
libtpu: 0.0.40
codegen_flags: <defaults>
</compile_context>

<pallas_src>
import functools
import math

import jax
import jax.numpy as jnp
from jax.experimental import pallas as pl
from jax.experimental.pallas import tpu as pltpu

LN_EPS = 1e-5  # torch.nn.LayerNorm default


# ----------------------------------------------------------------------------
# in-kernel helpers (traced inside Pallas kernels; all non-MXU math in f32)
# ----------------------------------------------------------------------------
def _silu(x):
    return x * (1.0 / (1.0 + jnp.exp(-x)))


def _gelu(x):
    # tanh approximation (EUP-friendly); tiny deviation from torch's erf GELU.
    return 0.5 * x * (1.0 + jnp.tanh(0.7978845608028654 *
                                     (x + 0.044715 * x * x * x)))


def _layernorm(x, g, b):
    mu = jnp.mean(x, axis=-1, keepdims=True)
    var = jnp.mean((x - mu) ** 2, axis=-1, keepdims=True)
    return (x - mu) * jax.lax.rsqrt(var + LN_EPS) * g + b


def _softmax_rows(s):
    s = s - jnp.max(s, axis=-1, keepdims=True)
    p = jnp.exp(s)
    return p * pl.reciprocal(jnp.sum(p, axis=-1, keepdims=True), approx=True)


def _attention_into(y_ref, q, k, v, num_heads, head_dim):
    """Multi-head attention; writes (Tq, D) into y_ref. q is pre-scaled by
    1/sqrt(head_dim). Head outputs go into a VMEM scratch via static lane
    slices (no concatenate chain)."""
    qb = q.astype(jnp.bfloat16)
    kb = k.astype(jnp.bfloat16)
    vb = v.astype(jnp.bfloat16)
    for h in range(num_heads):
        sl = slice(h * head_dim, (h + 1) * head_dim)
        s = jax.lax.dot_general(qb[:, sl], kb[:, sl],
                                dimension_numbers=(((1,), (1,)), ((), ())),
                                preferred_element_type=jnp.float32)
        p = _softmax_rows(s)
        y_ref[:, sl] = jnp.dot(p.astype(jnp.bfloat16), vb[:, sl],
                               preferred_element_type=jnp.float32)


def _stylize(y, scale, shift, g, b, w_out, b_out):
    """StylizationBlock: LN(y)*(1+scale)+shift -> SiLU -> Linear."""
    hn = _layernorm(y, g, b)
    hn = _silu(hn * (1.0 + scale) + shift)
    return jnp.dot(hn.astype(jnp.bfloat16), w_out,
                   preferred_element_type=jnp.float32) + b_out


# ----------------------------------------------------------------------------
# generic row x column tiled linear kernel (embeddings / stylization / output)
# ----------------------------------------------------------------------------
def _linear_kernel(x_ref, w_ref, b_ref, o_ref, *, act_in):
    x = x_ref[...]
    if act_in == "silu":
        x = _silu(x)
    o_ref[...] = jnp.dot(x.astype(jnp.bfloat16), w_ref[...],
                         preferred_element_type=jnp.float32) + b_ref[...]


def pallas_linear(x, w, b, act_in=None, *, tile_m=256, tile_n=512):
    """y = (act_in(x)) @ w + b.  x: (..., K) f32, w: (K, N) bf16, b: (N,) f32.
    Tiled over rows and output columns; non-divisible extents handled by
    pl.cdiv grids (padded edge blocks, masked writes)."""
    lead = x.shape[:-1]
    K = x.shape[-1]
    N = w.shape[-1]
    x2 = x.reshape(-1, K)
    M = x2.shape[0]
    tm = M if M <= tile_m else tile_m
    tn = N if N <= tile_n else tile_n
    out = pl.pallas_call(
        functools.partial(_linear_kernel, act_in=act_in),
        grid=(pl.cdiv(M, tm), pl.cdiv(N, tn)),
        in_specs=[pl.BlockSpec((tm, K), lambda i, j: (i, 0)),
                  pl.BlockSpec((K, tn), lambda i, j: (0, j)),
                  pl.BlockSpec((1, tn), lambda i, j: (0, j))],
        out_specs=pl.BlockSpec((tm, tn), lambda i, j: (i, j)),
        out_shape=jax.ShapeDtypeStruct((M, N), jnp.float32),
        compiler_params=pltpu.CompilerParams(
            dimension_semantics=("parallel", "parallel"),
            vmem_limit_bytes=32 * 1024 * 1024),
    )(x2, w, b.reshape(1, N))
    return out.reshape(*lead, N)


# ----------------------------------------------------------------------------
# fused decoder stack: one kernel, grid = (batch, layer)
# ----------------------------------------------------------------------------
def _decoder_stack_kernel(
        h_ref, xf_ref, sty_ref, ln_d_ref, ln_t_ref,
        wqkv_ref, bqkv_ref, wsao_ref, bsao_ref,
        wcaq_ref, bcaq_ref, wcakv_ref, bcakv_ref, wcao_ref, bcao_ref,
        wff1_ref, bff1_ref, wff2_ref, bff2_ref, wffo_ref, bffo_ref,
        o_ref, y_scr, *, num_heads):
    layer = pl.program_id(1)

    # The output block keeps the same index across the layer axis, so it is
    # VMEM-resident and carries h across layers; seed it from the input h.
    @pl.when(layer == 0)
    def _():
        o_ref[...] = h_ref[...]

    x = o_ref[...]                          # (T, D)
    T, D = x.shape
    dh = D // num_heads

    sty = sty_ref[...]                      # (6, D): sa/ca/ff (scale, shift)
    lnd = ln_d_ref[...]                     # (10, D): LN gammas/betas (latent)
    lnt = ln_t_ref[...]                     # (2, L):  text LN gamma/beta

    # --- TemporalSelfAttention --------------------------------------------
    # NOTE: reference adds (1 - src_mask)*-1e5 per query row; it is constant
    # along the softmax (key) axis and values are not masked -> no-op.
    xn = _layernorm(x, lnd[0:1], lnd[1:2])
    qkv = jnp.dot(xn.astype(jnp.bfloat16), wqkv_ref[...],
                  preferred_element_type=jnp.float32) + bqkv_ref[...]
    _attention_into(y_scr, qkv[:, :D], qkv[:, D:2 * D], qkv[:, 2 * D:],
                    num_heads, dh)
    x = x + _stylize(y_scr[...], sty[0:1], sty[1:2], lnd[2:3], lnd[3:4],
                     wsao_ref[...], bsao_ref[...])

    # --- TemporalCrossAttention --------------------------------------------
    xn = _layernorm(x, lnd[4:5], lnd[5:6])
    xfn = _layernorm(xf_ref[...], lnt[0:1], lnt[1:2])
    q = jnp.dot(xn.astype(jnp.bfloat16), wcaq_ref[...],
                preferred_element_type=jnp.float32) + bcaq_ref[...]
    kv = jnp.dot(xfn.astype(jnp.bfloat16), wcakv_ref[...],
                 preferred_element_type=jnp.float32) + bcakv_ref[...]
    _attention_into(y_scr, q, kv[:, :D], kv[:, D:], num_heads, dh)
    x = x + _stylize(y_scr[...], sty[2:3], sty[3:4], lnd[6:7], lnd[7:8],
                     wcao_ref[...], bcao_ref[...])

    # --- FFN (row-chunked so the f32 GELU intermediate stays small) ---------
    w1 = wff1_ref[...]
    b1 = bff1_ref[...]
    w2 = wff2_ref[...]
    b2 = bff2_ref[...]
    rc = min(T, 128)
    for r0 in range(0, T, rc):
        r1 = min(r0 + rc, T)
        h1 = _gelu(jnp.dot(x[r0:r1].astype(jnp.bfloat16), w1,
                           preferred_element_type=jnp.float32) + b1)
        y_scr[r0:r1, :] = jnp.dot(h1.astype(jnp.bfloat16), w2,
                                  preferred_element_type=jnp.float32) + b2
    x = x + _stylize(y_scr[...], sty[4:5], sty[5:6], lnd[8:9], lnd[9:10],
                     wffo_ref[...], bffo_ref[...])

    o_ref[...] = x


def decoder_stack(h, xf, sty, dp, *, num_heads):
    """h: (B,T,D), xf: (B,N,L), sty: (B,NL,6,D) scale/shift per sub-block."""
    B, T, D = h.shape
    N, L = xf.shape[1], xf.shape[2]
    NL = dp["w_qkv"].shape[0]
    F = dp["w_ff1"].shape[-1]
    sty3 = sty.reshape(B * NL, 6, D)

    b_idx = lambda b, l: (b, 0, 0)                     # per-batch blocks
    l_idx = lambda b, l: (l, 0, 0)                     # per-layer blocks
    s_idx = lambda b, l: (b * NL + l, 0, 0)            # per (batch, layer)

    in_specs = [
        pl.BlockSpec((None, T, D), b_idx),             # h (aliased to output)
        pl.BlockSpec((None, N, L), b_idx),             # xf
        pl.BlockSpec((None, 6, D), s_idx),             # stylization scale/shift
        pl.BlockSpec((None, 10, D), l_idx),            # latent LN params
        pl.BlockSpec((None, 2, L), l_idx),             # text LN params
        pl.BlockSpec((None, D, 3 * D), l_idx),         # w_qkv (bf16)
        pl.BlockSpec((None, 1, 3 * D), l_idx),         # b_qkv
        pl.BlockSpec((None, D, D), l_idx),             # w_sa_out (bf16)
        pl.BlockSpec((None, 1, D), l_idx),             # b_sa_out
        pl.BlockSpec((None, D, D), l_idx),             # w_ca_q (bf16)
        pl.BlockSpec((None, 1, D), l_idx),             # b_ca_q
        pl.BlockSpec((None, L, 2 * D), l_idx),         # w_ca_kv (bf16)
        pl.BlockSpec((None, 1, 2 * D), l_idx),         # b_ca_kv
        pl.BlockSpec((None, D, D), l_idx),             # w_ca_out (bf16)
        pl.BlockSpec((None, 1, D), l_idx),             # b_ca_out
        pl.BlockSpec((None, D, F), l_idx),             # w_ff1 (bf16)
        pl.BlockSpec((None, 1, F), l_idx),             # b_ff1
        pl.BlockSpec((None, F, D), l_idx),             # w_ff2 (bf16)
        pl.BlockSpec((None, 1, D), l_idx),             # b_ff2
        pl.BlockSpec((None, D, D), l_idx),             # w_ff_out (bf16)
        pl.BlockSpec((None, 1, D), l_idx),             # b_ff_out
    ]
    return pl.pallas_call(
        functools.partial(_decoder_stack_kernel, num_heads=num_heads),
        grid=(B, NL),
        in_specs=in_specs,
        out_specs=pl.BlockSpec((None, T, D), b_idx),
        out_shape=jax.ShapeDtypeStruct((B, T, D), jnp.float32),
        scratch_shapes=[pltpu.VMEM((T, D), jnp.float32)],
        input_output_aliases={0: 0},
        compiler_params=pltpu.CompilerParams(
            dimension_semantics=("parallel", "arbitrary"),
            vmem_limit_bytes=48 * 1024 * 1024),
    )(h, xf, sty3,
      dp["ln_d"], dp["ln_t"],
      dp["w_qkv"], dp["b_qkv"], dp["w_sa_out"], dp["b_sa_out"],
      dp["w_ca_q"], dp["b_ca_q"], dp["w_ca_kv"], dp["b_ca_kv"],
      dp["w_ca_out"], dp["b_ca_out"],
      dp["w_ff1"], dp["b_ff1"], dp["w_ff2"], dp["b_ff2"],
      dp["w_ff_out"], dp["b_ff_out"])


# ----------------------------------------------------------------------------
# Parameter initialization (deterministic; fused / stacked / pre-cast)
# ----------------------------------------------------------------------------
def _init_linear(key, fan_in, fan_out, scale=0.05):
    kw, kb = jax.random.split(key)
    w = jax.random.normal(kw, (fan_in, fan_out), jnp.float32) * scale
    b = jax.random.normal(kb, (fan_out,), jnp.float32) * scale
    return w, b


def init_params(key, *, input_feats, num_frames, latent_dim, ff_size,
                num_layers, num_heads, text_latent_dim):
    D = latent_dim
    E = 4 * D            # time_embed_dim
    F = ff_size
    L = text_latent_dim
    attn_scale = 1.0 / math.sqrt(D // num_heads)
    keys = iter(jax.random.split(key, 8 + 16 * num_layers))

    seq_emb = jax.random.normal(next(keys), (num_frames, D), jnp.float32)
    jw, jb = _init_linear(next(keys), input_feats, D)
    t1w, t1b = _init_linear(next(keys), D, E)
    t2w, t2b = _init_linear(next(keys), E, E)
    ow, ob = _init_linear(next(keys), D, input_feats)      # zero_module in ref

    wqkv, bqkv, wsao, bsao = [], [], [], []
    wcaq, bcaq, wcakv, bcakv, wcao, bcao = [], [], [], [], [], []
    wff1, bff1, wff2, bff2, wffo, bffo = [], [], [], [], [], []
    sty_w, sty_b = [], []

    for _ in range(num_layers):
        # --- self-attention (fused QKV; 1/sqrt(dh) folded into Q) -----------
        wq, bq = _init_linear(next(keys), D, D)
        wk, bk = _init_linear(next(keys), D, D)
        wv, bv = _init_linear(next(keys), D, D)
        wqkv.append(jnp.concatenate([wq * attn_scale, wk, wv], axis=1))
        bqkv.append(jnp.concatenate([bq * attn_scale, bk, bv]))
        ew, eb = _init_linear(next(keys), E, 2 * D)
        pw, pb = _init_linear(next(keys), D, D)             # zero_module in ref
        sty_w.append(ew); sty_b.append(eb); wsao.append(pw); bsao.append(pb)

        # --- cross-attention (fused KV) --------------------------------------
        cq, cbq = _init_linear(next(keys), D, D)
        ck, cbk = _init_linear(next(keys), L, D)
        cv, cbv = _init_linear(next(keys), L, D)
        wcaq.append(cq * attn_scale); bcaq.append(cbq * attn_scale)
        wcakv.append(jnp.concatenate([ck, cv], axis=1))
        bcakv.append(jnp.concatenate([cbk, cbv]))
        ew, eb = _init_linear(next(keys), E, 2 * D)
        pw, pb = _init_linear(next(keys), D, D)             # zero_module in ref
        sty_w.append(ew); sty_b.append(eb); wcao.append(pw); bcao.append(pb)

        # --- FFN --------------------------------------------------------------
        w1, b1 = _init_linear(next(keys), D, F)
        w2, b2 = _init_linear(next(keys), F, D)             # zero_module in ref
        wff1.append(w1); bff1.append(b1); wff2.append(w2); bff2.append(b2)
        ew, eb = _init_linear(next(keys), E, 2 * D)
        pw, pb = _init_linear(next(keys), D, D)             # zero_module in ref
        sty_w.append(ew); sty_b.append(eb); wffo.append(pw); bffo.append(pb)

    def stack_w(lst):
        return jnp.stack(lst).astype(jnp.bfloat16)

    def stack_b(lst, dim):
        return jnp.stack(lst).reshape(num_layers, 1, dim)

    # LayerNorm params packed as stacked rows (all gamma=1, beta=0 at init):
    # [sa_g, sa_b, sa_sty_g, sa_sty_b, ca_g, ca_b, ca_sty_g, ca_sty_b,
    #  ff_sty_g, ff_sty_b]
    pat_d = jnp.tile(jnp.array([1.0, 0.0], jnp.float32), 5)           # (10,)
    ln_d = jnp.broadcast_to(pat_d[None, :, None], (num_layers, 10, D))
    ln_d = ln_d + jnp.zeros((num_layers, 10, D), jnp.float32)
    pat_t = jnp.array([1.0, 0.0], jnp.float32)
    ln_t = jnp.broadcast_to(pat_t[None, :, None], (num_layers, 2, L))
    ln_t = ln_t + jnp.zeros((num_layers, 2, L), jnp.float32)

    return {
        "sequence_embedding": seq_emb,
        "joint_w": jw.astype(jnp.bfloat16), "joint_b": jb,
        "t1_w": t1w.astype(jnp.bfloat16), "t1_b": t1b,
        "t2_w": t2w.astype(jnp.bfloat16), "t2_b": t2b,
        "out_w": ow.astype(jnp.bfloat16), "out_b": ob,
        # all StylizationBlock emb_layers stacked into one matmul
        "sty_emb_w": jnp.concatenate(sty_w, axis=1).astype(jnp.bfloat16),
        "sty_emb_b": jnp.concatenate(sty_b, axis=0),
        "dec": {
            "ln_d": ln_d, "ln_t": ln_t,
            "w_qkv": stack_w(wqkv), "b_qkv": stack_b(bqkv, 3 * D),
            "w_sa_out": stack_w(wsao), "b_sa_out": stack_b(bsao, D),
            "w_ca_q": stack_w(wcaq), "b_ca_q": stack_b(bcaq, D),
            "w_ca_kv": stack_w(wcakv), "b_ca_kv": stack_b(bcakv, 2 * D),
            "w_ca_out": stack_w(wcao), "b_ca_out": stack_b(bcao, D),
            "w_ff1": stack_w(wff1), "b_ff1": stack_b(bff1, F),
            "w_ff2": stack_w(wff2), "b_ff2": stack_b(bff2, D),
            "w_ff_out": stack_w(wffo), "b_ff_out": stack_b(bffo, D),
        },
    }


# ----------------------------------------------------------------------------
# model forward (glue in JAX under jit, hot paths in fused Pallas kernels)
# ----------------------------------------------------------------------------
def timestep_embedding(timesteps, dim, max_period=10000):
    half = dim // 2
    freqs = jnp.exp(-math.log(max_period) *
                    jnp.arange(half, dtype=jnp.float32) / half)
    args = timesteps.astype(jnp.float32)[:, None] * freqs[None]
    emb = jnp.concatenate([jnp.cos(args), jnp.sin(args)], axis=-1)
    if dim % 2:
        emb = jnp.concatenate([emb, jnp.zeros_like(emb[:, :1])], axis=-1)
    return emb


def motion_transformer_forward(params, x, timesteps, length, xf_proj, xf_out,
                               *, num_heads):
    """x: (B, T, input_feats) -> (B, T, input_feats)."""
    del length  # reference mask is softmax-shift-invariant (no-op); see kernel
    B, T, _ = x.shape
    D = params["sequence_embedding"].shape[-1]
    NL = params["dec"]["w_qkv"].shape[0]

    # emb = time_embed(timestep_embedding(t)) + xf_proj
    te = timestep_embedding(timesteps, D)
    h1 = pallas_linear(te, params["t1_w"], params["t1_b"])
    emb = pallas_linear(h1, params["t2_w"], params["t2_b"], act_in="silu")
    emb = emb + xf_proj

    # all StylizationBlock scale/shift pairs in one (N-tiled) matmul
    sty = pallas_linear(emb, params["sty_emb_w"], params["sty_emb_b"],
                        act_in="silu")                       # (B, NL*6*D)
    sty = sty.reshape(B, NL, 6, D)

    # h = joint_embed(x) + sequence_embedding[:T]
    h = pallas_linear(x, params["joint_w"], params["joint_b"])
    h = h + params["sequence_embedding"][None, :T, :]

    # the entire decoder stack in one fused pallas_call (grid = batch x layer)
    h = decoder_stack(h, xf_out, sty, params["dec"], num_heads=num_heads)

    # output projection (zero_module in the reference)
    return pallas_linear(h, params["out_w"], params["out_b"])


# ----------------------------------------------------------------------------
# main
# ----------------------------------------------------------------------------
if __name__ == "__main__":
    # small, lane-aligned demo config (feature dims are multiples of 128)
    B, T = 2, 16
    input_feats = 12
    num_frames = 32
    latent_dim = 128
    ff_size = 256
    num_layers = 2
    num_heads = 4
    text_latent_dim = 128
    N_text = 8
    time_embed_dim = latent_dim * 4

    key = jax.random.PRNGKey(0)
    kp, kx, kxp, kxo = jax.random.split(key, 4)

    params = init_params(kp, input_feats=input_feats, num_frames=num_frames,
                         latent_dim=latent_dim, ff_size=ff_size,
                         num_layers=num_layers, num_heads=num_heads,
                         text_latent_dim=text_latent_dim)

    x = jax.random.normal(kx, (B, T, input_feats), jnp.float32)
    timesteps = jnp.array([3, 17], jnp.int32)
    length = jnp.array([16, 11], jnp.int32)
    # TODO(synk): the CLIP text encoder + text transformer (encode_text) has no
    # Pallas equivalent here; we use forward()'s supported precomputed
    # xf_proj / xf_out inputs instead.
    xf_proj = jax.random.normal(kxp, (B, time_embed_dim), jnp.float32) * 0.1
    xf_out = jax.random.normal(kxo, (B, N_text, text_latent_dim), jnp.float32)

    forward = jax.jit(functools.partial(motion_transformer_forward,
                                        num_heads=num_heads))
    out = forward(params, x, timesteps, length, xf_proj, xf_out)
    out = jax.block_until_ready(out)
    assert out.shape == (B, T, input_feats), out.shape
    assert bool(jnp.all(jnp.isfinite(out)))
    print("KERNEL_OK")
</pallas_src>

<mosaic_0001>
module attributes {stable_mosaic.version = 11 : i64} {
  func.func @_linear_kernel(%arg0: i32, %arg1: i32, %arg2: memref<2x512xf32, #tpu.memory_space<vmem>>, %arg3: memref<512x512xbf16, #tpu.memory_space<vmem>>, %arg4: memref<1x512xf32, #tpu.memory_space<vmem>>, %arg5: memref<2x512xf32, #tpu.memory_space<vmem>>) attributes {dimension_semantics = [#tpu.dimension_semantics<parallel>, #tpu.dimension_semantics<parallel>], iteration_bounds = array<i64: 1, 1>, scalar_prefetch = 0 : i64, scratch_operands = 0 : i64, tpu.core_type = #tpu.core_type<tc>, window_params = [{transform_indices = @transform_0, window_bounds = array<i64: 2, 512>}, {transform_indices = @transform_1, window_bounds = array<i64: 512, 512>}, {transform_indices = @transform_2, window_bounds = array<i64: 1, 512>}, {transform_indices = @transform_3, window_bounds = array<i64: 2, 512>}]} {
    %c0 = arith.constant 0 : index
    %c0_0 = arith.constant 0 : index
    %0 = vector.load %arg2[%c0, %c0_0] : memref<2x512xf32, #tpu.memory_space<vmem>>, vector<2x512xf32>
    %cst = arith.constant 0.000000e+00 : f32
    %1 = vector.broadcast %cst : f32 to vector<2x512xf32>
    %2 = arith.subf %1, %0 : vector<2x512xf32>
    %3 = math.exp %2 : vector<2x512xf32>
    %cst_1 = arith.constant 1.000000e+00 : f32
    %4 = vector.broadcast %cst_1 : f32 to vector<2x512xf32>
    %5 = arith.addf %4, %3 : vector<2x512xf32>
    %cst_2 = arith.constant 1.000000e+00 : f32
    %6 = vector.broadcast %cst_2 : f32 to vector<2x512xf32>
    %7 = arith.divf %6, %5 : vector<2x512xf32>
    %8 = arith.mulf %0, %7 : vector<2x512xf32>
    %9 = arith.truncf %8 : vector<2x512xf32> to vector<2x512xbf16>
    %c0_3 = arith.constant 0 : index
    %c0_4 = arith.constant 0 : index
    %10 = vector.load %arg3[%c0_3, %c0_4] : memref<512x512xbf16, #tpu.memory_space<vmem>>, vector<512x512xbf16>
    %cst_5 = arith.constant dense<0.000000e+00> : vector<2x512xf32>
    %11 = tpu.matmul %9, %10, %cst_5 {dimension_numbers = #tpu.dot_dimension_numbers<[1], [0], [0], [1], [0, 0, 1, 1], [], []>} : vector<2x512xbf16>, vector<512x512xbf16>, vector<2x512xf32> -> vector<2x512xf32>
    %c0_6 = arith.constant 0 : index
    %c0_7 = arith.constant 0 : index
    %12 = vector.load %arg4[%c0_6, %c0_7] : memref<1x512xf32, #tpu.memory_space<vmem>>, vector<1x512xf32>
    %13 = vector.broadcast %12 : vector<1x512xf32> to vector<2x512xf32>
    %14 = arith.addf %11, %13 : vector<2x512xf32>
    %c0_8 = arith.constant 0 : index
    %c0_9 = arith.constant 0 : index
    %15 = vector.load %arg5[%c0_8, %c0_9] : memref<2x512xf32, #tpu.memory_space<vmem>>, vector<2x512xf32>
    tpu.vector_store %arg5[%c0_8, %c0_9], %14 {strides = array<i32>} : memref<2x512xf32, #tpu.memory_space<vmem>>, vector<2x512xf32>,
    return
  }
  func.func @transform_0(%arg0: i32, %arg1: i32) -> (i32, i32) {
    %c0_i32 = arith.constant 0 : i32
    %c0_i32_0 = arith.constant 0 : i32
    return %arg0, %c0_i32 : i32, i32
  }
  func.func @transform_1(%arg0: i32, %arg1: i32) -> (i32, i32) {
    %c0_i32 = arith.constant 0 : i32
    %c0_i32_0 = arith.constant 0 : i32
    return %c0_i32, %arg1 : i32, i32
  }
  func.func @transform_2(%arg0: i32, %arg1: i32) -> (i32, i32) {
    %c0_i32 = arith.constant 0 : i32
    %c0_i32_0 = arith.constant 0 : i32
    return %c0_i32, %arg1 : i32, i32
  }
  func.func @transform_3(%arg0: i32, %arg1: i32) -> (i32, i32) {
    %c0_i32 = arith.constant 0 : i32
    return %arg0, %arg1 : i32, i32
  }
}

module attributes {stable_mosaic.version = 11 : i64} {
  func.func @_linear_kernel(%arg0: i32, %arg1: i32, %arg2: memref<2x128xf32, #tpu.memory_space<vmem>>, %arg3: memref<128x512xbf16, #tpu.memory_space<vmem>>, %arg4: memref<1x512xf32, #tpu.memory_space<vmem>>, %arg5: memref<2x512xf32, #tpu.memory_space<vmem>>) attributes {dimension_semantics = [#tpu.dimension_semantics<parallel>, #tpu.dimension_semantics<parallel>], iteration_bounds = array<i64: 1, 1>, scalar_prefetch = 0 : i64, scratch_operands = 0 : i64, tpu.core_type = #tpu.core_type<tc>, window_params = [{transform_indices = @transform_0, window_bounds = array<i64: 2, 128>}, {transform_indices = @transform_1, window_bounds = array<i64: 128, 512>}, {transform_indices = @transform_2, window_bounds = array<i64: 1, 512>}, {transform_indices = @transform_3, window_bounds = array<i64: 2, 512>}]} {
    %c0 = arith.constant 0 : index
    %c0_0 = arith.constant 0 : index
    %0 = vector.load %arg2[%c0, %c0_0] : memref<2x128xf32, #tpu.memory_space<vmem>>, vector<2x128xf32>
    %1 = arith.truncf %0 : vector<2x128xf32> to vector<2x128xbf16>
    %c0_1 = arith.constant 0 : index
    %c0_2 = arith.constant 0 : index
    %2 = vector.load %arg3[%c0_1, %c0_2] : memref<128x512xbf16, #tpu.memory_space<vmem>>, vector<128x512xbf16>
    %cst = arith.constant dense<0.000000e+00> : vector<2x512xf32>
    %3 = tpu.matmul %1, %2, %cst {dimension_numbers = #tpu.dot_dimension_numbers<[1], [0], [0], [1], [0, 0, 1, 1], [], []>} : vector<2x128xbf16>, vector<128x512xbf16>, vector<2x512xf32> -> vector<2x512xf32>
    %c0_3 = arith.constant 0 : index
    %c0_4 = arith.constant 0 : index
    %4 = vector.load %arg4[%c0_3, %c0_4] : memref<1x512xf32, #tpu.memory_space<vmem>>, vector<1x512xf32>
    %5 = vector.broadcast %4 : vector<1x512xf32> to vector<2x512xf32>
    %6 = arith.addf %3, %5 : vector<2x512xf32>
    %c0_5 = arith.constant 0 : index
    %c0_6 = arith.constant 0 : index
    %7 = vector.load %arg5[%c0_5, %c0_6] : memref<2x512xf32, #tpu.memory_space<vmem>>, vector<2x512xf32>
    tpu.vector_store %arg5[%c0_5, %c0_6], %6 {strides = array<i32>} : memref<2x512xf32, #tpu.memory_space<vmem>>, vector<2x512xf32>,
    return
  }
  func.func @transform_0(%arg0: i32, %arg1: i32) -> (i32, i32) {
    %c0_i32 = arith.constant 0 : i32
    %c0_i32_0 = arith.constant 0 : i32
    return %arg0, %c0_i32 : i32, i32
  }
  func.func @transform_1(%arg0: i32, %arg1: i32) -> (i32, i32) {
    %c0_i32 = arith.constant 0 : i32
    %c0_i32_0 = arith.constant 0 : i32
    return %c0_i32, %arg1 : i32, i32
  }
  func.func @transform_2(%arg0: i32, %arg1: i32) -> (i32, i32) {
    %c0_i32 = arith.constant 0 : i32
    %c0_i32_0 = arith.constant 0 : i32
    return %c0_i32, %arg1 : i32, i32
  }
  func.func @transform_3(%arg0: i32, %arg1: i32) -> (i32, i32) {
    %c0_i32 = arith.constant 0 : i32
    return %arg0, %arg1 : i32, i32
  }
}

module attributes {stable_mosaic.version = 11 : i64} {
  func.func @_linear_kernel(%arg0: i32, %arg1: i32, %arg2: memref<2x512xf32, #tpu.memory_space<vmem>>, %arg3: memref<512x512xbf16, #tpu.memory_space<vmem>>, %arg4: memref<1x512xf32, #tpu.memory_space<vmem>>, %arg5: memref<2x512xf32, #tpu.memory_space<vmem>>) attributes {dimension_semantics = [#tpu.dimension_semantics<parallel>, #tpu.dimension_semantics<parallel>], iteration_bounds = array<i64: 1, 3>, scalar_prefetch = 0 : i64, scratch_operands = 0 : i64, tpu.core_type = #tpu.core_type<tc>, window_params = [{transform_indices = @transform_0, window_bounds = array<i64: 2, 512>}, {transform_indices = @transform_1, window_bounds = array<i64: 512, 512>}, {transform_indices = @transform_2, window_bounds = array<i64: 1, 512>}, {transform_indices = @transform_3, window_bounds = array<i64: 2, 512>}]} {
    %c0 = arith.constant 0 : index
    %c0_0 = arith.constant 0 : index
    %0 = vector.load %arg2[%c0, %c0_0] : memref<2x512xf32, #tpu.memory_space<vmem>>, vector<2x512xf32>
    %cst = arith.constant 0.000000e+00 : f32
    %1 = vector.broadcast %cst : f32 to vector<2x512xf32>
    %2 = arith.subf %1, %0 : vector<2x512xf32>
    %3 = math.exp %2 : vector<2x512xf32>
    %cst_1 = arith.constant 1.000000e+00 : f32
    %4 = vector.broadcast %cst_1 : f32 to vector<2x512xf32>
    %5 = arith.addf %4, %3 : vector<2x512xf32>
    %cst_2 = arith.constant 1.000000e+00 : f32
    %6 = vector.broadcast %cst_2 : f32 to vector<2x512xf32>
    %7 = arith.divf %6, %5 : vector<2x512xf32>
    %8 = arith.mulf %0, %7 : vector<2x512xf32>
    %9 = arith.truncf %8 : vector<2x512xf32> to vector<2x512xbf16>
    %c0_3 = arith.constant 0 : index
    %c0_4 = arith.constant 0 : index
    %10 = vector.load %arg3[%c0_3, %c0_4] : memref<512x512xbf16, #tpu.memory_space<vmem>>, vector<512x512xbf16>
    %cst_5 = arith.constant dense<0.000000e+00> : vector<2x512xf32>
    %11 = tpu.matmul %9, %10, %cst_5 {dimension_numbers = #tpu.dot_dimension_numbers<[1], [0], [0], [1], [0, 0, 1, 1], [], []>} : vector<2x512xbf16>, vector<512x512xbf16>, vector<2x512xf32> -> vector<2x512xf32>
    %c0_6 = arith.constant 0 : index
    %c0_7 = arith.constant 0 : index
    %12 = vector.load %arg4[%c0_6, %c0_7] : memref<1x512xf32, #tpu.memory_space<vmem>>, vector<1x512xf32>
    %13 = vector.broadcast %12 : vector<1x512xf32> to vector<2x512xf32>
    %14 = arith.addf %11, %13 : vector<2x512xf32>
    %c0_8 = arith.constant 0 : index
    %c0_9 = arith.constant 0 : index
    %15 = vector.load %arg5[%c0_8, %c0_9] : memref<2x512xf32, #tpu.memory_space<vmem>>, vector<2x512xf32>
    tpu.vector_store %arg5[%c0_8, %c0_9], %14 {strides = array<i32>} : memref<2x512xf32, #tpu.memory_space<vmem>>, vector<2x512xf32>,
    return
  }
  func.func @transform_0(%arg0: i32, %arg1: i32) -> (i32, i32) {
    %c0_i32 = arith.constant 0 : i32
    %c0_i32_0 = arith.constant 0 : i32
    return %arg0, %c0_i32 : i32, i32
  }
  func.func @transform_1(%arg0: i32, %arg1: i32) -> (i32, i32) {
    %c0_i32 = arith.constant 0 : i32
    %c0_i32_0 = arith.constant 0 : i32
    return %c0_i32, %arg1 : i32, i32
  }
  func.func @transform_2(%arg0: i32, %arg1: i32) -> (i32, i32) {
    %c0_i32 = arith.constant 0 : i32
    %c0_i32_0 = arith.constant 0 : i32
    return %c0_i32, %arg1 : i32, i32
  }
  func.func @transform_3(%arg0: i32, %arg1: i32) -> (i32, i32) {
    %c0_i32 = arith.constant 0 : i32
    return %arg0, %arg1 : i32, i32
  }
}

module attributes {stable_mosaic.version = 11 : i64} {
  func.func @_linear_kernel(%arg0: i32, %arg1: i32, %arg2: memref<32x12xf32, #tpu.memory_space<vmem>>, %arg3: memref<12x128xbf16, #tpu.memory_space<vmem>>, %arg4: memref<1x128xf32, #tpu.memory_space<vmem>>, %arg5: memref<32x128xf32, #tpu.memory_space<vmem>>) attributes {dimension_semantics = [#tpu.dimension_semantics<parallel>, #tpu.dimension_semantics<parallel>], iteration_bounds = array<i64: 1, 1>, scalar_prefetch = 0 : i64, scratch_operands = 0 : i64, tpu.core_type = #tpu.core_type<tc>, window_params = [{transform_indices = @transform_0, window_bounds = array<i64: 32, 12>}, {transform_indices = @transform_1, window_bounds = array<i64: 12, 128>}, {transform_indices = @transform_2, window_bounds = array<i64: 1, 128>}, {transform_indices = @transform_3, window_bounds = array<i64: 32, 128>}]} {
    %c0 = arith.constant 0 : index
    %c0_0 = arith.constant 0 : index
    %0 = vector.load %arg2[%c0, %c0_0] : memref<32x12xf32, #tpu.memory_space<vmem>>, vector<32x12xf32>
    %1 = arith.truncf %0 : vector<32x12xf32> to vector<32x12xbf16>
    %c0_1 = arith.constant 0 : index
    %c0_2 = arith.constant 0 : index
    %2 = vector.load %arg3[%c0_1, %c0_2] : memref<12x128xbf16, #tpu.memory_space<vmem>>, vector<12x128xbf16>
    %cst = arith.constant dense<0.000000e+00> : vector<32x128xf32>
    %3 = tpu.matmul %1, %2, %cst {dimension_numbers = #tpu.dot_dimension_numbers<[1], [0], [0], [1], [0, 0, 1, 1], [], []>} : vector<32x12xbf16>, vector<12x128xbf16>, vector<32x128xf32> -> vector<32x128xf32>
    %c0_3 = arith.constant 0 : index
    %c0_4 = arith.constant 0 : index
    %4 = vector.load %arg4[%c0_3, %c0_4] : memref<1x128xf32, #tpu.memory_space<vmem>>, vector<1x128xf32>
    %5 = vector.broadcast %4 : vector<1x128xf32> to vector<32x128xf32>
    %6 = arith.addf %3, %5 : vector<32x128xf32>
    %c0_5 = arith.constant 0 : index
    %c0_6 = arith.constant 0 : index
    %7 = vector.load %arg5[%c0_5, %c0_6] : memref<32x128xf32, #tpu.memory_space<vmem>>, vector<32x128xf32>
    tpu.vector_store %arg5[%c0_5, %c0_6], %6 {strides = array<i32>} : memref<32x128xf32, #tpu.memory_space<vmem>>, vector<32x128xf32>,
    return
  }
  func.func @transform_0(%arg0: i32, %arg1: i32) -> (i32, i32) {
    %c0_i32 = arith.constant 0 : i32
    %c0_i32_0 = arith.constant 0 : i32
    return %arg0, %c0_i32 : i32, i32
  }
  func.func @transform_1(%arg0: i32, %arg1: i32) -> (i32, i32) {
    %c0_i32 = arith.constant 0 : i32
    %c0_i32_0 = arith.constant 0 : i32
    return %c0_i32, %arg1 : i32, i32
  }
  func.func @transform_2(%arg0: i32, %arg1: i32) -> (i32, i32) {
    %c0_i32 = arith.constant 0 : i32
    %c0_i32_0 = arith.constant 0 : i32
    return %c0_i32, %arg1 : i32, i32
  }
  func.func @transform_3(%arg0: i32, %arg1: i32) -> (i32, i32) {
    %c0_i32 = arith.constant 0 : i32
    return %arg0, %arg1 : i32, i32
  }
}

module attributes {stable_mosaic.version = 11 : i64} {
  func.func @_linear_kernel(%arg0: i32, %arg1: i32, %arg2: memref<32x128xf32, #tpu.memory_space<vmem>>, %arg3: memref<128x12xbf16, #tpu.memory_space<vmem>>, %arg4: memref<1x12xf32, #tpu.memory_space<vmem>>, %arg5: memref<32x12xf32, #tpu.memory_space<vmem>>) attributes {dimension_semantics = [#tpu.dimension_semantics<parallel>, #tpu.dimension_semantics<parallel>], iteration_bounds = array<i64: 1, 1>, scalar_prefetch = 0 : i64, scratch_operands = 0 : i64, tpu.core_type = #tpu.core_type<tc>, window_params = [{transform_indices = @transform_0, window_bounds = array<i64: 32, 128>}, {transform_indices = @transform_1, window_bounds = array<i64: 128, 12>}, {transform_indices = @transform_2, window_bounds = array<i64: 1, 12>}, {transform_indices = @transform_3, window_bounds = array<i64: 32, 12>}]} {
    %c0 = arith.constant 0 : index
    %c0_0 = arith.constant 0 : index
    %0 = vector.load %arg2[%c0, %c0_0] : memref<32x128xf32, #tpu.memory_space<vmem>>, vector<32x128xf32>
    %1 = arith.truncf %0 : vector<32x128xf32> to vector<32x128xbf16>
    %c0_1 = arith.constant 0 : index
    %c0_2 = arith.constant 0 : index
    %2 = vector.load %arg3[%c0_1, %c0_2] : memref<128x12xbf16, #tpu.memory_space<vmem>>, vector<128x12xbf16>
    %cst = arith.constant dense<0.000000e+00> : vector<32x12xf32>
    %3 = tpu.matmul %1, %2, %cst {dimension_numbers = #tpu.dot_dimension_numbers<[1], [0], [0], [1], [0, 0, 1, 1], [], []>} : vector<32x128xbf16>, vector<128x12xbf16>, vector<32x12xf32> -> vector<32x12xf32>
    %c0_3 = arith.constant 0 : index
    %c0_4 = arith.constant 0 : index
    %4 = vector.load %arg4[%c0_3, %c0_4] : memref<1x12xf32, #tpu.memory_space<vmem>>, vector<1x12xf32>
    %5 = vector.broadcast %4 : vector<1x12xf32> to vector<32x12xf32>
    %6 = arith.addf %3, %5 : vector<32x12xf32>
    %c0_5 = arith.constant 0 : index
    %c0_6 = arith.constant 0 : index
    %7 = vector.load %arg5[%c0_5, %c0_6] : memref<32x12xf32, #tpu.memory_space<vmem>>, vector<32x12xf32>
    tpu.vector_store %arg5[%c0_5, %c0_6], %6 {strides = array<i32>} : memref<32x12xf32, #tpu.memory_space<vmem>>, vector<32x12xf32>,
    return
  }
  func.func @transform_0(%arg0: i32, %arg1: i32) -> (i32, i32) {
    %c0_i32 = arith.constant 0 : i32
    %c0_i32_0 = arith.constant 0 : i32
    return %arg0, %c0_i32 : i32, i32
  }
  func.func @transform_1(%arg0: i32, %arg1: i32) -> (i32, i32) {
    %c0_i32 = arith.constant 0 : i32
    %c0_i32_0 = arith.constant 0 : i32
    return %c0_i32, %arg1 : i32, i32
  }
  func.func @transform_2(%arg0: i32, %arg1: i32) -> (i32, i32) {
    %c0_i32 = arith.constant 0 : i32
    %c0_i32_0 = arith.constant 0 : i32
    return %c0_i32, %arg1 : i32, i32
  }
  func.func @transform_3(%arg0: i32, %arg1: i32) -> (i32, i32) {
    %c0_i32 = arith.constant 0 : i32
    return %arg0, %arg1 : i32, i32
  }
}

module attributes {stable_mosaic.version = 11 : i64} {
  func.func @_decoder_stack_kernel(%arg0: i32, %arg1: i32, %arg2: memref<1x16x128xf32, #tpu.memory_space<vmem>>, %arg3: memref<1x8x128xf32, #tpu.memory_space<vmem>>, %arg4: memref<1x6x128xf32, #tpu.memory_space<vmem>>, %arg5: memref<1x10x128xf32, #tpu.memory_space<vmem>>, %arg6: memref<1x2x128xf32, #tpu.memory_space<vmem>>, %arg7: memref<1x128x384xbf16, #tpu.memory_space<vmem>>, %arg8: memref<1x1x384xf32, #tpu.memory_space<vmem>>, %arg9: memref<1x128x128xbf16, #tpu.memory_space<vmem>>, %arg10: memref<1x1x128xf32, #tpu.memory_space<vmem>>, %arg11: memref<1x128x128xbf16, #tpu.memory_space<vmem>>, %arg12: memref<1x1x128xf32, #tpu.memory_space<vmem>>, %arg13: memref<1x128x256xbf16, #tpu.memory_space<vmem>>, %arg14: memref<1x1x256xf32, #tpu.memory_space<vmem>>, %arg15: memref<1x128x128xbf16, #tpu.memory_space<vmem>>, %arg16: memref<1x1x128xf32, #tpu.memory_space<vmem>>, %arg17: memref<1x128x256xbf16, #tpu.memory_space<vmem>>, %arg18: memref<1x1x256xf32, #tpu.memory_space<vmem>>, %arg19: memref<1x256x128xbf16, #tpu.memory_space<vmem>>, %arg20: memref<1x1x128xf32, #tpu.memory_space<vmem>>, %arg21: memref<1x128x128xbf16, #tpu.memory_space<vmem>>, %arg22: memref<1x1x128xf32, #tpu.memory_space<vmem>>, %arg23: memref<1x16x128xf32, #tpu.memory_space<vmem>>, %arg24: memref<16x128xf32, #tpu.memory_space<vmem>>) attributes {dimension_semantics = [#tpu.dimension_semantics<parallel>, #tpu.dimension_semantics<arbitrary>], iteration_bounds = array<i64: 2, 2>, scalar_prefetch = 0 : i64, scratch_operands = 1 : i64, tpu.core_type = #tpu.core_type<tc>, window_params = [{transform_indices = @transform_0, window_bounds = array<i64: 1, 16, 128>}, {transform_indices = @transform_1, window_bounds = array<i64: 1, 8, 128>}, {transform_indices = @transform_2, window_bounds = array<i64: 1, 6, 128>}, {transform_indices = @transform_3, window_bounds = array<i64: 1, 10, 128>}, {transform_indices = @transform_4, window_bounds = array<i64: 1, 2, 128>}, {transform_indices = @transform_5, window_bounds = array<i64: 1, 128, 384>}, {transform_indices = @transform_6, window_bounds = array<i64: 1, 1, 384>}, {transform_indices = @transform_7, window_bounds = array<i64: 1, 128, 128>}, {transform_indices = @transform_8, window_bounds = array<i64: 1, 1, 128>}, {transform_indices = @transform_9, window_bounds = array<i64: 1, 128, 128>}, {transform_indices = @transform_10, window_bounds = array<i64: 1, 1, 128>}, {transform_indices = @transform_11, window_bounds = array<i64: 1, 128, 256>}, {transform_indices = @transform_12, window_bounds = array<i64: 1, 1, 256>}, {transform_indices = @transform_13, window_bounds = array<i64: 1, 128, 128>}, {transform_indices = @transform_14, window_bounds = array<i64: 1, 1, 128>}, {transform_indices = @transform_15, window_bounds = array<i64: 1, 128, 256>}, {transform_indices = @transform_16, window_bounds = array<i64: 1, 1, 256>}, {transform_indices = @transform_17, window_bounds = array<i64: 1, 256, 128>}, {transform_indices = @transform_18, window_bounds = array<i64: 1, 1, 128>}, {transform_indices = @transform_19, window_bounds = array<i64: 1, 128, 128>}, {transform_indices = @transform_20, window_bounds = array<i64: 1, 1, 128>}, {transform_indices = @transform_21, window_bounds = array<i64: 1, 16, 128>}]} {
    %c0_i32 = arith.constant 0 : i32
    %0 = arith.cmpi eq, %arg1, %c0_i32 : i32
    %1 = arith.extui %0 : i1 to i32
    %c0_i32_0 = arith.constant 0 : i32
    %2 = arith.cmpi ne, %1, %c0_i32_0 : i32
    scf.if %2 {
      %c0_172 = arith.constant 0 : index
      %c0_173 = arith.constant 0 : index
      %c0_174 = arith.constant 0 : index
      %439 = vector.load %arg2[%c0_172, %c0_173, %c0_174] : memref<1x16x128xf32, #tpu.memory_space<vmem>>, vector<1x16x128xf32>
      %440 = vector.shape_cast %439 : vector<1x16x128xf32> to vector<16x128xf32>
      %c0_175 = arith.constant 0 : index
      %c0_176 = arith.constant 0 : index
      %c0_177 = arith.constant 0 : index
      %441 = vector.load %arg23[%c0_175, %c0_176, %c0_177] : memref<1x16x128xf32, #tpu.memory_space<vmem>>, vector<1x16x128xf32>
      %442 = vector.shape_cast %441 : vector<1x16x128xf32> to vector<16x128xf32>
      %443 = vector.shape_cast %440 : vector<16x128xf32> to vector<1x16x128xf32>
      tpu.vector_store %arg23[%c0_175, %c0_176, %c0_177], %443 {strides = array<i32>} : memref<1x16x128xf32, #tpu.memory_space<vmem>>, vector<1x16x128xf32>,
    } else {
    }
    %c0 = arith.constant 0 : index
    %c0_1 = arith.constant 0 : index
    %c0_2 = arith.constant 0 : index
    %3 = vector.load %arg23[%c0, %c0_1, %c0_2] : memref<1x16x128xf32, #tpu.memory_space<vmem>>, vector<1x16x128xf32>
    %4 = vector.shape_cast %3 : vector<1x16x128xf32> to vector<16x128xf32>
    %c0_3 = arith.constant 0 : index
    %c0_4 = arith.constant 0 : index
    %c0_5 = arith.constant 0 : index
    %5 = vector.load %arg4[%c0_3, %c0_4, %c0_5] : memref<1x6x128xf32, #tpu.memory_space<vmem>>, vector<1x6x128xf32>
    %6 = vector.shape_cast %5 : vector<1x6x128xf32> to vector<6x128xf32>
    %c0_6 = arith.constant 0 : index
    %c0_7 = arith.constant 0 : index
    %c0_8 = arith.constant 0 : index
    %7 = vector.load %arg5[%c0_6, %c0_7, %c0_8] : memref<1x10x128xf32, #tpu.memory_space<vmem>>, vector<1x10x128xf32>
    %8 = vector.shape_cast %7 : vector<1x10x128xf32> to vector<10x128xf32>
    %c0_9 = arith.constant 0 : index
    %c0_10 = arith.constant 0 : index
    %c0_11 = arith.constant 0 : index
    %9 = vector.load %arg6[%c0_9, %c0_10, %c0_11] : memref<1x2x128xf32, #tpu.memory_space<vmem>>, vector<1x2x128xf32>
    %10 = vector.shape_cast %9 : vector<1x2x128xf32> to vector<2x128xf32>
    %11 = vector.extract_strided_slice %8 {offsets = [0, 0], sizes = [1, 128], strides = [1, 1]} : vector<10x128xf32> to vector<1x128xf32>
    %12 = vector.extract_strided_slice %8 {offsets = [1, 0], sizes = [1, 128], strides = [1, 1]} : vector<10x128xf32> to vector<1x128xf32>
    %cst = arith.constant dense<0.000000e+00> : vector<16xf32>
    %13 = vector.multi_reduction <add>, %4, %cst [1] : vector<16x128xf32> to vector<16xf32>
    %14 = vector.shape_cast %13 : vector<16xf32> to vector<16x1xf32>
    %cst_12 = arith.constant 1.280000e+02 : f32
    %15 = vector.broadcast %cst_12 : f32 to vector<16x1xf32>
    %16 = arith.divf %14, %15 : vector<16x1xf32>
    %17 = vector.broadcast %16 : vector<16x1xf32> to vector<16x128xf32>
    %18 = arith.subf %4, %17 : vector<16x128xf32>
    %19 = arith.mulf %18, %18 : vector<16x128xf32>
    %cst_13 = arith.constant dense<0.000000e+00> : vector<16xf32>
    %20 = vector.multi_reduction <add>, %19, %cst_13 [1] : vector<16x128xf32> to vector<16xf32>
    %21 = vector.shape_cast %20 : vector<16xf32> to vector<16x1xf32>
    %cst_14 = arith.constant 1.280000e+02 : f32
    %22 = vector.broadcast %cst_14 : f32 to vector<16x1xf32>
    %23 = arith.divf %21, %22 : vector<16x1xf32>
    %24 = vector.broadcast %16 : vector<16x1xf32> to vector<16x128xf32>
    %25 = arith.subf %4, %24 : vector<16x128xf32>
    %cst_15 = arith.constant 9.99999974E-6 : f32
    %26 = vector.broadcast %cst_15 : f32 to vector<16x1xf32>
    %27 = arith.addf %23, %26 : vector<16x1xf32>
    %28 = math.rsqrt %27 : vector<16x1xf32>
    %29 = vector.broadcast %28 : vector<16x1xf32> to vector<16x128xf32>
    %30 = arith.mulf %25, %29 : vector<16x128xf32>
    %31 = vector.broadcast %11 : vector<1x128xf32> to vector<16x128xf32>
    %32 = arith.mulf %30, %31 : vector<16x128xf32>
    %33 = vector.broadcast %12 : vector<1x128xf32> to vector<16x128xf32>
    %34 = arith.addf %32, %33 : vector<16x128xf32>
    %35 = arith.truncf %34 : vector<16x128xf32> to vector<16x128xbf16>
    %c0_16 = arith.constant 0 : index
    %c0_17 = arith.constant 0 : index
    %c0_18 = arith.constant 0 : index
    %36 = vector.load %arg7[%c0_16, %c0_17, %c0_18] : memref<1x128x384xbf16, #tpu.memory_space<vmem>>, vector<1x128x384xbf16>
    %37 = vector.shape_cast %36 : vector<1x128x384xbf16> to vector<128x384xbf16>
    %cst_19 = arith.constant dense<0.000000e+00> : vector<16x384xf32>
    %38 = tpu.matmul %35, %37, %cst_19 {dimension_numbers = #tpu.dot_dimension_numbers<[1], [0], [0], [1], [0, 0, 1, 1], [], []>} : vector<16x128xbf16>, vector<128x384xbf16>, vector<16x384xf32> -> vector<16x384xf32>
    %c0_20 = arith.constant 0 : index
    %c0_21 = arith.constant 0 : index
    %c0_22 = arith.constant 0 : index
    %39 = vector.load %arg8[%c0_20, %c0_21, %c0_22] : memref<1x1x384xf32, #tpu.memory_space<vmem>>, vector<1x1x384xf32>
    %40 = vector.shape_cast %39 : vector<1x1x384xf32> to vector<1x384xf32>
    %41 = vector.broadcast %40 : vector<1x384xf32> to vector<16x384xf32>
    %42 = arith.addf %38, %41 : vector<16x384xf32>
    %43 = vector.extract_strided_slice %42 {offsets = [0, 0], sizes = [16, 128], strides = [1, 1]} : vector<16x384xf32> to vector<16x128xf32>
    %44 = vector.extract_strided_slice %42 {offsets = [0, 128], sizes = [16, 128], strides = [1, 1]} : vector<16x384xf32> to vector<16x128xf32>
    %45 = vector.extract_strided_slice %42 {offsets = [0, 256], sizes = [16, 128], strides = [1, 1]} : vector<16x384xf32> to vector<16x128xf32>
    %46 = arith.truncf %43 : vector<16x128xf32> to vector<16x128xbf16>
    %47 = arith.truncf %44 : vector<16x128xf32> to vector<16x128xbf16>
    %48 = arith.truncf %45 : vector<16x128xf32> to vector<16x128xbf16>
    %49 = vector.extract_strided_slice %46 {offsets = [0, 0], sizes = [16, 32], strides = [1, 1]} : vector<16x128xbf16> to vector<16x32xbf16>
    %50 = vector.extract_strided_slice %47 {offsets = [0, 0], sizes = [16, 32], strides = [1, 1]} : vector<16x128xbf16> to vector<16x32xbf16>
    %cst_23 = arith.constant dense<0.000000e+00> : vector<16x16xf32>
    %51 = tpu.matmul %49, %50, %cst_23 {dimension_numbers = #tpu.dot_dimension_numbers<[1], [1], [0], [0], [0, 0, 1, 0], [], []>} : vector<16x32xbf16>, vector<16x32xbf16>, vector<16x16xf32> -> vector<16x16xf32>
    %cst_24 = arith.constant dense<0xFF800000> : vector<16xf32>
    %52 = vector.multi_reduction <maximumf>, %51, %cst_24 [1] : vector<16x16xf32> to vector<16xf32>
    %53 = vector.shape_cast %52 : vector<16xf32> to vector<16x1xf32>
    %54 = vector.broadcast %53 : vector<16x1xf32> to vector<16x16xf32>
    %55 = arith.subf %51, %54 : vector<16x16xf32>
    %56 = math.exp %55 : vector<16x16xf32>
    %cst_25 = arith.constant dense<0.000000e+00> : vector<16xf32>
    %57 = vector.multi_reduction <add>, %56, %cst_25 [1] : vector<16x16xf32> to vector<16xf32>
    %58 = vector.shape_cast %57 : vector<16xf32> to vector<16x1xf32>
    %59 = tpu.reciprocal %58 {approx = true} : vector<16x1xf32> -> vector<16x1xf32>
    %60 = vector.broadcast %59 : vector<16x1xf32> to vector<16x16xf32>
    %61 = arith.mulf %56, %60 : vector<16x16xf32>
    %62 = arith.truncf %61 : vector<16x16xf32> to vector<16x16xbf16>
    %63 = vector.extract_strided_slice %48 {offsets = [0, 0], sizes = [16, 32], strides = [1, 1]} : vector<16x128xbf16> to vector<16x32xbf16>
    %cst_26 = arith.constant dense<0.000000e+00> : vector<16x32xf32>
    %64 = tpu.matmul %62, %63, %cst_26 {dimension_numbers = #tpu.dot_dimension_numbers<[1], [0], [0], [1], [0, 0, 1, 1], [], []>} : vector<16x16xbf16>, vector<16x32xbf16>, vector<16x32xf32> -> vector<16x32xf32>
    %c0_27 = arith.constant 0 : index
    %c0_28 = arith.constant 0 : index
    %65 = vector.load %arg24[%c0_27, %c0_28] : memref<16x128xf32, #tpu.memory_space<vmem>>, vector<16x32xf32>
    tpu.vector_store %arg24[%c0_27, %c0_28], %64 {strides = array<i32>} : memref<16x128xf32, #tpu.memory_space<vmem>>, vector<16x32xf32>,
    %66 = vector.extract_strided_slice %46 {offsets = [0, 32], sizes = [16, 32], strides = [1, 1]} : vector<16x128xbf16> to vector<16x32xbf16>
    %67 = vector.extract_strided_slice %47 {offsets = [0, 32], sizes = [16, 32], strides = [1, 1]} : vector<16x128xbf16> to vector<16x32xbf16>
    %cst_29 = arith.constant dense<0.000000e+00> : vector<16x16xf32>
    %68 = tpu.matmul %66, %67, %cst_29 {dimension_numbers = #tpu.dot_dimension_numbers<[1], [1], [0], [0], [0, 0, 1, 0], [], []>} : vector<16x32xbf16>, vector<16x32xbf16>, vector<16x16xf32> -> vector<16x16xf32>
    %cst_30 = arith.constant dense<0xFF800000> : vector<16xf32>
    %69 = vector.multi_reduction <maximumf>, %68, %cst_30 [1] : vector<16x16xf32> to vector<16xf32>
    %70 = vector.shape_cast %69 : vector<16xf32> to vector<16x1xf32>
    %71 = vector.broadcast %70 : vector<16x1xf32> to vector<16x16xf32>
    %72 = arith.subf %68, %71 : vector<16x16xf32>
    %73 = math.exp %72 : vector<16x16xf32>
    %cst_31 = arith.constant dense<0.000000e+00> : vector<16xf32>
    %74 = vector.multi_reduction <add>, %73, %cst_31 [1] : vector<16x16xf32> to vector<16xf32>
    %75 = vector.shape_cast %74 : vector<16xf32> to vector<16x1xf32>
    %76 = tpu.reciprocal %75 {approx = true} : vector<16x1xf32> -> vector<16x1xf32>
    %77 = vector.broadcast %76 : vector<16x1xf32> to vector<16x16xf32>
    %78 = arith.mulf %73, %77 : vector<16x16xf32>
    %79 = arith.truncf %78 : vector<16x16xf32> to vector<16x16xbf16>
    %80 = vector.extract_strided_slice %48 {offsets = [0, 32], sizes = [16, 32], strides = [1, 1]} : vector<16x128xbf16> to vector<16x32xbf16>
    %cst_32 = arith.constant dense<0.000000e+00> : vector<16x32xf32>
    %81 = tpu.matmul %79, %80, %cst_32 {dimension_numbers = #tpu.dot_dimension_numbers<[1], [0], [0], [1], [0, 0, 1, 1], [], []>} : vector<16x16xbf16>, vector<16x32xbf16>, vector<16x32xf32> -> vector<16x32xf32>
    %c0_33 = arith.constant 0 : index
    %c32 = arith.constant 32 : index
    %82 = vector.load %arg24[%c0_33, %c32] : memref<16x128xf32, #tpu.memory_space<vmem>>, vector<16x32xf32>
    tpu.vector_store %arg24[%c0_33, %c32], %81 {strides = array<i32>} : memref<16x128xf32, #tpu.memory_space<vmem>>, vector<16x32xf32>,
    %83 = vector.extract_strided_slice %46 {offsets = [0, 64], sizes = [16, 32], strides = [1, 1]} : vector<16x128xbf16> to vector<16x32xbf16>
    %84 = vector.extract_strided_slice %47 {offsets = [0, 64], sizes = [16, 32], strides = [1, 1]} : vector<16x128xbf16> to vector<16x32xbf16>
    %cst_34 = arith.constant dense<0.000000e+00> : vector<16x16xf32>
    %85 = tpu.matmul %83, %84, %cst_34 {dimension_numbers = #tpu.dot_dimension_numbers<[1], [1], [0], [0], [0, 0, 1, 0], [], []>} : vector<16x32xbf16>, vector<16x32xbf16>, vector<16x16xf32> -> vector<16x16xf32>
    %cst_35 = arith.constant dense<0xFF800000> : vector<16xf32>
    %86 = vector.multi_reduction <maximumf>, %85, %cst_35 [1] : vector<16x16xf32> to vector<16xf32>
    %87 = vector.shape_cast %86 : vector<16xf32> to vector<16x1xf32>
    %88 = vector.broadcast %87 : vector<16x1xf32> to vector<16x16xf32>
    %89 = arith.subf %85, %88 : vector<16x16xf32>
    %90 = math.exp %89 : vector<16x16xf32>
    %cst_36 = arith.constant dense<0.000000e+00> : vector<16xf32>
    %91 = vector.multi_reduction <add>, %90, %cst_36 [1] : vector<16x16xf32> to vector<16xf32>
    %92 = vector.shape_cast %91 : vector<16xf32> to vector<16x1xf32>
    %93 = tpu.reciprocal %92 {approx = true} : vector<16x1xf32> -> vector<16x1xf32>
    %94 = vector.broadcast %93 : vector<16x1xf32> to vector<16x16xf32>
    %95 = arith.mulf %90, %94 : vector<16x16xf32>
    %96 = arith.truncf %95 : vector<16x16xf32> to vector<16x16xbf16>
    %97 = vector.extract_strided_slice %48 {offsets = [0, 64], sizes = [16, 32], strides = [1, 1]} : vector<16x128xbf16> to vector<16x32xbf16>
    %cst_37 = arith.constant dense<0.000000e+00> : vector<16x32xf32>
    %98 = tpu.matmul %96, %97, %cst_37 {dimension_numbers = #tpu.dot_dimension_numbers<[1], [0], [0], [1], [0, 0, 1, 1], [], []>} : vector<16x16xbf16>, vector<16x32xbf16>, vector<16x32xf32> -> vector<16x32xf32>
    %c0_38 = arith.constant 0 : index
    %c64 = arith.constant 64 : index
    %99 = vector.load %arg24[%c0_38, %c64] : memref<16x128xf32, #tpu.memory_space<vmem>>, vector<16x32xf32>
    tpu.vector_store %arg24[%c0_38, %c64], %98 {strides = array<i32>} : memref<16x128xf32, #tpu.memory_space<vmem>>, vector<16x32xf32>,
    %100 = vector.extract_strided_slice %46 {offsets = [0, 96], sizes = [16, 32], strides = [1, 1]} : vector<16x128xbf16> to vector<16x32xbf16>
    %101 = vector.extract_strided_slice %47 {offsets = [0, 96], sizes = [16, 32], strides = [1, 1]} : vector<16x128xbf16> to vector<16x32xbf16>
    %cst_39 = arith.constant dense<0.000000e+00> : vector<16x16xf32>
    %102 = tpu.matmul %100, %101, %cst_39 {dimension_numbers = #tpu.dot_dimension_numbers<[1], [1], [0], [0], [0, 0, 1, 0], [], []>} : vector<16x32xbf16>, vector<16x32xbf16>, vector<16x16xf32> -> vector<16x16xf32>
    %cst_40 = arith.constant dense<0xFF800000> : vector<16xf32>
    %103 = vector.multi_reduction <maximumf>, %102, %cst_40 [1] : vector<16x16xf32> to vector<16xf32>
    %104 = vector.shape_cast %103 : vector<16xf32> to vector<16x1xf32>
    %105 = vector.broadcast %104 : vector<16x1xf32> to vector<16x16xf32>
    %106 = arith.subf %102, %105 : vector<16x16xf32>
    %107 = math.exp %106 : vector<16x16xf32>
    %cst_41 = arith.constant dense<0.000000e+00> : vector<16xf32>
    %108 = vector.multi_reduction <add>, %107, %cst_41 [1] : vector<16x16xf32> to vector<16xf32>
    %109 = vector.shape_cast %108 : vector<16xf32> to vector<16x1xf32>
    %110 = tpu.reciprocal %109 {approx = true} : vector<16x1xf32> -> vector<16x1xf32>
    %111 = vector.broadcast %110 : vector<16x1xf32> to vector<16x16xf32>
    %112 = arith.mulf %107, %111 : vector<16x16xf32>
    %113 = arith.truncf %112 : vector<16x16xf32> to vector<16x16xbf16>
    %114 = vector.extract_strided_slice %48 {offsets = [0, 96], sizes = [16, 32], strides = [1, 1]} : vector<16x128xbf16> to vector<16x32xbf16>
    %cst_42 = arith.constant dense<0.000000e+00> : vector<16x32xf32>
    %115 = tpu.matmul %113, %114, %cst_42 {dimension_numbers = #tpu.dot_dimension_numbers<[1], [0], [0], [1], [0, 0, 1, 1], [], []>} : vector<16x16xbf16>, vector<16x32xbf16>, vector<16x32xf32> -> vector<16x32xf32>
    %c0_43 = arith.constant 0 : index
    %c96 = arith.constant 96 : index
    %116 = vector.load %arg24[%c0_43, %c96] : memref<16x128xf32, #tpu.memory_space<vmem>>, vector<16x32xf32>
    tpu.vector_store %arg24[%c0_43, %c96], %115 {strides = array<i32>} : memref<16x128xf32, #tpu.memory_space<vmem>>, vector<16x32xf32>,
    %c0_44 = arith.constant 0 : index
    %c0_45 = arith.constant 0 : index
    %117 = vector.load %arg24[%c0_44, %c0_45] : memref<16x128xf32, #tpu.memory_space<vmem>>, vector<16x128xf32>
    %118 = vector.extract_strided_slice %6 {offsets = [0, 0], sizes = [1, 128], strides = [1, 1]} : vector<6x128xf32> to vector<1x128xf32>
    %119 = vector.extract_strided_slice %6 {offsets = [1, 0], sizes = [1, 128], strides = [1, 1]} : vector<6x128xf32> to vector<1x128xf32>
    %120 = vector.extract_strided_slice %8 {offsets = [2, 0], sizes = [1, 128], strides = [1, 1]} : vector<10x128xf32> to vector<1x128xf32>
    %121 = vector.extract_strided_slice %8 {offsets = [3, 0], sizes = [1, 128], strides = [1, 1]} : vector<10x128xf32> to vector<1x128xf32>
    %c0_46 = arith.constant 0 : index
    %c0_47 = arith.constant 0 : index
    %c0_48 = arith.constant 0 : index
    %122 = vector.load %arg9[%c0_46, %c0_47, %c0_48] : memref<1x128x128xbf16, #tpu.memory_space<vmem>>, vector<1x128x128xbf16>
    %123 = vector.shape_cast %122 : vector<1x128x128xbf16> to vector<128x128xbf16>
    %c0_49 = arith.constant 0 : index
    %c0_50 = arith.constant 0 : index
    %c0_51 = arith.constant 0 : index
    %124 = vector.load %arg10[%c0_49, %c0_50, %c0_51] : memref<1x1x128xf32, #tpu.memory_space<vmem>>, vector<1x1x128xf32>
    %125 = vector.shape_cast %124 : vector<1x1x128xf32> to vector<1x128xf32>
    %cst_52 = arith.constant dense<0.000000e+00> : vector<16xf32>
    %126 = vector.multi_reduction <add>, %117, %cst_52 [1] : vector<16x128xf32> to vector<16xf32>
    %127 = vector.shape_cast %126 : vector<16xf32> to vector<16x1xf32>
    %cst_53 = arith.constant 1.280000e+02 : f32
    %128 = vector.broadcast %cst_53 : f32 to vector<16x1xf32>
    %129 = arith.divf %127, %128 : vector<16x1xf32>
    %130 = vector.broadcast %129 : vector<16x1xf32> to vector<16x128xf32>
    %131 = arith.subf %117, %130 : vector<16x128xf32>
    %132 = arith.mulf %131, %131 : vector<16x128xf32>
    %cst_54 = arith.constant dense<0.000000e+00> : vector<16xf32>
    %133 = vector.multi_reduction <add>, %132, %cst_54 [1] : vector<16x128xf32> to vector<16xf32>
    %134 = vector.shape_cast %133 : vector<16xf32> to vector<16x1xf32>
    %cst_55 = arith.constant 1.280000e+02 : f32
    %135 = vector.broadcast %cst_55 : f32 to vector<16x1xf32>
    %136 = arith.divf %134, %135 : vector<16x1xf32>
    %137 = vector.broadcast %129 : vector<16x1xf32> to vector<16x128xf32>
    %138 = arith.subf %117, %137 : vector<16x128xf32>
    %cst_56 = arith.constant 9.99999974E-6 : f32
    %139 = vector.broadcast %cst_56 : f32 to vector<16x1xf32>
    %140 = arith.addf %136, %139 : vector<16x1xf32>
    %141 = math.rsqrt %140 : vector<16x1xf32>
    %142 = vector.broadcast %141 : vector<16x1xf32> to vector<16x128xf32>
    %143 = arith.mulf %138, %142 : vector<16x128xf32>
    %144 = vector.broadcast %120 : vector<1x128xf32> to vector<16x128xf32>
    %145 = arith.mulf %143, %144 : vector<16x128xf32>
    %146 = vector.broadcast %121 : vector<1x128xf32> to vector<16x128xf32>
    %147 = arith.addf %145, %146 : vector<16x128xf32>
    %cst_57 = arith.constant 1.000000e+00 : f32
    %148 = vector.broadcast %cst_57 : f32 to vector<1x128xf32>
    %149 = arith.addf %148, %118 : vector<1x128xf32>
    %150 = vector.broadcast %149 : vector<1x128xf32> to vector<16x128xf32>
    %151 = arith.mulf %147, %150 : vector<16x128xf32>
    %152 = vector.broadcast %119 : vector<1x128xf32> to vector<16x128xf32>
    %153 = arith.addf %151, %152 : vector<16x128xf32>
    %cst_58 = arith.constant 0.000000e+00 : f32
    %154 = vector.broadcast %cst_58 : f32 to vector<16x128xf32>
    %155 = arith.subf %154, %153 : vector<16x128xf32>
    %156 = math.exp %155 : vector<16x128xf32>
    %cst_59 = arith.constant 1.000000e+00 : f32
    %157 = vector.broadcast %cst_59 : f32 to vector<16x128xf32>
    %158 = arith.addf %157, %156 : vector<16x128xf32>
    %cst_60 = arith.constant 1.000000e+00 : f32
    %159 = vector.broadcast %cst_60 : f32 to vector<16x128xf32>
    %160 = arith.divf %159, %158 : vector<16x128xf32>
    %161 = arith.mulf %153, %160 : vector<16x128xf32>
    %162 = arith.truncf %161 : vector<16x128xf32> to vector<16x128xbf16>
    %cst_61 = arith.constant dense<0.000000e+00> : vector<16x128xf32>
    %163 = tpu.matmul %162, %123, %cst_61 {dimension_numbers = #tpu.dot_dimension_numbers<[1], [0], [0], [1], [0, 0, 1, 1], [], []>} : vector<16x128xbf16>, vector<128x128xbf16>, vector<16x128xf32> -> vector<16x128xf32>
    %164 = vector.broadcast %125 : vector<1x128xf32> to vector<16x128xf32>
    %165 = arith.addf %163, %164 : vector<16x128xf32>
    %166 = arith.addf %4, %165 : vector<16x128xf32>
    %167 = vector.extract_strided_slice %8 {offsets = [4, 0], sizes = [1, 128], strides = [1, 1]} : vector<10x128xf32> to vector<1x128xf32>
    %168 = vector.extract_strided_slice %8 {offsets = [5, 0], sizes = [1, 128], strides = [1, 1]} : vector<10x128xf32> to vector<1x128xf32>
    %cst_62 = arith.constant dense<0.000000e+00> : vector<16xf32>
    %169 = vector.multi_reduction <add>, %166, %cst_62 [1] : vector<16x128xf32> to vector<16xf32>
    %170 = vector.shape_cast %169 : vector<16xf32> to vector<16x1xf32>
    %cst_63 = arith.constant 1.280000e+02 : f32
    %171 = vector.broadcast %cst_63 : f32 to vector<16x1xf32>
    %172 = arith.divf %170, %171 : vector<16x1xf32>
    %173 = vector.broadcast %172 : vector<16x1xf32> to vector<16x128xf32>
    %174 = arith.subf %166, %173 : vector<16x128xf32>
    %175 = arith.mulf %174, %174 : vector<16x128xf32>
    %cst_64 = arith.constant dense<0.000000e+00> : vector<16xf32>
    %176 = vector.multi_reduction <add>, %175, %cst_64 [1] : vector<16x128xf32> to vector<16xf32>
    %177 = vector.shape_cast %176 : vector<16xf32> to vector<16x1xf32>
    %cst_65 = arith.constant 1.280000e+02 : f32
    %178 = vector.broadcast %cst_65 : f32 to vector<16x1xf32>
    %179 = arith.divf %177, %178 : vector<16x1xf32>
    %180 = vector.broadcast %172 : vector<16x1xf32> to vector<16x128xf32>
    %181 = arith.subf %166, %180 : vector<16x128xf32>
    %cst_66 = arith.constant 9.99999974E-6 : f32
    %182 = vector.broadcast %cst_66 : f32 to vector<16x1xf32>
    %183 = arith.addf %179, %182 : vector<16x1xf32>
    %184 = math.rsqrt %183 : vector<16x1xf32>
    %185 = vector.broadcast %184 : vector<16x1xf32> to vector<16x128xf32>
    %186 = arith.mulf %181, %185 : vector<16x128xf32>
    %187 = vector.broadcast %167 : vector<1x128xf32> to vector<16x128xf32>
    %188 = arith.mulf %186, %187 : vector<16x128xf32>
    %189 = vector.broadcast %168 : vector<1x128xf32> to vector<16x128xf32>
    %190 = arith.addf %188, %189 : vector<16x128xf32>
    %c0_67 = arith.constant 0 : index
    %c0_68 = arith.constant 0 : index
    %c0_69 = arith.constant 0 : index
    %191 = vector.load %arg3[%c0_67, %c0_68, %c0_69] : memref<1x8x128xf32, #tpu.memory_space<vmem>>, vector<1x8x128xf32>
    %192 = vector.shape_cast %191 : vector<1x8x128xf32> to vector<8x128xf32>
    %193 = vector.extract_strided_slice %10 {offsets = [0, 0], sizes = [1, 128], strides = [1, 1]} : vector<2x128xf32> to vector<1x128xf32>
    %194 = vector.extract_strided_slice %10 {offsets = [1, 0], sizes = [1, 128], strides = [1, 1]} : vector<2x128xf32> to vector<1x128xf32>
    %cst_70 = arith.constant dense<0.000000e+00> : vector<8xf32>
    %195 = vector.multi_reduction <add>, %192, %cst_70 [1] : vector<8x128xf32> to vector<8xf32>
    %196 = vector.shape_cast %195 : vector<8xf32> to vector<8x1xf32>
    %cst_71 = arith.constant 1.280000e+02 : f32
    %197 = vector.broadcast %cst_71 : f32 to vector<8x1xf32>
    %198 = arith.divf %196, %197 : vector<8x1xf32>
    %199 = vector.broadcast %198 : vector<8x1xf32> to vector<8x128xf32>
    %200 = arith.subf %192, %199 : vector<8x128xf32>
    %201 = arith.mulf %200, %200 : vector<8x128xf32>
    %cst_72 = arith.constant dense<0.000000e+00> : vector<8xf32>
    %202 = vector.multi_reduction <add>, %201, %cst_72 [1] : vector<8x128xf32> to vector<8xf32>
    %203 = vector.shape_cast %202 : vector<8xf32> to vector<8x1xf32>
    %cst_73 = arith.constant 1.280000e+02 : f32
    %204 = vector.broadcast %cst_73 : f32 to vector<8x1xf32>
    %205 = arith.divf %203, %204 : vector<8x1xf32>
    %206 = vector.broadcast %198 : vector<8x1xf32> to vector<8x128xf32>
    %207 = arith.subf %192, %206 : vector<8x128xf32>
    %cst_74 = arith.constant 9.99999974E-6 : f32
    %208 = vector.broadcast %cst_74 : f32 to vector<8x1xf32>
    %209 = arith.addf %205, %208 : vector<8x1xf32>
    %210 = math.rsqrt %209 : vector<8x1xf32>
    %211 = vector.broadcast %210 : vector<8x1xf32> to vector<8x128xf32>
    %212 = arith.mulf %207, %211 : vector<8x128xf32>
    %213 = vector.broadcast %193 : vector<1x128xf32> to vector<8x128xf32>
    %214 = arith.mulf %212, %213 : vector<8x128xf32>
    %215 = vector.broadcast %194 : vector<1x128xf32> to vector<8x128xf32>
    %216 = arith.addf %214, %215 : vector<8x128xf32>
    %217 = arith.truncf %190 : vector<16x128xf32> to vector<16x128xbf16>
    %c0_75 = arith.constant 0 : index
    %c0_76 = arith.constant 0 : index
    %c0_77 = arith.constant 0 : index
    %218 = vector.load %arg11[%c0_75, %c0_76, %c0_77] : memref<1x128x128xbf16, #tpu.memory_space<vmem>>, vector<1x128x128xbf16>
    %219 = vector.shape_cast %218 : vector<1x128x128xbf16> to vector<128x128xbf16>
    %cst_78 = arith.constant dense<0.000000e+00> : vector<16x128xf32>
    %220 = tpu.matmul %217, %219, %cst_78 {dimension_numbers = #tpu.dot_dimension_numbers<[1], [0], [0], [1], [0, 0, 1, 1], [], []>} : vector<16x128xbf16>, vector<128x128xbf16>, vector<16x128xf32> -> vector<16x128xf32>
    %c0_79 = arith.constant 0 : index
    %c0_80 = arith.constant 0 : index
    %c0_81 = arith.constant 0 : index
    %221 = vector.load %arg12[%c0_79, %c0_80, %c0_81] : memref<1x1x128xf32, #tpu.memory_space<vmem>>, vector<1x1x128xf32>
    %222 = vector.shape_cast %221 : vector<1x1x128xf32> to vector<1x128xf32>
    %223 = vector.broadcast %222 : vector<1x128xf32> to vector<16x128xf32>
    %224 = arith.addf %220, %223 : vector<16x128xf32>
    %225 = arith.truncf %216 : vector<8x128xf32> to vector<8x128xbf16>
    %c0_82 = arith.constant 0 : index
    %c0_83 = arith.constant 0 : index
    %c0_84 = arith.constant 0 : index
    %226 = vector.load %arg13[%c0_82, %c0_83, %c0_84] : memref<1x128x256xbf16, #tpu.memory_space<vmem>>, vector<1x128x256xbf16>
    %227 = vector.shape_cast %226 : vector<1x128x256xbf16> to vector<128x256xbf16>
    %cst_85 = arith.constant dense<0.000000e+00> : vector<8x256xf32>
    %228 = tpu.matmul %225, %227, %cst_85 {dimension_numbers = #tpu.dot_dimension_numbers<[1], [0], [0], [1], [0, 0, 1, 1], [], []>} : vector<8x128xbf16>, vector<128x256xbf16>, vector<8x256xf32> -> vector<8x256xf32>
    %c0_86 = arith.constant 0 : index
    %c0_87 = arith.constant 0 : index
    %c0_88 = arith.constant 0 : index
    %229 = vector.load %arg14[%c0_86, %c0_87, %c0_88] : memref<1x1x256xf32, #tpu.memory_space<vmem>>, vector<1x1x256xf32>
    %230 = vector.shape_cast %229 : vector<1x1x256xf32> to vector<1x256xf32>
    %231 = vector.broadcast %230 : vector<1x256xf32> to vector<8x256xf32>
    %232 = arith.addf %228, %231 : vector<8x256xf32>
    %233 = vector.extract_strided_slice %232 {offsets = [0, 0], sizes = [8, 128], strides = [1, 1]} : vector<8x256xf32> to vector<8x128xf32>
    %234 = vector.extract_strided_slice %232 {offsets = [0, 128], sizes = [8, 128], strides = [1, 1]} : vector<8x256xf32> to vector<8x128xf32>
    %235 = arith.truncf %224 : vector<16x128xf32> to vector<16x128xbf16>
    %236 = arith.truncf %233 : vector<8x128xf32> to vector<8x128xbf16>
    %237 = arith.truncf %234 : vector<8x128xf32> to vector<8x128xbf16>
    %238 = vector.extract_strided_slice %235 {offsets = [0, 0], sizes = [16, 32], strides = [1, 1]} : vector<16x128xbf16> to vector<16x32xbf16>
    %239 = vector.extract_strided_slice %236 {offsets = [0, 0], sizes = [8, 32], strides = [1, 1]} : vector<8x128xbf16> to vector<8x32xbf16>
    %cst_89 = arith.constant dense<0.000000e+00> : vector<16x8xf32>
    %240 = tpu.matmul %238, %239, %cst_89 {dimension_numbers = #tpu.dot_dimension_numbers<[1], [1], [0], [0], [0, 0, 1, 0], [], []>} : vector<16x32xbf16>, vector<8x32xbf16>, vector<16x8xf32> -> vector<16x8xf32>
    %cst_90 = arith.constant dense<0xFF800000> : vector<16xf32>
    %241 = vector.multi_reduction <maximumf>, %240, %cst_90 [1] : vector<16x8xf32> to vector<16xf32>
    %242 = vector.shape_cast %241 : vector<16xf32> to vector<16x1xf32>
    %243 = vector.broadcast %242 : vector<16x1xf32> to vector<16x8xf32>
    %244 = arith.subf %240, %243 : vector<16x8xf32>
    %245 = math.exp %244 : vector<16x8xf32>
    %cst_91 = arith.constant dense<0.000000e+00> : vector<16xf32>
    %246 = vector.multi_reduction <add>, %245, %cst_91 [1] : vector<16x8xf32> to vector<16xf32>
    %247 = vector.shape_cast %246 : vector<16xf32> to vector<16x1xf32>
    %248 = tpu.reciprocal %247 {approx = true} : vector<16x1xf32> -> vector<16x1xf32>
    %249 = vector.broadcast %248 : vector<16x1xf32> to vector<16x8xf32>
    %250 = arith.mulf %245, %249 : vector<16x8xf32>
    %251 = arith.truncf %250 : vector<16x8xf32> to vector<16x8xbf16>
    %252 = vector.extract_strided_slice %237 {offsets = [0, 0], sizes = [8, 32], strides = [1, 1]} : vector<8x128xbf16> to vector<8x32xbf16>
    %cst_92 = arith.constant dense<0.000000e+00> : vector<16x32xf32>
    %253 = tpu.matmul %251, %252, %cst_92 {dimension_numbers = #tpu.dot_dimension_numbers<[1], [0], [0], [1], [0, 0, 1, 1], [], []>} : vector<16x8xbf16>, vector<8x32xbf16>, vector<16x32xf32> -> vector<16x32xf32>
    %c0_93 = arith.constant 0 : index
    %c0_94 = arith.constant 0 : index
    %254 = vector.load %arg24[%c0_93, %c0_94] : memref<16x128xf32, #tpu.memory_space<vmem>>, vector<16x32xf32>
    tpu.vector_store %arg24[%c0_93, %c0_94], %253 {strides = array<i32>} : memref<16x128xf32, #tpu.memory_space<vmem>>, vector<16x32xf32>,
    %255 = vector.extract_strided_slice %235 {offsets = [0, 32], sizes = [16, 32], strides = [1, 1]} : vector<16x128xbf16> to vector<16x32xbf16>
    %256 = vector.extract_strided_slice %236 {offsets = [0, 32], sizes = [8, 32], strides = [1, 1]} : vector<8x128xbf16> to vector<8x32xbf16>
    %cst_95 = arith.constant dense<0.000000e+00> : vector<16x8xf32>
    %257 = tpu.matmul %255, %256, %cst_95 {dimension_numbers = #tpu.dot_dimension_numbers<[1], [1], [0], [0], [0, 0, 1, 0], [], []>} : vector<16x32xbf16>, vector<8x32xbf16>, vector<16x8xf32> -> vector<16x8xf32>
    %cst_96 = arith.constant dense<0xFF800000> : vector<16xf32>
    %258 = vector.multi_reduction <maximumf>, %257, %cst_96 [1] : vector<16x8xf32> to vector<16xf32>
    %259 = vector.shape_cast %258 : vector<16xf32> to vector<16x1xf32>
    %260 = vector.broadcast %259 : vector<16x1xf32> to vector<16x8xf32>
    %261 = arith.subf %257, %260 : vector<16x8xf32>
    %262 = math.exp %261 : vector<16x8xf32>
    %cst_97 = arith.constant dense<0.000000e+00> : vector<16xf32>
    %263 = vector.multi_reduction <add>, %262, %cst_97 [1] : vector<16x8xf32> to vector<16xf32>
    %264 = vector.shape_cast %263 : vector<16xf32> to vector<16x1xf32>
    %265 = tpu.reciprocal %264 {approx = true} : vector<16x1xf32> -> vector<16x1xf32>
    %266 = vector.broadcast %265 : vector<16x1xf32> to vector<16x8xf32>
    %267 = arith.mulf %262, %266 : vector<16x8xf32>
    %268 = arith.truncf %267 : vector<16x8xf32> to vector<16x8xbf16>
    %269 = vector.extract_strided_slice %237 {offsets = [0, 32], sizes = [8, 32], strides = [1, 1]} : vector<8x128xbf16> to vector<8x32xbf16>
    %cst_98 = arith.constant dense<0.000000e+00> : vector<16x32xf32>
    %270 = tpu.matmul %268, %269, %cst_98 {dimension_numbers = #tpu.dot_dimension_numbers<[1], [0], [0], [1], [0, 0, 1, 1], [], []>} : vector<16x8xbf16>, vector<8x32xbf16>, vector<16x32xf32> -> vector<16x32xf32>
    %c0_99 = arith.constant 0 : index
    %c32_100 = arith.constant 32 : index
    %271 = vector.load %arg24[%c0_99, %c32_100] : memref<16x128xf32, #tpu.memory_space<vmem>>, vector<16x32xf32>
    tpu.vector_store %arg24[%c0_99, %c32_100], %270 {strides = array<i32>} : memref<16x128xf32, #tpu.memory_space<vmem>>, vector<16x32xf32>,
    %272 = vector.extract_strided_slice %235 {offsets = [0, 64], sizes = [16, 32], strides = [1, 1]} : vector<16x128xbf16> to vector<16x32xbf16>
    %273 = vector.extract_strided_slice %236 {offsets = [0, 64], sizes = [8, 32], strides = [1, 1]} : vector<8x128xbf16> to vector<8x32xbf16>
    %cst_101 = arith.constant dense<0.000000e+00> : vector<16x8xf32>
    %274 = tpu.matmul %272, %273, %cst_101 {dimension_numbers = #tpu.dot_dimension_numbers<[1], [1], [0], [0], [0, 0, 1, 0], [], []>} : vector<16x32xbf16>, vector<8x32xbf16>, vector<16x8xf32> -> vector<16x8xf32>
    %cst_102 = arith.constant dense<0xFF800000> : vector<16xf32>
    %275 = vector.multi_reduction <maximumf>, %274, %cst_102 [1] : vector<16x8xf32> to vector<16xf32>
    %276 = vector.shape_cast %275 : vector<16xf32> to vector<16x1xf32>
    %277 = vector.broadcast %276 : vector<16x1xf32> to vector<16x8xf32>
    %278 = arith.subf %274, %277 : vector<16x8xf32>
    %279 = math.exp %278 : vector<16x8xf32>
    %cst_103 = arith.constant dense<0.000000e+00> : vector<16xf32>
    %280 = vector.multi_reduction <add>, %279, %cst_103 [1] : vector<16x8xf32> to vector<16xf32>
    %281 = vector.shape_cast %280 : vector<16xf32> to vector<16x1xf32>
    %282 = tpu.reciprocal %281 {approx = true} : vector<16x1xf32> -> vector<16x1xf32>
    %283 = vector.broadcast %282 : vector<16x1xf32> to vector<16x8xf32>
    %284 = arith.mulf %279, %283 : vector<16x8xf32>
    %285 = arith.truncf %284 : vector<16x8xf32> to vector<16x8xbf16>
    %286 = vector.extract_strided_slice %237 {offsets = [0, 64], sizes = [8, 32], strides = [1, 1]} : vector<8x128xbf16> to vector<8x32xbf16>
    %cst_104 = arith.constant dense<0.000000e+00> : vector<16x32xf32>
    %287 = tpu.matmul %285, %286, %cst_104 {dimension_numbers = #tpu.dot_dimension_numbers<[1], [0], [0], [1], [0, 0, 1, 1], [], []>} : vector<16x8xbf16>, vector<8x32xbf16>, vector<16x32xf32> -> vector<16x32xf32>
    %c0_105 = arith.constant 0 : index
    %c64_106 = arith.constant 64 : index
    %288 = vector.load %arg24[%c0_105, %c64_106] : memref<16x128xf32, #tpu.memory_space<vmem>>, vector<16x32xf32>
    tpu.vector_store %arg24[%c0_105, %c64_106], %287 {strides = array<i32>} : memref<16x128xf32, #tpu.memory_space<vmem>>, vector<16x32xf32>,
    %289 = vector.extract_strided_slice %235 {offsets = [0, 96], sizes = [16, 32], strides = [1, 1]} : vector<16x128xbf16> to vector<16x32xbf16>
    %290 = vector.extract_strided_slice %236 {offsets = [0, 96], sizes = [8, 32], strides = [1, 1]} : vector<8x128xbf16> to vector<8x32xbf16>
    %cst_107 = arith.constant dense<0.000000e+00> : vector<16x8xf32>
    %291 = tpu.matmul %289, %290, %cst_107 {dimension_numbers = #tpu.dot_dimension_numbers<[1], [1], [0], [0], [0, 0, 1, 0], [], []>} : vector<16x32xbf16>, vector<8x32xbf16>, vector<16x8xf32> -> vector<16x8xf32>
    %cst_108 = arith.constant dense<0xFF800000> : vector<16xf32>
    %292 = vector.multi_reduction <maximumf>, %291, %cst_108 [1] : vector<16x8xf32> to vector<16xf32>
    %293 = vector.shape_cast %292 : vector<16xf32> to vector<16x1xf32>
    %294 = vector.broadcast %293 : vector<16x1xf32> to vector<16x8xf32>
    %295 = arith.subf %291, %294 : vector<16x8xf32>
    %296 = math.exp %295 : vector<16x8xf32>
    %cst_109 = arith.constant dense<0.000000e+00> : vector<16xf32>
    %297 = vector.multi_reduction <add>, %296, %cst_109 [1] : vector<16x8xf32> to vector<16xf32>
    %298 = vector.shape_cast %297 : vector<16xf32> to vector<16x1xf32>
    %299 = tpu.reciprocal %298 {approx = true} : vector<16x1xf32> -> vector<16x1xf32>
    %300 = vector.broadcast %299 : vector<16x1xf32> to vector<16x8xf32>
    %301 = arith.mulf %296, %300 : vector<16x8xf32>
    %302 = arith.truncf %301 : vector<16x8xf32> to vector<16x8xbf16>
    %303 = vector.extract_strided_slice %237 {offsets = [0, 96], sizes = [8, 32], strides = [1, 1]} : vector<8x128xbf16> to vector<8x32xbf16>
    %cst_110 = arith.constant dense<0.000000e+00> : vector<16x32xf32>
    %304 = tpu.matmul %302, %303, %cst_110 {dimension_numbers = #tpu.dot_dimension_numbers<[1], [0], [0], [1], [0, 0, 1, 1], [], []>} : vector<16x8xbf16>, vector<8x32xbf16>, vector<16x32xf32> -> vector<16x32xf32>
    %c0_111 = arith.constant 0 : index
    %c96_112 = arith.constant 96 : index
    %305 = vector.load %arg24[%c0_111, %c96_112] : memref<16x128xf32, #tpu.memory_space<vmem>>, vector<16x32xf32>
    tpu.vector_store %arg24[%c0_111, %c96_112], %304 {strides = array<i32>} : memref<16x128xf32, #tpu.memory_space<vmem>>, vector<16x32xf32>,
    %c0_113 = arith.constant 0 : index
    %c0_114 = arith.constant 0 : index
    %306 = vector.load %arg24[%c0_113, %c0_114] : memref<16x128xf32, #tpu.memory_space<vmem>>, vector<16x128xf32>
    %307 = vector.extract_strided_slice %6 {offsets = [2, 0], sizes = [1, 128], strides = [1, 1]} : vector<6x128xf32> to vector<1x128xf32>
    %308 = vector.extract_strided_slice %6 {offsets = [3, 0], sizes = [1, 128], strides = [1, 1]} : vector<6x128xf32> to vector<1x128xf32>
    %309 = vector.extract_strided_slice %8 {offsets = [6, 0], sizes = [1, 128], strides = [1, 1]} : vector<10x128xf32> to vector<1x128xf32>
    %310 = vector.extract_strided_slice %8 {offsets = [7, 0], sizes = [1, 128], strides = [1, 1]} : vector<10x128xf32> to vector<1x128xf32>
    %c0_115 = arith.constant 0 : index
    %c0_116 = arith.constant 0 : index
    %c0_117 = arith.constant 0 : index
    %311 = vector.load %arg15[%c0_115, %c0_116, %c0_117] : memref<1x128x128xbf16, #tpu.memory_space<vmem>>, vector<1x128x128xbf16>
    %312 = vector.shape_cast %311 : vector<1x128x128xbf16> to vector<128x128xbf16>
    %c0_118 = arith.constant 0 : index
    %c0_119 = arith.constant 0 : index
    %c0_120 = arith.constant 0 : index
    %313 = vector.load %arg16[%c0_118, %c0_119, %c0_120] : memref<1x1x128xf32, #tpu.memory_space<vmem>>, vector<1x1x128xf32>
    %314 = vector.shape_cast %313 : vector<1x1x128xf32> to vector<1x128xf32>
    %cst_121 = arith.constant dense<0.000000e+00> : vector<16xf32>
    %315 = vector.multi_reduction <add>, %306, %cst_121 [1] : vector<16x128xf32> to vector<16xf32>
    %316 = vector.shape_cast %315 : vector<16xf32> to vector<16x1xf32>
    %cst_122 = arith.constant 1.280000e+02 : f32
    %317 = vector.broadcast %cst_122 : f32 to vector<16x1xf32>
    %318 = arith.divf %316, %317 : vector<16x1xf32>
    %319 = vector.broadcast %318 : vector<16x1xf32> to vector<16x128xf32>
    %320 = arith.subf %306, %319 : vector<16x128xf32>
    %321 = arith.mulf %320, %320 : vector<16x128xf32>
    %cst_123 = arith.constant dense<0.000000e+00> : vector<16xf32>
    %322 = vector.multi_reduction <add>, %321, %cst_123 [1] : vector<16x128xf32> to vector<16xf32>
    %323 = vector.shape_cast %322 : vector<16xf32> to vector<16x1xf32>
    %cst_124 = arith.constant 1.280000e+02 : f32
    %324 = vector.broadcast %cst_124 : f32 to vector<16x1xf32>
    %325 = arith.divf %323, %324 : vector<16x1xf32>
    %326 = vector.broadcast %318 : vector<16x1xf32> to vector<16x128xf32>
    %327 = arith.subf %306, %326 : vector<16x128xf32>
    %cst_125 = arith.constant 9.99999974E-6 : f32
    %328 = vector.broadcast %cst_125 : f32 to vector<16x1xf32>
    %329 = arith.addf %325, %328 : vector<16x1xf32>
    %330 = math.rsqrt %329 : vector<16x1xf32>
    %331 = vector.broadcast %330 : vector<16x1xf32> to vector<16x128xf32>
    %332 = arith.mulf %327, %331 : vector<16x128xf32>
    %333 = vector.broadcast %309 : vector<1x128xf32> to vector<16x128xf32>
    %334 = arith.mulf %332, %333 : vector<16x128xf32>
    %335 = vector.broadcast %310 : vector<1x128xf32> to vector<16x128xf32>
    %336 = arith.addf %334, %335 : vector<16x128xf32>
    %cst_126 = arith.constant 1.000000e+00 : f32
    %337 = vector.broadcast %cst_126 : f32 to vector<1x128xf32>
    %338 = arith.addf %337, %307 : vector<1x128xf32>
    %339 = vector.broadcast %338 : vector<1x128xf32> to vector<16x128xf32>
    %340 = arith.mulf %336, %339 : vector<16x128xf32>
    %341 = vector.broadcast %308 : vector<1x128xf32> to vector<16x128xf32>
    %342 = arith.addf %340, %341 : vector<16x128xf32>
    %cst_127 = arith.constant 0.000000e+00 : f32
    %343 = vector.broadcast %cst_127 : f32 to vector<16x128xf32>
    %344 = arith.subf %343, %342 : vector<16x128xf32>
    %345 = math.exp %344 : vector<16x128xf32>
    %cst_128 = arith.constant 1.000000e+00 : f32
    %346 = vector.broadcast %cst_128 : f32 to vector<16x128xf32>
    %347 = arith.addf %346, %345 : vector<16x128xf32>
    %cst_129 = arith.constant 1.000000e+00 : f32
    %348 = vector.broadcast %cst_129 : f32 to vector<16x128xf32>
    %349 = arith.divf %348, %347 : vector<16x128xf32>
    %350 = arith.mulf %342, %349 : vector<16x128xf32>
    %351 = arith.truncf %350 : vector<16x128xf32> to vector<16x128xbf16>
    %cst_130 = arith.constant dense<0.000000e+00> : vector<16x128xf32>
    %352 = tpu.matmul %351, %312, %cst_130 {dimension_numbers = #tpu.dot_dimension_numbers<[1], [0], [0], [1], [0, 0, 1, 1], [], []>} : vector<16x128xbf16>, vector<128x128xbf16>, vector<16x128xf32> -> vector<16x128xf32>
    %353 = vector.broadcast %314 : vector<1x128xf32> to vector<16x128xf32>
    %354 = arith.addf %352, %353 : vector<16x128xf32>
    %355 = arith.addf %166, %354 : vector<16x128xf32>
    %c0_131 = arith.constant 0 : index
    %c0_132 = arith.constant 0 : index
    %c0_133 = arith.constant 0 : index
    %356 = vector.load %arg17[%c0_131, %c0_132, %c0_133] : memref<1x128x256xbf16, #tpu.memory_space<vmem>>, vector<1x128x256xbf16>
    %357 = vector.shape_cast %356 : vector<1x128x256xbf16> to vector<128x256xbf16>
    %c0_134 = arith.constant 0 : index
    %c0_135 = arith.constant 0 : index
    %c0_136 = arith.constant 0 : index
    %358 = vector.load %arg18[%c0_134, %c0_135, %c0_136] : memref<1x1x256xf32, #tpu.memory_space<vmem>>, vector<1x1x256xf32>
    %359 = vector.shape_cast %358 : vector<1x1x256xf32> to vector<1x256xf32>
    %c0_137 = arith.constant 0 : index
    %c0_138 = arith.constant 0 : index
    %c0_139 = arith.constant 0 : index
    %360 = vector.load %arg19[%c0_137, %c0_138, %c0_139] : memref<1x256x128xbf16, #tpu.memory_space<vmem>>, vector<1x256x128xbf16>
    %361 = vector.shape_cast %360 : vector<1x256x128xbf16> to vector<256x128xbf16>
    %c0_140 = arith.constant 0 : index
    %c0_141 = arith.constant 0 : index
    %c0_142 = arith.constant 0 : index
    %362 = vector.load %arg20[%c0_140, %c0_141, %c0_142] : memref<1x1x128xf32, #tpu.memory_space<vmem>>, vector<1x1x128xf32>
    %363 = vector.shape_cast %362 : vector<1x1x128xf32> to vector<1x128xf32>
    %364 = arith.truncf %355 : vector<16x128xf32> to vector<16x128xbf16>
    %cst_143 = arith.constant dense<0.000000e+00> : vector<16x256xf32>
    %365 = tpu.matmul %364, %357, %cst_143 {dimension_numbers = #tpu.dot_dimension_numbers<[1], [0], [0], [1], [0, 0, 1, 1], [], []>} : vector<16x128xbf16>, vector<128x256xbf16>, vector<16x256xf32> -> vector<16x256xf32>
    %366 = vector.broadcast %359 : vector<1x256xf32> to vector<16x256xf32>
    %367 = arith.addf %365, %366 : vector<16x256xf32>
    %cst_144 = arith.constant 5.000000e-01 : f32
    %368 = vector.broadcast %cst_144 : f32 to vector<16x256xf32>
    %369 = arith.mulf %368, %367 : vector<16x256xf32>
    %cst_145 = arith.constant 4.471500e-02 : f32
    %370 = vector.broadcast %cst_145 : f32 to vector<16x256xf32>
    %371 = arith.mulf %370, %367 : vector<16x256xf32>
    %372 = arith.mulf %371, %367 : vector<16x256xf32>
    %373 = arith.mulf %372, %367 : vector<16x256xf32>
    %374 = arith.addf %367, %373 : vector<16x256xf32>
    %cst_146 = arith.constant 0.797884583 : f32
    %375 = vector.broadcast %cst_146 : f32 to vector<16x256xf32>
    %376 = arith.mulf %375, %374 : vector<16x256xf32>
    %377 = math.tanh %376 : vector<16x256xf32>
    %cst_147 = arith.constant 1.000000e+00 : f32
    %378 = vector.broadcast %cst_147 : f32 to vector<16x256xf32>
    %379 = arith.addf %378, %377 : vector<16x256xf32>
    %380 = arith.mulf %369, %379 : vector<16x256xf32>
    %381 = arith.truncf %380 : vector<16x256xf32> to vector<16x256xbf16>
    %cst_148 = arith.constant dense<0.000000e+00> : vector<16x128xf32>
    %382 = tpu.matmul %381, %361, %cst_148 {dimension_numbers = #tpu.dot_dimension_numbers<[1], [0], [0], [1], [0, 0, 1, 1], [], []>} : vector<16x256xbf16>, vector<256x128xbf16>, vector<16x128xf32> -> vector<16x128xf32>
    %383 = vector.broadcast %363 : vector<1x128xf32> to vector<16x128xf32>
    %384 = arith.addf %382, %383 : vector<16x128xf32>
    %c0_149 = arith.constant 0 : index
    %c0_150 = arith.constant 0 : index
    %385 = vector.load %arg24[%c0_149, %c0_150] : memref<16x128xf32, #tpu.memory_space<vmem>>, vector<16x128xf32>
    tpu.vector_store %arg24[%c0_149, %c0_150], %384 {strides = array<i32>} : memref<16x128xf32, #tpu.memory_space<vmem>>, vector<16x128xf32>,
    %c0_151 = arith.constant 0 : index
    %c0_152 = arith.constant 0 : index
    %386 = vector.load %arg24[%c0_151, %c0_152] : memref<16x128xf32, #tpu.memory_space<vmem>>, vector<16x128xf32>
    %387 = vector.extract_strided_slice %6 {offsets = [4, 0], sizes = [1, 128], strides = [1, 1]} : vector<6x128xf32> to vector<1x128xf32>
    %388 = vector.extract_strided_slice %6 {offsets = [5, 0], sizes = [1, 128], strides = [1, 1]} : vector<6x128xf32> to vector<1x128xf32>
    %389 = vector.extract_strided_slice %8 {offsets = [8, 0], sizes = [1, 128], strides = [1, 1]} : vector<10x128xf32> to vector<1x128xf32>
    %390 = vector.extract_strided_slice %8 {offsets = [9, 0], sizes = [1, 128], strides = [1, 1]} : vector<10x128xf32> to vector<1x128xf32>
    %c0_153 = arith.constant 0 : index
    %c0_154 = arith.constant 0 : index
    %c0_155 = arith.constant 0 : index
    %391 = vector.load %arg21[%c0_153, %c0_154, %c0_155] : memref<1x128x128xbf16, #tpu.memory_space<vmem>>, vector<1x128x128xbf16>
    %392 = vector.shape_cast %391 : vector<1x128x128xbf16> to vector<128x128xbf16>
    %c0_156 = arith.constant 0 : index
    %c0_157 = arith.constant 0 : index
    %c0_158 = arith.constant 0 : index
    %393 = vector.load %arg22[%c0_156, %c0_157, %c0_158] : memref<1x1x128xf32, #tpu.memory_space<vmem>>, vector<1x1x128xf32>
    %394 = vector.shape_cast %393 : vector<1x1x128xf32> to vector<1x128xf32>
    %cst_159 = arith.constant dense<0.000000e+00> : vector<16xf32>
    %395 = vector.multi_reduction <add>, %386, %cst_159 [1] : vector<16x128xf32> to vector<16xf32>
    %396 = vector.shape_cast %395 : vector<16xf32> to vector<16x1xf32>
    %cst_160 = arith.constant 1.280000e+02 : f32
    %397 = vector.broadcast %cst_160 : f32 to vector<16x1xf32>
    %398 = arith.divf %396, %397 : vector<16x1xf32>
    %399 = vector.broadcast %398 : vector<16x1xf32> to vector<16x128xf32>
    %400 = arith.subf %386, %399 : vector<16x128xf32>
    %401 = arith.mulf %400, %400 : vector<16x128xf32>
    %cst_161 = arith.constant dense<0.000000e+00> : vector<16xf32>
    %402 = vector.multi_reduction <add>, %401, %cst_161 [1] : vector<16x128xf32> to vector<16xf32>
    %403 = vector.shape_cast %402 : vector<16xf32> to vector<16x1xf32>
    %cst_162 = arith.constant 1.280000e+02 : f32
    %404 = vector.broadcast %cst_162 : f32 to vector<16x1xf32>
    %405 = arith.divf %403, %404 : vector<16x1xf32>
    %406 = vector.broadcast %398 : vector<16x1xf32> to vector<16x128xf32>
    %407 = arith.subf %386, %406 : vector<16x128xf32>
    %cst_163 = arith.constant 9.99999974E-6 : f32
    %408 = vector.broadcast %cst_163 : f32 to vector<16x1xf32>
    %409 = arith.addf %405, %408 : vector<16x1xf32>
    %410 = math.rsqrt %409 : vector<16x1xf32>
    %411 = vector.broadcast %410 : vector<16x1xf32> to vector<16x128xf32>
    %412 = arith.mulf %407, %411 : vector<16x128xf32>
    %413 = vector.broadcast %389 : vector<1x128xf32> to vector<16x128xf32>
    %414 = arith.mulf %412, %413 : vector<16x128xf32>
    %415 = vector.broadcast %390 : vector<1x128xf32> to vector<16x128xf32>
    %416 = arith.addf %414, %415 : vector<16x128xf32>
    %cst_164 = arith.constant 1.000000e+00 : f32
    %417 = vector.broadcast %cst_164 : f32 to vector<1x128xf32>
    %418 = arith.addf %417, %387 : vector<1x128xf32>
    %419 = vector.broadcast %418 : vector<1x128xf32> to vector<16x128xf32>
    %420 = arith.mulf %416, %419 : vector<16x128xf32>
    %421 = vector.broadcast %388 : vector<1x128xf32> to vector<16x128xf32>
    %422 = arith.addf %420, %421 : vector<16x128xf32>
    %cst_165 = arith.constant 0.000000e+00 : f32
    %423 = vector.broadcast %cst_165 : f32 to vector<16x128xf32>
    %424 = arith.subf %423, %422 : vector<16x128xf32>
    %425 = math.exp %424 : vector<16x128xf32>
    %cst_166 = arith.constant 1.000000e+00 : f32
    %426 = vector.broadcast %cst_166 : f32 to vector<16x128xf32>
    %427 = arith.addf %426, %425 : vector<16x128xf32>
    %cst_167 = arith.constant 1.000000e+00 : f32
    %428 = vector.broadcast %cst_167 : f32 to vector<16x128xf32>
    %429 = arith.divf %428, %427 : vector<16x128xf32>
    %430 = arith.mulf %422, %429 : vector<16x128xf32>
    %431 = arith.truncf %430 : vector<16x128xf32> to vector<16x128xbf16>
    %cst_168 = arith.constant dense<0.000000e+00> : vector<16x128xf32>
    %432 = tpu.matmul %431, %392, %cst_168 {dimension_numbers = #tpu.dot_dimension_numbers<[1], [0], [0], [1], [0, 0, 1, 1], [], []>} : vector<16x128xbf16>, vector<128x128xbf16>, vector<16x128xf32> -> vector<16x128xf32>
    %433 = vector.broadcast %394 : vector<1x128xf32> to vector<16x128xf32>
    %434 = arith.addf %432, %433 : vector<16x128xf32>
    %435 = arith.addf %355, %434 : vector<16x128xf32>
    %c0_169 = arith.constant 0 : index
    %c0_170 = arith.constant 0 : index
    %c0_171 = arith.constant 0 : index
    %436 = vector.load %arg23[%c0_169, %c0_170, %c0_171] : memref<1x16x128xf32, #tpu.memory_space<vmem>>, vector<1x16x128xf32>
    %437 = vector.shape_cast %436 : vector<1x16x128xf32> to vector<16x128xf32>
    %438 = vector.shape_cast %435 : vector<16x128xf32> to vector<1x16x128xf32>
    tpu.vector_store %arg23[%c0_169, %c0_170, %c0_171], %438 {strides = array<i32>} : memref<1x16x128xf32, #tpu.memory_space<vmem>>, vector<1x16x128xf32>,
    return
  }
  func.func @transform_0(%arg0: i32, %arg1: i32) -> (i32, i32, i32) {
    %c0_i32 = arith.constant 0 : i32
    %c0_i32_0 = arith.constant 0 : i32
    %c0_i32_1 = arith.constant 0 : i32
    return %arg0, %c0_i32, %c0_i32_0 : i32, i32, i32
  }
  func.func @transform_1(%arg0: i32, %arg1: i32) -> (i32, i32, i32) {
    %c0_i32 = arith.constant 0 : i32
    %c0_i32_0 = arith.constant 0 : i32
    %c0_i32_1 = arith.constant 0 : i32
    return %arg0, %c0_i32, %c0_i32_0 : i32, i32, i32
  }
  func.func @transform_2(%arg0: i32, %arg1: i32) -> (i32, i32, i32) {
    %c2_i32 = arith.constant 2 : i32
    %0 = arith.muli %arg0, %c2_i32 : i32
    %1 = arith.addi %0, %arg1 : i32
    %c0_i32 = arith.constant 0 : i32
    %c0_i32_0 = arith.constant 0 : i32
    %c0_i32_1 = arith.constant 0 : i32
    return %1, %c0_i32, %c0_i32_0 : i32, i32, i32
  }
  func.func @transform_3(%arg0: i32, %arg1: i32) -> (i32, i32, i32) {
    %c0_i32 = arith.constant 0 : i32
    %c0_i32_0 = arith.constant 0 : i32
    %c0_i32_1 = arith.constant 0 : i32
    return %arg1, %c0_i32, %c0_i32_0 : i32, i32, i32
  }
  func.func @transform_4(%arg0: i32, %arg1: i32) -> (i32, i32, i32) {
    %c0_i32 = arith.constant 0 : i32
    %c0_i32_0 = arith.constant 0 : i32
    %c0_i32_1 = arith.constant 0 : i32
    return %arg1, %c0_i32, %c0_i32_0 : i32, i32, i32
  }
  func.func @transform_5(%arg0: i32, %arg1: i32) -> (i32, i32, i32) {
    %c0_i32 = arith.constant 0 : i32
    %c0_i32_0 = arith.constant 0 : i32
    %c0_i32_1 = arith.constant 0 : i32
    return %arg1, %c0_i32, %c0_i32_0 : i32, i32, i32
  }
  func.func @transform_6(%arg0: i32, %arg1: i32) -> (i32, i32, i32) {
    %c0_i32 = arith.constant 0 : i32
    %c0_i32_0 = arith.constant 0 : i32
    %c0_i32_1 = arith.constant 0 : i32
    return %arg1, %c0_i32, %c0_i32_0 : i32, i32, i32
  }
  func.func @transform_7(%arg0: i32, %arg1: i32) -> (i32, i32, i32) {
    %c0_i32 = arith.constant 0 : i32
    %c0_i32_0 = arith.constant 0 : i32
    %c0_i32_1 = arith.constant 0 : i32
    return %arg1, %c0_i32, %c0_i32_0 : i32, i32, i32
  }
  func.func @transform_8(%arg0: i32, %arg1: i32) -> (i32, i32, i32) {
    %c0_i32 = arith.constant 0 : i32
    %c0_i32_0 = arith.constant 0 : i32
    %c0_i32_1 = arith.constant 0 : i32
    return %arg1, %c0_i32, %c0_i32_0 : i32, i32, i32
  }
  func.func @transform_9(%arg0: i32, %arg1: i32) -> (i32, i32, i32) {
    %c0_i32 = arith.constant 0 : i32
    %c0_i32_0 = arith.constant 0 : i32
    %c0_i32_1 = arith.constant 0 : i32
    return %arg1, %c0_i32, %c0_i32_0 : i32, i32, i32
  }
  func.func @transform_10(%arg0: i32, %arg1: i32) -> (i32, i32, i32) {
    %c0_i32 = arith.constant 0 : i32
    %c0_i32_0 = arith.constant 0 : i32
    %c0_i32_1 = arith.constant 0 : i32
    return %arg1, %c0_i32, %c0_i32_0 : i32, i32, i32
  }
  func.func @transform_11(%arg0: i32, %arg1: i32) -> (i32, i32, i32) {
    %c0_i32 = arith.constant 0 : i32
    %c0_i32_0 = arith.constant 0 : i32
    %c0_i32_1 = arith.constant 0 : i32
    return %arg1, %c0_i32, %c0_i32_0 : i32, i32, i32
  }
  func.func @transform_12(%arg0: i32, %arg1: i32) -> (i32, i32, i32) {
    %c0_i32 = arith.constant 0 : i32
    %c0_i32_0 = arith.constant 0 : i32
    %c0_i32_1 = arith.constant 0 : i32
    return %arg1, %c0_i32, %c0_i32_0 : i32, i32, i32
  }
  func.func @transform_13(%arg0: i32, %arg1: i32) -> (i32, i32, i32) {
    %c0_i32 = arith.constant 0 : i32
    %c0_i32_0 = arith.constant 0 : i32
    %c0_i32_1 = arith.constant 0 : i32
    return %arg1, %c0_i32, %c0_i32_0 : i32, i32, i32
  }
  func.func @transform_14(%arg0: i32, %arg1: i32) -> (i32, i32, i32) {
    %c0_i32 = arith.constant 0 : i32
    %c0_i32_0 = arith.constant 0 : i32
    %c0_i32_1 = arith.constant 0 : i32
    return %arg1, %c0_i32, %c0_i32_0 : i32, i32, i32
  }
  func.func @transform_15(%arg0: i32, %arg1: i32) -> (i32, i32, i32) {
    %c0_i32 = arith.constant 0 : i32
    %c0_i32_0 = arith.constant 0 : i32
    %c0_i32_1 = arith.constant 0 : i32
    return %arg1, %c0_i32, %c0_i32_0 : i32, i32, i32
  }
  func.func @transform_16(%arg0: i32, %arg1: i32) -> (i32, i32, i32) {
    %c0_i32 = arith.constant 0 : i32
    %c0_i32_0 = arith.constant 0 : i32
    %c0_i32_1 = arith.constant 0 : i32
    return %arg1, %c0_i32, %c0_i32_0 : i32, i32, i32
  }
  func.func @transform_17(%arg0: i32, %arg1: i32) -> (i32, i32, i32) {
    %c0_i32 = arith.constant 0 : i32
    %c0_i32_0 = arith.constant 0 : i32
    %c0_i32_1 = arith.constant 0 : i32
    return %arg1, %c0_i32, %c0_i32_0 : i32, i32, i32
  }
  func.func @transform_18(%arg0: i32, %arg1: i32) -> (i32, i32, i32) {
    %c0_i32 = arith.constant 0 : i32
    %c0_i32_0 = arith.constant 0 : i32
    %c0_i32_1 = arith.constant 0 : i32
    return %arg1, %c0_i32, %c0_i32_0 : i32, i32, i32
  }
  func.func @transform_19(%arg0: i32, %arg1: i32) -> (i32, i32, i32) {
    %c0_i32 = arith.constant 0 : i32
    %c0_i32_0 = arith.constant 0 : i32
    %c0_i32_1 = arith.constant 0 : i32
    return %arg1, %c0_i32, %c0_i32_0 : i32, i32, i32
  }
  func.func @transform_20(%arg0: i32, %arg1: i32) -> (i32, i32, i32) {
    %c0_i32 = arith.constant 0 : i32
    %c0_i32_0 = arith.constant 0 : i32
    %c0_i32_1 = arith.constant 0 : i32
    return %arg1, %c0_i32, %c0_i32_0 : i32, i32, i32
  }
  func.func @transform_21(%arg0: i32, %arg1: i32) -> (i32, i32, i32) {
    %c0_i32 = arith.constant 0 : i32
    %c0_i32_0 = arith.constant 0 : i32
    %c0_i32_1 = arith.constant 0 : i32
    return %arg0, %c0_i32, %c0_i32_0 : i32, i32, i32
  }
}

</mosaic_0001>

<bundles_post_ra>
// kernel: motion_transformer_forward.6
= control target key start
LH: loop header
LB: loop body
LE: loop exit
PB: predicated region body
PF: predicated region fallthrough
CT: control target
= control target key end

     0   :  { %8 = vsyncpa [#allocation3], 0  ;;  %s558_s0 = inlined_call_operand.vmem [shape: f32[2,128], index: 0, kind: input, shape index: {}]   ;;  %s559_s1 = inlined_call_operand.hbm [shape: bf16[128,512], index: 1, kind: input, shape index: {}]   ;;  %s560_s2 = inlined_call_operand.hbm [shape: f32[1,512], index: 2, kind: input, shape index: {}]   ;;  %s561_s3 = inlined_call_operand.vmem [shape: f32[2,512], index: 3, kind: output, shape index: {}]  }
   0x1   :  { %9 = vsyncpa [#allocation5], 0  ;;  %s502_s12 = smov [#allocation2]   ;;  %s454_s16 = scalar_lea.hbm %s559_s1, 4096 }
   0x2   :  { %s17_s13 = sshll.u32 %s502_s12, 4  ;;  %p455_p0 = scmp.ne.s32.totalorder %s559_s1, %s454_s16  ;;  %s18_s13 = int_to_ptr.vmem [resolvable:$true] %s17_s13 }
   0x3   :  { %p458_p1 = scmp.lt.u32.totalorder %s454_s16, %s559_s1 }
   0x5   :  { %p460_p2 = pnand %p458_p1, %p455_p0 }
   0x7   :  { %463 = shalt.err (!%p460_p2)
}
   0x8   :  { %s464_s21 = scalar_lea.vmem %s18_s13, 4096  ;;  %p469_p4 = scmp.lt.s32.totalorder %s18_s13, %s18_s13 }
   0x9   :  { %p465_p3 = scmp.ne.s32.totalorder %s18_s13, %s464_s21  ;;  %p470_p5 = scmp.lt.s32.totalorder %s464_s21, %s464_s21 }
   0xb   :  { %p471_p6 = por %p470_p5, %p469_p4 }
   0xd   :  { %p472_p7 = pnand %p471_p6, %p465_p3 }
   0xf   :  { %475 = shalt.err (!%p472_p7)
}
  0x10   :  { %s503_s22 = smov 256   ;;  %s504_s23 = smov 16  }
  0x11   :  { %23 = dma.hbm_to_vmem [thread:$0]  %s559_s1, 4096, %s18_s13, [#allocation3], %s503_s22, %s503_s22, %s504_s23  }
  0x12   :  { %s505_s26 = smov [#allocation4]   ;;  %s476_s30 = scalar_lea.hbm %s560_s2, 64 }
  0x13   :  { %s30_s27 = sshll.u32 %s505_s26, 4  ;;  %p477_p8 = scmp.ne.s32.totalorder %s560_s2, %s476_s30  ;;  %s31_s27 = int_to_ptr.vmem [resolvable:$true] %s30_s27 }
  0x14   :  { %p480_p9 = scmp.lt.u32.totalorder %s476_s30, %s560_s2 }
  0x16   :  { %p482_p10 = pnand %p480_p9, %p477_p8 }
  0x18   :  { %485 = shalt.err (!%p482_p10)
}
  0x19   :  { %s486_s8 = scalar_lea.vmem %s31_s27, 64  ;;  %p491_p12 = scmp.lt.s32.totalorder %s31_s27, %s31_s27 }
  0x1a   :  { %p487_p11 = scmp.ne.s32.totalorder %s31_s27, %s486_s8  ;;  %p492_p13 = scmp.lt.s32.totalorder %s486_s8, %s486_s8 }
  0x1c   :  { %p493_p0 = por %p492_p13, %p491_p12 }
  0x1e   :  { %p494_p1 = pnand %p493_p0, %p487_p11 }
  0x20   :  { %497 = shalt.err (!%p494_p1)
}
  0x21   :  { %33 = dma.hbm_to_vmem [thread:$0]  %s560_s2, 64, %s31_s27, [#allocation5]  }
  0x22   :  { %498 = dma.done.wait [#allocation3], 4096  }
  0x23   :  { %499 = vsyncadd [#allocation3], 4294963200 }
  0x24   :  { %500 = dma.done.wait [#allocation5], 64  }
  0x25   :  { %501 = vsyncadd [#allocation5], 4294967232  ;;  %v506_v0 = vmov 0   ;;  %v406_v1 = vld [vmem:[#allocation2 + $0x4] ss:$16 sps:$4 sm:$0xff]   ;;  %v77_v35 = vlaneseq }
  0x26   :  { %289 = vmatprep.mubr.bf16.mxu0 %v506_v0  ;;  %330 = vmatprep.mubr.bf16.mxu1 %v506_v0  ;;  %v408_v2 = vld [vmem:[#allocation2 + $0xc] ss:$16 sps:$4 sm:$0xff]   ;;  %v410_v3 = vld [vmem:[#allocation2] ss:$16 sps:$4 sm:$0xff]   ;;  %v411_v4 = vld [vmem:[#allocation2 + $0x8] ss:$16 sps:$4 sm:$0xff]  }
  0x27   :  { %257 = vmatprep.subr.bf16.mxu0 %v406_v1  ;;  %298 = vmatprep.subr.bf16.mxu1 %v408_v2  ;;  %v412_v5 = vld [vmem:[#allocation2 + $0x24] ss:$16 sps:$4 sm:$0xff]   ;;  %v414_v6 = vld [vmem:[#allocation2 + $0x2c] ss:$16 sps:$4 sm:$0xff]   ;;  %v416_v7 = vld [vmem:[#allocation2 + $0x20] ss:$16 sps:$4 sm:$0xff]  }
  0x28   :  { %258 = vmatpush1.bf16.msra.mxu0 %v410_v3  ;;  %299 = vmatpush1.bf16.msra.mxu1 %v411_v4  ;;  %v417_v8 = vld [vmem:[#allocation2 + $0x28] ss:$16 sps:$4 sm:$0xff]   ;;  %v418_v9 = vld [vmem:[#allocation2 + $0x44] ss:$16 sps:$4 sm:$0xff]   ;;  %v420_v10 = vld [vmem:[#allocation2 + $0x4c] ss:$16 sps:$4 sm:$0xff]  }
  0x29   :  { %259 = vmatprep.subr.bf16.mxu0 %v412_v5  ;;  %300 = vmatprep.subr.bf16.mxu1 %v414_v6  ;;  %v422_v11 = vld [vmem:[#allocation2 + $0x40] ss:$16 sps:$4 sm:$0xff]   ;;  %v423_v12 = vld [vmem:[#allocation2 + $0x48] ss:$16 sps:$4 sm:$0xff]   ;;  %v424_v13 = vld [vmem:[#allocation2 + $0x64] ss:$16 sps:$4 sm:$0xff]  }
  0x2a   :  { %v426_v14 = vld [vmem:[#allocation2 + $0x6c] ss:$16 sps:$4 sm:$0xff]   ;;  %v428_v15 = vld [vmem:[#allocation2 + $0x60] ss:$16 sps:$4 sm:$0xff]   ;;  %v429_v16 = vld [vmem:[#allocation2 + $0x68] ss:$16 sps:$4 sm:$0xff]  }
  0x2b   :  { %v430_v17 = vld [vmem:[#allocation2 + $0x84] ss:$16 sps:$4 sm:$0xff]   ;;  %v432_v18 = vld [vmem:[#allocation2 + $0x8c] ss:$16 sps:$4 sm:$0xff]   ;;  %v434_v19 = vld [vmem:[#allocation2 + $0x80] ss:$16 sps:$4 sm:$0xff]  }
  0x2c   :  { %260 = vmatpush1.bf16.msra.mxu0 %v416_v7  ;;  %301 = vmatpush1.bf16.msra.mxu1 %v417_v8  ;;  %v435_v20 = vld [vmem:[#allocation2 + $0x88] ss:$16 sps:$4 sm:$0xff]   ;;  %v436_v21 = vld [vmem:[#allocation2 + $0xa4] ss:$16 sps:$4 sm:$0xff]   ;;  %v438_v22 = vld [vmem:[#allocation2 + $0xac] ss:$16 sps:$4 sm:$0xff]  }
  0x2d   :  { %261 = vmatprep.subr.bf16.mxu0 %v418_v9  ;;  %302 = vmatprep.subr.bf16.mxu1 %v420_v10  ;;  %v440_v23 = vld [vmem:[#allocation2 + $0xa0] ss:$16 sps:$4 sm:$0xff]   ;;  %v441_v24 = vld [vmem:[#allocation2 + $0xa8] ss:$16 sps:$4 sm:$0xff]   ;;  %v442_v25 = vld [vmem:[#allocation2 + $0xc4] ss:$16 sps:$4 sm:$0xff]  }
  0x2e   :  { %v444_v26 = vld [vmem:[#allocation2 + $0xcc] ss:$16 sps:$4 sm:$0xff]   ;;  %v446_v27 = vld [vmem:[#allocation2 + $0xc0] ss:$16 sps:$4 sm:$0xff]   ;;  %v447_v28 = vld [vmem:[#allocation2 + $0xc8] ss:$16 sps:$4 sm:$0xff]  }
  0x2f   :  { %v448_v29 = vld [vmem:[#allocation2 + $0xe4] ss:$16 sps:$4 sm:$0xff]   ;;  %v450_v30 = vld [vmem:[#allocation2 + $0xec] ss:$16 sps:$4 sm:$0xff]   ;;  %v452_v31 = vld [vmem:[#allocation2 + $0xe0] ss:$16 sps:$4 sm:$0xff]  }
  0x30   :  { %262 = vmatpush1.bf16.msra.mxu0 %v422_v11  ;;  %303 = vmatpush1.bf16.msra.mxu1 %v423_v12  ;;  %v453_v32 = vld [vmem:[#allocation2 + $0xe8] ss:$16 sps:$4 sm:$0xff]   ;;  %v41_v33 = vld [vmem:[%s558_s0] sm:$0x3]  ;;  %v78_v36 = vshrl.u32 %v77_v35, 7 }
  0x31   :  { %263 = vmatprep.subr.bf16.mxu0 %v424_v13  ;;  %304 = vmatprep.subr.bf16.mxu1 %v426_v14  ;;  %v42_v34 = vpack.c.bf16 %v41_v33, %v41_v33  ;;  %v75_v39 = vld [vmem:[#allocation4] sm:$0xf]  ;;  %v507_v41 = vmov 1983009808  }
  0x32   :  { %v79_v37 = vsub.s32 0, %v78_v36  ;;  %v87_v38 = vsub.s32 2, %v78_v36  ;;  %v83_v40 = vsub.s32 1, %v78_v36  ;;  %v346_v42 = vunpack.c.l.s4 %v507_v41 }
  0x33   :  { %v91_v43 = vsub.s32 3, %v78_v36 }
  0x34   :  { %264 = vmatpush1.bf16.msra.mxu0 %v428_v15  ;;  %305 = vmatpush1.bf16.msra.mxu1 %v429_v16  ;;  %v80_v44 = vrot.slane %v75_v39, %v79_v37  ;;  %v88_v45 = vrot.slane %v75_v39, %v87_v38  ;;  %v84_v46 = vrot.slane %v75_v39, %v83_v40  ;;  %v347_v47 = vunpack.c.0.s8 %v346_v42 }
  0x35   :  { %265 = vmatprep.subr.bf16.mxu0 %v430_v17  ;;  %306 = vmatprep.subr.bf16.mxu1 %v432_v18  ;;  %v92_v48 = vrot.slane %v75_v39, %v91_v43 }
  0x36   :  { %v350_v56 = vsub.s32 %v347_v47, %v78_v36 }
  0x38   :  { %266 = vmatpush1.bf16.msra.mxu0 %v434_v19  ;;  %307 = vmatpush1.bf16.msra.mxu1 %v435_v20 }
  0x39   :  { %267 = vmatprep.subr.bf16.mxu0 %v436_v21  ;;  %308 = vmatprep.subr.bf16.mxu1 %v438_v22 }
  0x3c   :  { %268 = vmatpush1.bf16.msra.mxu0 %v440_v23  ;;  %309 = vmatpush1.bf16.msra.mxu1 %v441_v24 }
  0x3d   :  { %269 = vmatprep.subr.bf16.mxu0 %v442_v25  ;;  %310 = vmatprep.subr.bf16.mxu1 %v444_v26 }
  0x40   :  { %270 = vmatpush1.bf16.msra.mxu0 %v446_v27  ;;  %311 = vmatpush1.bf16.msra.mxu1 %v447_v28 }
  0x41   :  { %271 = vmatprep.subr.bf16.mxu0 %v448_v29  ;;  %312 = vmatprep.subr.bf16.mxu1 %v450_v30 }
  0x44   :  { %272 = vmatpush1.bf16.msra.mxu0 %v452_v31  ;;  %313 = vmatpush1.bf16.msra.mxu1 %v453_v32 }
  0x47   :  { %290 = vmatmul.mubr.bf16.vlgmr.msra.gmra.mrb[0].mxu0 %v42_v34  ;;  %331 = vmatmul.mubr.bf16.vlgmr.msra.gmra.mrb[0].mxu1 %v42_v34 }
 0x11a   :  { %v291_v49 = vpop.f32.mrb[0].mxu0  ;;  %v332_v50 = vpop.f32.mrb[0].mxu1 }
 0x11b   :  { %v292_v51 = vadd.f32 %v291_v49, %v80_v44  ;;  %v333_v52 = vadd.f32 %v332_v50, %v88_v45  ;;  %v293_v53 = vpop.f32.mrb[1].mxu0  ;;  %v334_v54 = vpop.f32.mrb[1].mxu1 }
 0x11c   :  { %v294_v55 = vadd.f32 %v293_v53, %v84_v46  ;;  %v335_v57 = vadd.f32 %v334_v54, %v92_v48  ;;  %v295_v58 = vpop.f32.mrb[2].mxu0  ;;  %v336_v59 = vpop.f32.mrb[2].mxu1 }
 0x11d   :  { %v296_v60 = vpop.f32.mrb[3].mxu0  ;;  %v337_v61 = vpop.f32.mrb[3].mxu1 }
 0x11e   :  { %v343_v62 = vcombine.low %v292_v51, %v294_v55  ;;  %v344_v63 = vcombine.low %v333_v52, %v335_v57 }
 0x120   :  { %v351_v0 = vrot.slane %v343_v62, %v350_v56  ;;  %v358_v1 = vrot.slane %v344_v63, %v350_v56 }
 0x122   :  { %v359_v2 = vcombine.low %v351_v0, %v358_v1 }
 0x124   :  { %361 = vst [vmem:[%s561_s3] sm:$0xff] %v359_v2 }
 0x125   :  { %366 = vsyncpa [#allocation3], 1 }
 0x126   :  { %367 = vsyncpa [#allocation5], 1 }

// kernel: motion_transformer_forward.9
= control target key start
LH: loop header
LB: loop body
LE: loop exit
PB: predicated region body
PF: predicated region fallthrough
CT: control target
= control target key end

     0   :  { %vm42_vm0 = vcmask 1045504   ;;  %vm35_vm1 = vcmask 97280   ;;  %s168_s1 = inlined_call_operand.vmem [shape: bf16[12,128], index: 1, kind: input, shape index: {}]   ;;  %s169_s0 = inlined_call_operand.vmem [shape: f32[32,12], index: 0, kind: input, shape index: {}]   ;;  %s170_s2 = inlined_call_operand.vmem [shape: f32[1,128], index: 2, kind: input, shape index: {}]   ;;  %s171_s3 = inlined_call_operand.vmem [shape: f32[32,128], index: 3, kind: output, shape index: {}]  }
   0x1   :  { %v117_v0 = vld [vmem:[%s168_s1] sm:$0x3f]   ;;  %v16_v2 = vld [vmem:[%s169_s0 + $0x8] sm:$0xff]  ;;  %v17_v3 = vld [vmem:[%s169_s0 + $0x10] sm:$0xff] }
   0x2   :  { %v15_v1 = vld [vmem:[%s169_s0] sm:$0xff]  ;;  %116 = vmatprep.subr.msk.bf16.mxu0 %vm42_vm0, %v117_v0  ;;  %v44_v4 = vsel %vm42_vm0, %v117_v0, 0  ;;  %v18_v6 = vld [vmem:[%s169_s0 + $0x18] sm:$0xff] }
   0x3   :  { %v19_v5 = vpack.c.bf16 %v16_v2, %v15_v1  ;;  %111 = vmatpush3.bf16.msra.mxu0 %v44_v4  ;;  %v20_v7 = vpack.c.bf16 %v18_v6, %v17_v3  ;;  %v103_v8 = vld [vmem:[%s170_s2] ss:$0 sm:$0xff] }
   0x5   :  { %112 = vmatprep.mubr.msk.bf16.mxu0 %vm35_vm1, %v19_v5 }
   0x6   :  { %113 = vmatmul.mubr.msk.bf16.vlgmr.msra.gmra.mrb[0].mxu0 %vm35_vm1, %v20_v7 }
  0xd9   :  { %v114_v9 = vpop.f32.mrb[0].mxu0 }
  0xda   :  { %v89_v10 = vadd.f32 %v114_v9, %v103_v8  ;;  %v80_v11 = vpop.f32.mrb[1].mxu0 }
  0xdb   :  { %v81_v12 = vadd.f32 %v103_v8, %v80_v11  ;;  %v115_v13 = vpop.f32.mrb[2].mxu0 }
  0xdc   :  { %97 = vst [vmem:[%s171_s3 + $0x10] sm:$0xff] %v89_v10  ;;  %v92_v14 = vadd.f32 %v115_v13, %v103_v8  ;;  %v83_v15 = vpop.f32.mrb[3].mxu0 }
  0xdd   :  { %95 = vst [vmem:[%s171_s3] sm:$0xff] %v81_v12  ;;  %v84_v16 = vadd.f32 %v103_v8, %v83_v15 }
  0xde   :  { %98 = vst [vmem:[%s171_s3 + $0x18] sm:$0xff] %v92_v14 }
  0xdf   :  { %96 = vst [vmem:[%s171_s3 + $0x8] sm:$0xff] %v84_v16 }

// kernel: motion_transformer_forward.8
= control target key start
LH: loop header
LB: loop body
LE: loop exit
PB: predicated region body
PF: predicated region fallthrough
CT: control target
= control target key end

     0   :  { %8 = vsyncpa [#allocation3], 0  ;;  %s2183_s0 = inlined_call_operand.vmem [shape: f32[2,512], index: 0, kind: input, shape index: {}]   ;;  %s2184_s1 = inlined_call_operand.hbm [shape: bf16[512,1536], index: 1, kind: input, shape index: {}]   ;;  %s2185_s2 = inlined_call_operand.vmem [shape: f32[1,1536], index: 2, kind: input, shape index: {}]   ;;  %s2186_s3 = inlined_call_operand.vmem [shape: f32[2,1536], index: 3, kind: output, shape index: {}]  }
   0x1   :  { %10 = vsyncpa [#allocation3 + $0x1], 0  ;;  %s1899_s12 = smov 0   ;;  %s1901_s13 = smov 0  }
   0x2   :  { %s1903_s14 = smov 0   ;;  %s1905_s15 = smov 0  }
   0x3   :  { %s1907_s16 = smov 0   ;;  %s1909_s17 = smov 0  }
   0x4 LB: > { %s1381_s18 = sadd.s32 4294967295, %s1872_s17   ;;  %s25_s19 = sadd.s32 1, %s1868_s16  ;;  %s1872_s17 = sphi %s1909_s17, %s16_s17   ;;  %s1868_s16 = sphi %s1907_s16, %s2195_s16   ;;  %s1864_s15 = sphi %s1905_s15, %s2194_s15   ;;  %s1860_s14 = sphi %s1903_s14, %s2193_s14   ;;  %s1856_s13 = sphi %s1901_s13, %s2192_s13   ;;  %s1852_s12 = sphi %s1899_s12, %s2191_s12  }
   0x5   : > { %p26_p0 = scmp.ge.s32.totalorder %s25_s19, 3  ;;  %s61_s20 = sadd.s32 1, %s1860_s14 }
   0x6   : > { %p68_p1 = scmp.ne.s32.totalorder %s1860_s14, %s1856_s13  ;;  %p69_p2 = scmp.eq.s32.totalorder %s1872_s17, 0 }
   0x7   : > { %s2197_s19 = smov (%p26_p0, %s25_s19), 0  ;;  %p74_p4 = scmp.ne.s32.totalorder %s1856_s13, %s1852_s12 }
   0x8   : > { %p1935_p3 = por %p69_p2, %p68_p1  ;;  %s58_s22 = ssub.s32 %s1868_s16, %s2197_s19 }
   0x9   : > { %p75_p5 = scmp.eq.s32.totalorder %s1381_s18, 0  ;;  %p59_p6 = scmp.eq.s32.totalorder %s58_s22, 0 }
   0xa   : > { %p1543_p8 = scmp.lt.s32.totalorder %s1872_s17, 3  ;;  %s160_s25 = sand.u32 1, %s1860_s14  }
   0xb   : > { %p1942_p7 = por %p75_p5, %p74_p4  ;;  %s1524_s26 = sshll.u32 %s1868_s16, 8 }
   0xc   : > { %s1948_s24 = scalar_select %p59_p6, %s1860_s14, %s61_s20  }
   0xd   : > { %s1386_s27 = sshll.u32 %s160_s25, 10  ;;  %s1955_s30 = scalar_lea.hbm %s2184_s1, %s1524_s26 }
   0xe   : > { %s164_s4 = scalar_lea.vmem [#allocation2], %s1386_s27  ;;  %p1959_p9 = pnand %p1543_p8, %p1935_p3 }
   0xf   : > { %s171_s5 = sshll.u32 %s164_s4, 4  ;;  %s1966_s7 = scalar_lea.sflag [#allocation3], %s160_s25  ;;  %s1963_s5 = int_to_ptr.vmem [resolvable:$true] %s171_s5 }
  0x10   : > { %s1792_s8 = scalar_lea.hbm %s1955_s30, 16384  ;;  %p1794_p12 = pneg %p1959_p9 }
  0x11   : > { %p1793_p11 = scmp.ne.s32.totalorder %s1955_s30, %s1792_s8  ;;  %s1797_s11 = scalar_lea.hbm %s2184_s1, 49152 }
  0x12   : > { %p1798_p1 = scmp.lt.u32.totalorder %s1955_s30, %s2184_s1  ;;  %p1799_p2 = scmp.lt.u32.totalorder %s1797_s11, %s1792_s8 }
  0x13   : > { %p1795_p13 = pnand %p1794_p12, %p1793_p11  ;;  %p1801_p4 = scmp.lt.u32.totalorder %s1792_s8, %s1955_s30 }
  0x14   : > { %p1800_p3 = por %p1799_p2, %p1798_p1 }
  0x15   : > { %p1796_p0 = pneg %p1795_p13 }
  0x16   : > { %p1802_p5 = por %p1801_p4, %p1800_p3 }
  0x18   : > { %p1803_p6 = pnand %p1802_p5, %p1796_p0 }
  0x1a   : > { %1806 = shalt.err (!%p1803_p6)
}
  0x1b   : > { %s1807_s20 = scalar_lea.vmem %s1963_s5, 16384  ;;  %s1874_s21 = smov [#allocation2]  }
  0x1c   : > { %p1808_p8 = scmp.ne.s32.totalorder %s1963_s5, %s1807_s20  ;;  %s1812_s22 = sshll.u32 %s1874_s21, 4  ;;  %s1813_s22 = int_to_ptr.vmem [resolvable:$false] %s1812_s22 }
  0x1d   : > { %s1814_s25 = scalar_lea.vmem %s1813_s22, 32768  ;;  %p1815_p10 = scmp.lt.s32.totalorder %s1963_s5, %s1813_s22 }
  0x1e   : > { %p1810_p11 = pnand %p1808_p8, %p1794_p12  ;;  %p1816_p1 = scmp.lt.s32.totalorder %s1814_s25, %s1807_s20 }
  0x20   : > { %p1811_p13 = pneg %p1810_p11  ;;  %p1817_p2 = por %p1816_p1, %p1815_p10 }
  0x22   : > { %p1818_p3 = pnand %p1817_p2, %p1811_p13 }
  0x24   : > { %1821 = shalt.err (!%p1818_p3)
}
  0x25   : > { %s1875_s26 = smov 768   ;;  %s1876_s27 = smov 256  }
  0x26   : > { %s1877_s28 = smov 16   ;;  %p187_p12 = scmp.lt.s32.totalorder %s1872_s17, 4 }
  0x27   : > { %1542 = dma.hbm_to_vmem [thread:$0]  (!%p1959_p9), %s1955_s30, 16384, %s1963_s5, %s1966_s7, %s1875_s26, %s1876_s27, %s1877_s28  }
  0x28   : > { %p2190_p0 = scmp.ge.s32.totalorder %s1872_s17, 1 }
  0x2a   : > { %p188_p4 = pnand %p2190_p0, %p187_p12 }
  0x2b   : > { %s193_s29 = sand.u32 (!%p188_p4), 1, %s1856_s13  }
  0x2c   : > { %191 = sbr.rel (%p188_p4) target bundleno = 403 (0x193), region = 32  ;;  %s1390_s4 = sshll.u32 (!%p188_p4), %s193_s29, 10 }
  0x2d   : > { %s194_s8 = scalar_lea.sflag (!%p188_p4), [#allocation3], %s193_s29  ;;  %s1998_s9 = scalar_lea.vmem (!%p188_p4), [#allocation2], %s1390_s4 }
  0x33   : > { %1847 = dma.done.wait (%p1942_p7), %s194_s8, 16384  }
  0x34   : > { %1849 = vsyncadd (%p1942_p7), %s194_s8, 4294950912  ;;  %v1596_v0 = vld [vmem:[%s1998_s9 + $0x4] ss:$16 sps:$4 sm:$0xff]   ;;  %v1598_v1 = vld [vmem:[%s1998_s9 + $0xc] ss:$16 sps:$4 sm:$0xff]   ;;  %s1391_s5 = sshll.u32 %s1864_s15, 2 }
  0x35   : > { %1078 = vmatprep.subr.bf16.mxu0 %v1596_v0  ;;  %v1600_v2 = vld [vmem:[%s1998_s9] ss:$16 sps:$4 sm:$0xff]   ;;  %v1601_v3 = vld [vmem:[%s1998_s9 + $0x8] ss:$16 sps:$4 sm:$0xff]   ;;  %1160 = vmatprep.subr.bf16.mxu1 %v1598_v1  ;;  %v1602_v4 = vld [vmem:[%s1998_s9 + $0x24] ss:$16 sps:$4 sm:$0xff]  }
  0x36   : > { %1079 = vmatpush1.bf16.msra.mxu0 %v1600_v2  ;;  %1161 = vmatpush1.bf16.msra.mxu1 %v1601_v3  ;;  %v1604_v5 = vld [vmem:[%s1998_s9 + $0x2c] ss:$16 sps:$4 sm:$0xff]   ;;  %v1606_v6 = vld [vmem:[%s1998_s9 + $0x20] ss:$16 sps:$4 sm:$0xff]   ;;  %v1607_v7 = vld [vmem:[%s1998_s9 + $0x28] ss:$16 sps:$4 sm:$0xff]  }
  0x37   : > { %1080 = vmatprep.subr.bf16.mxu0 %v1602_v4  ;;  %1162 = vmatprep.subr.bf16.mxu1 %v1604_v5  ;;  %v1608_v8 = vld [vmem:[%s1998_s9 + $0x44] ss:$16 sps:$4 sm:$0xff]   ;;  %v1610_v9 = vld [vmem:[%s1998_s9 + $0x4c] ss:$16 sps:$4 sm:$0xff]   ;;  %v1612_v10 = vld [vmem:[%s1998_s9 + $0x40] ss:$16 sps:$4 sm:$0xff]  }
  0x38   : > { %v1613_v11 = vld [vmem:[%s1998_s9 + $0x48] ss:$16 sps:$4 sm:$0xff]   ;;  %v1614_v12 = vld [vmem:[%s1998_s9 + $0x64] ss:$16 sps:$4 sm:$0xff]   ;;  %v1616_v13 = vld [vmem:[%s1998_s9 + $0x6c] ss:$16 sps:$4 sm:$0xff]  }
  0x39   : > { %v1618_v14 = vld [vmem:[%s1998_s9 + $0x60] ss:$16 sps:$4 sm:$0xff]   ;;  %v1619_v15 = vld [vmem:[%s1998_s9 + $0x68] ss:$16 sps:$4 sm:$0xff]   ;;  %v1620_v16 = vld [vmem:[%s1998_s9 + $0x84] ss:$16 sps:$4 sm:$0xff]  }
  0x3a   : > { %1081 = vmatpush1.bf16.msra.mxu0 %v1606_v6  ;;  %1163 = vmatpush1.bf16.msra.mxu1 %v1607_v7  ;;  %v1622_v17 = vld [vmem:[%s1998_s9 + $0x8c] ss:$16 sps:$4 sm:$0xff]   ;;  %v1624_v18 = vld [vmem:[%s1998_s9 + $0x80] ss:$16 sps:$4 sm:$0xff]   ;;  %v1625_v19 = vld [vmem:[%s1998_s9 + $0x88] ss:$16 sps:$4 sm:$0xff]   ;;  %v267_v7 = vlaneseq }
  0x3b   : > { %1082 = vmatprep.subr.bf16.mxu0 %v1608_v8  ;;  %1164 = vmatprep.subr.bf16.mxu1 %v1610_v9  ;;  %v1626_v20 = vld [vmem:[%s1998_s9 + $0xa4] ss:$16 sps:$4 sm:$0xff]   ;;  %v1628_v21 = vld [vmem:[%s1998_s9 + $0xac] ss:$16 sps:$4 sm:$0xff]   ;;  %v1630_v22 = vld [vmem:[%s1998_s9 + $0xa0] ss:$16 sps:$4 sm:$0xff]  }
  0x3c   : > { %v1631_v23 = vld [vmem:[%s1998_s9 + $0xa8] ss:$16 sps:$4 sm:$0xff]   ;;  %v1632_v24 = vld [vmem:[%s1998_s9 + $0xc4] ss:$16 sps:$4 sm:$0xff]   ;;  %v1634_v25 = vld [vmem:[%s1998_s9 + $0xcc] ss:$16 sps:$4 sm:$0xff]  }
  0x3d   : > { %v1636_v26 = vld [vmem:[%s1998_s9 + $0xc0] ss:$16 sps:$4 sm:$0xff]   ;;  %v1637_v27 = vld [vmem:[%s1998_s9 + $0xc8] ss:$16 sps:$4 sm:$0xff]   ;;  %v1638_v28 = vld [vmem:[%s1998_s9 + $0xe4] ss:$16 sps:$4 sm:$0xff]  }
  0x3e   : > { %1083 = vmatpush1.bf16.msra.mxu0 %v1612_v10  ;;  %1165 = vmatpush1.bf16.msra.mxu1 %v1613_v11  ;;  %v1640_v29 = vld [vmem:[%s1998_s9 + $0xec] ss:$16 sps:$4 sm:$0xff]   ;;  %v1642_v30 = vld [vmem:[%s1998_s9 + $0xe0] ss:$16 sps:$4 sm:$0xff]   ;;  %v1643_v31 = vld [vmem:[%s1998_s9 + $0xe8] ss:$16 sps:$4 sm:$0xff]  }
  0x3f   : > { %1084 = vmatprep.subr.bf16.mxu0 %v1614_v12  ;;  %1166 = vmatprep.subr.bf16.mxu1 %v1616_v13  ;;  %v1644_v32 = vld [vmem:[%s1998_s9 + $0x104] ss:$16 sps:$4 sm:$0xff]   ;;  %v1646_v33 = vld [vmem:[%s1998_s9 + $0x10c] ss:$16 sps:$4 sm:$0xff]   ;;  %v1648_v34 = vld [vmem:[%s1998_s9 + $0x100] ss:$16 sps:$4 sm:$0xff]  }
  0x40   : > { %v1649_v35 = vld [vmem:[%s1998_s9 + $0x108] ss:$16 sps:$4 sm:$0xff]   ;;  %v1650_v36 = vld [vmem:[%s1998_s9 + $0x124] ss:$16 sps:$4 sm:$0xff]   ;;  %v1652_v37 = vld [vmem:[%s1998_s9 + $0x12c] ss:$16 sps:$4 sm:$0xff]  }
  0x41   : > { %v1654_v38 = vld [vmem:[%s1998_s9 + $0x120] ss:$16 sps:$4 sm:$0xff]   ;;  %v1655_v39 = vld [vmem:[%s1998_s9 + $0x128] ss:$16 sps:$4 sm:$0xff]   ;;  %v1656_v40 = vld [vmem:[%s1998_s9 + $0x144] ss:$16 sps:$4 sm:$0xff]  }
  0x42   : > { %1085 = vmatpush1.bf16.msra.mxu0 %v1618_v14  ;;  %1167 = vmatpush1.bf16.msra.mxu1 %v1619_v15  ;;  %v1658_v41 = vld [vmem:[%s1998_s9 + $0x14c] ss:$16 sps:$4 sm:$0xff]   ;;  %v1660_v42 = vld [vmem:[%s1998_s9 + $0x140] ss:$16 sps:$4 sm:$0xff]   ;;  %v1661_v43 = vld [vmem:[%s1998_s9 + $0x148] ss:$16 sps:$4 sm:$0xff]  }
  0x43   : > { %1086 = vmatprep.subr.bf16.mxu0 %v1620_v16  ;;  %1168 = vmatprep.subr.bf16.mxu1 %v1622_v17  ;;  %v1662_v44 = vld [vmem:[%s1998_s9 + $0x164] ss:$16 sps:$4 sm:$0xff]   ;;  %v1664_v45 = vld [vmem:[%s1998_s9 + $0x16c] ss:$16 sps:$4 sm:$0xff]   ;;  %v1666_v47 = vld [vmem:[%s1998_s9 + $0x160] ss:$16 sps:$4 sm:$0xff]  }
  0x44   : > { %v254_v46 = vld [vmem:[%s2183_s0] sm:$0xff]  ;;  %v1667_v49 = vld [vmem:[%s1998_s9 + $0x168] ss:$16 sps:$4 sm:$0xff]   ;;  %v1670_v51 = vld [vmem:[%s1998_s9 + $0x18c] ss:$16 sps:$4 sm:$0xff]   ;;  %v2073_v11 = vshrl.u32 %v267_v7, 7 }
  0x45   : > { %v255_v48 = vsub.f32 0.0, %v254_v46  ;;  %v1668_v50 = vld [vmem:[%s1998_s9 + $0x184] ss:$16 sps:$4 sm:$0xff]   ;;  %v1672_v53 = vld [vmem:[%s1998_s9 + $0x180] ss:$16 sps:$4 sm:$0xff]   ;;  %p240_p7 = scmp.lt.s32.totalorder %s1391_s5, 11 }
  0x46   : > { %1087 = vmatpush1.bf16.msra.mxu0 %v1624_v18  ;;  %1169 = vmatpush1.bf16.msra.mxu1 %v1625_v19  ;;  %v1673_v54 = vld [vmem:[%s1998_s9 + $0x188] ss:$16 sps:$4 sm:$0xff]   ;;  %v1674_v55 = vld [vmem:[%s1998_s9 + $0x1a4] ss:$16 sps:$4 sm:$0xff]   ;;  %v1676_v56 = vld [vmem:[%s1998_s9 + $0x1ac] ss:$16 sps:$4 sm:$0xff]  }
  0x47   : > { %1088 = vmatprep.subr.bf16.mxu0 %v1626_v20  ;;  %1170 = vmatprep.subr.bf16.mxu1 %v1628_v21  ;;  %v256_v52 = vmul.f32 1.442695, %v255_v48  ;;  %v1678_v57 = vld [vmem:[%s1998_s9 + $0x1a0] ss:$16 sps:$4 sm:$0xff]   ;;  %v1679_v58 = vld [vmem:[%s1998_s9 + $0x1a8] ss:$16 sps:$4 sm:$0xff]  }
  0x48   : > { %v1680_v59 = vld [vmem:[%s1998_s9 + $0x1c4] ss:$16 sps:$4 sm:$0xff]   ;;  %v1682_v60 = vld [vmem:[%s1998_s9 + $0x1cc] ss:$16 sps:$4 sm:$0xff]   ;;  %v1684_v61 = vld [vmem:[%s1998_s9 + $0x1c0] ss:$16 sps:$4 sm:$0xff]  }
  0x49   : > { %1788 = vpow2.f32 %v256_v52  ;;  %v1685_v62 = vld [vmem:[%s1998_s9 + $0x1c8] ss:$16 sps:$4 sm:$0xff]   ;;  %v1686_v0 = vld [vmem:[%s1998_s9 + $0x1e4] ss:$16 sps:$4 sm:$0xff]   ;;  %v1688_v1 = vld [vmem:[%s1998_s9 + $0x1ec] ss:$16 sps:$4 sm:$0xff]  }
  0x4a   : > { %1089 = vmatpush1.bf16.msra.mxu0 %v1630_v22  ;;  %1171 = vmatpush1.bf16.msra.mxu1 %v1631_v23  ;;  %v1690_v3 = vld [vmem:[%s1998_s9 + $0x1e0] ss:$16 sps:$4 sm:$0xff]   ;;  %v1691_v4 = vld [vmem:[%s1998_s9 + $0x1e8] ss:$16 sps:$4 sm:$0xff]   ;;  %v1878_v5 = vmov 1983009808  }
  0x4b   : > { %1090 = vmatprep.subr.bf16.mxu0 %v1632_v24  ;;  %1172 = vmatprep.subr.bf16.mxu1 %v1634_v25  ;;  %v265_v6 = vunpack.c.l.s4 %v1878_v5  ;;  %v1694_v8 = vld [vmem:[%s1998_s9 + $0x204] ss:$16 sps:$4 sm:$0xff]   ;;  %v1697_v9 = vld [vmem:[%s1998_s9 + $0x20c] ss:$16 sps:$4 sm:$0xff]   ;;  %v1692_v19 = vld [vmem:[%s1998_s9 + $0x200] ss:$16 sps:$4 sm:$0xff]  }
  0x4c   : > { %v1695_v22 = vld [vmem:[%s1998_s9 + $0x208] ss:$16 sps:$4 sm:$0xff]   ;;  %v1700_v23 = vld [vmem:[%s1998_s9 + $0x224] ss:$16 sps:$4 sm:$0xff]   ;;  %v1703_v25 = vld [vmem:[%s1998_s9 + $0x22c] ss:$16 sps:$4 sm:$0xff]  }
  0x4d   : > { %v266_v10 = vunpack.c.0.s8 %v265_v6  ;;  %v1731_v48 = vld [vmem:[%s1998_s9 + $0x2c8] ss:$16 sps:$4 sm:$0xff]   ;;  %v1766_v5 = vld [vmem:[%s1998_s9 + $0x384] ss:$16 sps:$4 sm:$0xff]   ;;  %v1769_v6 = vld [vmem:[%s1998_s9 + $0x38c] ss:$16 sps:$4 sm:$0xff]  }
  0x4e   : > { %1091 = vmatpush1.bf16.msra.mxu0 %v1636_v26  ;;  %1173 = vmatpush1.bf16.msra.mxu1 %v1637_v27  ;;  %v1698_v27 = vld [vmem:[%s1998_s9 + $0x220] ss:$16 sps:$4 sm:$0xff]   ;;  %v1737_v52 = vld [vmem:[%s1998_s9 + $0x2e8] ss:$16 sps:$4 sm:$0xff]   ;;  %s2199_s5 = smov (!%p240_p7, %s1391_s5), 11 }
  0x4f   : > { %1092 = vmatprep.subr.bf16.mxu0 %v1638_v28  ;;  %1174 = vmatprep.subr.bf16.mxu1 %v1640_v29  ;;  %v2076_v12 = vsub.s32 %v266_v10, %v2073_v11  ;;  %v1701_v28 = vld [vmem:[%s1998_s9 + $0x228] ss:$16 sps:$4 sm:$0xff]   ;;  %v1706_v29 = vld [vmem:[%s1998_s9 + $0x244] ss:$16 sps:$4 sm:$0xff]   ;;  %v1764_v7 = vld [vmem:[%s1998_s9 + $0x380] ss:$16 sps:$4 sm:$0xff]   ;;  %s242_s10 = scalar_lea.vmem %s2185_s2, %s2199_s5 }
  0x50   : > { %v1775_v10 = vld [vmem:[%s1998_s9 + $0x3ac] ss:$16 sps:$4 sm:$0xff]   ;;  %s1393_s15 = sshll.u32 %s2199_s5, 1 }
  0x51   : > { %s252_s18 = scalar_lea.vmem %s2186_s3, %s1393_s15 }
  0x52   : > { %1093 = vmatpush1.bf16.msra.mxu0 %v1642_v30  ;;  %1175 = vmatpush1.bf16.msra.mxu1 %v1643_v31  ;;  %v1709_v30 = vld [vmem:[%s1998_s9 + $0x24c] ss:$16 sps:$4 sm:$0xff]   ;;  %v1704_v31 = vld [vmem:[%s1998_s9 + $0x240] ss:$16 sps:$4 sm:$0xff]  }
  0x53   : > { %1094 = vmatprep.subr.bf16.mxu0 %v1644_v32  ;;  %1176 = vmatprep.subr.bf16.mxu1 %v1646_v33  ;;  %v1789_v63 = vpop.eup %1788  ;;  %v1707_v32 = vld [vmem:[%s1998_s9 + $0x248] ss:$16 sps:$4 sm:$0xff]   ;;  %v1712_v33 = vld [vmem:[%s1998_s9 + $0x264] ss:$16 sps:$4 sm:$0xff]  }
  0x54   : > { %v258_v2 = vadd.f32 1.0, %v1789_v63  ;;  %v1752_v63 = vld [vmem:[%s1998_s9 + $0x340] ss:$16 sps:$4 sm:$0xff]  }
  0x56   : > { %1095 = vmatpush1.bf16.msra.mxu0 %v1648_v34  ;;  %1177 = vmatpush1.bf16.msra.mxu1 %v1649_v35  ;;  %1790 = vrcp.f32 %v258_v2  ;;  %v1715_v34 = vld [vmem:[%s1998_s9 + $0x26c] ss:$16 sps:$4 sm:$0xff]   ;;  %v1710_v35 = vld [vmem:[%s1998_s9 + $0x260] ss:$16 sps:$4 sm:$0xff]  }
  0x57   : > { %1096 = vmatprep.subr.bf16.mxu0 %v1650_v36  ;;  %1178 = vmatprep.subr.bf16.mxu1 %v1652_v37  ;;  %v1713_v36 = vld [vmem:[%s1998_s9 + $0x268] ss:$16 sps:$4 sm:$0xff]   ;;  %v1718_v37 = vld [vmem:[%s1998_s9 + $0x284] ss:$16 sps:$4 sm:$0xff]   ;;  %v1763_v2 = vld [vmem:[%s1998_s9 + $0x36c] ss:$16 sps:$4 sm:$0xff]  }
  0x5a   : > { %1097 = vmatpush1.bf16.msra.mxu0 %v1654_v38  ;;  %1179 = vmatpush1.bf16.msra.mxu1 %v1655_v39  ;;  %v1721_v38 = vld [vmem:[%s1998_s9 + $0x28c] ss:$16 sps:$4 sm:$0xff]   ;;  %v1716_v39 = vld [vmem:[%s1998_s9 + $0x280] ss:$16 sps:$4 sm:$0xff]  }
  0x5b   : > { %1098 = vmatprep.subr.bf16.mxu0 %v1656_v40  ;;  %1180 = vmatprep.subr.bf16.mxu1 %v1658_v41  ;;  %v1719_v40 = vld [vmem:[%s1998_s9 + $0x288] ss:$16 sps:$4 sm:$0xff]   ;;  %v1724_v41 = vld [vmem:[%s1998_s9 + $0x2a4] ss:$16 sps:$4 sm:$0xff]  }
  0x5e   : > { %1099 = vmatpush1.bf16.msra.mxu0 %v1660_v42  ;;  %1181 = vmatpush1.bf16.msra.mxu1 %v1661_v43  ;;  %v1727_v42 = vld [vmem:[%s1998_s9 + $0x2ac] ss:$16 sps:$4 sm:$0xff]   ;;  %v1722_v43 = vld [vmem:[%s1998_s9 + $0x2a0] ss:$16 sps:$4 sm:$0xff]  }
  0x5f   : > { %1100 = vmatprep.subr.bf16.mxu0 %v1662_v44  ;;  %1182 = vmatprep.subr.bf16.mxu1 %v1664_v45  ;;  %v1725_v44 = vld [vmem:[%s1998_s9 + $0x2a8] ss:$16 sps:$4 sm:$0xff]   ;;  %v1730_v45 = vld [vmem:[%s1998_s9 + $0x2c4] ss:$16 sps:$4 sm:$0xff]  }
  0x60   : > { %v1791_v13 = vpop.eup %1790 }
  0x61   : > { %v261_v14 = vmul.f32 %v1791_v13, %v254_v46  ;;  %v1733_v46 = vld [vmem:[%s1998_s9 + $0x2cc] ss:$16 sps:$4 sm:$0xff]   ;;  %v1770_v13 = vld [vmem:[%s1998_s9 + $0x3a0] ss:$16 sps:$4 sm:$0xff]  }
  0x62   : > { %1101 = vmatpush1.bf16.msra.mxu0 %v1666_v47  ;;  %1183 = vmatpush1.bf16.msra.mxu1 %v1667_v49  ;;  %v1728_v47 = vld [vmem:[%s1998_s9 + $0x2c0] ss:$16 sps:$4 sm:$0xff]   ;;  %v1736_v49 = vld [vmem:[%s1998_s9 + $0x2e4] ss:$16 sps:$4 sm:$0xff]  }
  0x63   : > { %1102 = vmatprep.subr.bf16.mxu0 %v1668_v50  ;;  %1184 = vmatprep.subr.bf16.mxu1 %v1670_v51  ;;  %v263_v15 = vcombine.high %v261_v14, %v261_v14  ;;  %v270_v16 = vrot.slane %v261_v14, %v2076_v12  ;;  %v1739_v50 = vld [vmem:[%s1998_s9 + $0x2ec] ss:$16 sps:$4 sm:$0xff]   ;;  %v1734_v51 = vld [vmem:[%s1998_s9 + $0x2e0] ss:$16 sps:$4 sm:$0xff]   ;;  %v1773_v14 = vld [vmem:[%s1998_s9 + $0x3a8] ss:$16 sps:$4 sm:$0xff]  }
  0x65   : > { %v278_v17 = vcombine.high %v270_v16, %v270_v16  ;;  %v2080_v18 = vrot.slane %v263_v15, %v2076_v12  ;;  %v284_v20 = vpack.c.bf16 %v270_v16, %v270_v16  ;;  %v1778_v15 = vld [vmem:[%s1998_s9 + $0x3c4] ss:$16 sps:$4 sm:$0xff]   ;;  %v1781_v16 = vld [vmem:[%s1998_s9 + $0x3cc] ss:$16 sps:$4 sm:$0xff]  }
  0x66   : > { %1103 = vmatpush1.bf16.msra.mxu0 %v1672_v53  ;;  %1185 = vmatpush1.bf16.msra.mxu1 %v1673_v54  ;;  %v1742_v53 = vld [vmem:[%s1998_s9 + $0x304] ss:$16 sps:$4 sm:$0xff]   ;;  %v1745_v54 = vld [vmem:[%s1998_s9 + $0x30c] ss:$16 sps:$4 sm:$0xff]  }
  0x67   : > { %1104 = vmatprep.subr.bf16.mxu0 %v1674_v55  ;;  %1186 = vmatprep.subr.bf16.mxu1 %v1676_v56  ;;  %v285_v21 = vpack.c.bf16 %v278_v17, %v278_v17  ;;  %v279_v24 = vcombine.high %v2080_v18, %v2080_v18  ;;  %v1740_v55 = vld [vmem:[%s1998_s9 + $0x300] ss:$16 sps:$4 sm:$0xff]   ;;  %v1743_v56 = vld [vmem:[%s1998_s9 + $0x308] ss:$16 sps:$4 sm:$0xff]  }
  0x68   : > { %v1776_v17 = vld [vmem:[%s1998_s9 + $0x3c0] ss:$16 sps:$4 sm:$0xff]  }
  0x69   : > { %1110 = vmatprep.mubr.bf16.mxu0 %v285_v21  ;;  %1192 = vmatprep.mubr.bf16.mxu1 %v285_v21  ;;  %v287_v26 = vpack.c.bf16 %v279_v24, %v279_v24  ;;  %v1787_v21 = vld [vmem:[%s1998_s9 + $0x3ec] ss:$16 sps:$4 sm:$0xff]   ;;  %v286_v24 = vpack.c.bf16 %v2080_v18, %v2080_v18  ;;  %v424_v18 = vsub.s32 1, %v2073_v11 }
  0x6a   : > { %1105 = vmatpush1.bf16.msra.mxu0 %v1678_v57  ;;  %1187 = vmatpush1.bf16.msra.mxu1 %v1679_v58  ;;  %v1748_v57 = vld [vmem:[%s1998_s9 + $0x324] ss:$16 sps:$4 sm:$0xff]   ;;  %v1751_v58 = vld [vmem:[%s1998_s9 + $0x32c] ss:$16 sps:$4 sm:$0xff]  }
  0x6b   : > { %1106 = vmatprep.subr.bf16.mxu0 %v1680_v59  ;;  %1188 = vmatprep.subr.bf16.mxu1 %v1682_v60  ;;  %v1746_v59 = vld [vmem:[%s1998_s9 + $0x320] ss:$16 sps:$4 sm:$0xff]   ;;  %v1749_v60 = vld [vmem:[%s1998_s9 + $0x328] ss:$16 sps:$4 sm:$0xff]  }
  0x6e   : > { %1107 = vmatpush1.bf16.msra.mxu0 %v1684_v61  ;;  %1189 = vmatpush1.bf16.msra.mxu1 %v1685_v62  ;;  %v1754_v61 = vld [vmem:[%s1998_s9 + $0x344] ss:$16 sps:$4 sm:$0xff]   ;;  %v1757_v62 = vld [vmem:[%s1998_s9 + $0x34c] ss:$16 sps:$4 sm:$0xff]  }
  0x6f   : > { %1108 = vmatprep.subr.bf16.mxu0 %v1686_v0  ;;  %1190 = vmatprep.subr.bf16.mxu1 %v1688_v1  ;;  %v1755_v0 = vld [vmem:[%s1998_s9 + $0x348] ss:$16 sps:$4 sm:$0xff]   ;;  %v1760_v1 = vld [vmem:[%s1998_s9 + $0x364] ss:$16 sps:$4 sm:$0xff]  }
  0x72   : > { %1109 = vmatpush1.bf16.msra.mxu0 %v1690_v3  ;;  %1191 = vmatpush1.bf16.msra.mxu1 %v1691_v4  ;;  %v1758_v3 = vld [vmem:[%s1998_s9 + $0x360] ss:$16 sps:$4 sm:$0xff]   ;;  %v1761_v4 = vld [vmem:[%s1998_s9 + $0x368] ss:$16 sps:$4 sm:$0xff]  }
  0x73   : > { %1119 = vmatprep.subr.bf16.mxu0 %v1694_v8  ;;  %1201 = vmatprep.subr.bf16.mxu1 %v1697_v9  ;;  %v1767_v8 = vld [vmem:[%s1998_s9 + $0x388] ss:$16 sps:$4 sm:$0xff]   ;;  %v1772_v9 = vld [vmem:[%s1998_s9 + $0x3a4] ss:$16 sps:$4 sm:$0xff]  }
  0x75   : > { %1111 = vmatmul.mubr.bf16.vlgmr.msra.gmra.mrb[0].mxu0 %v284_v20  ;;  %1193 = vmatmul.mubr.bf16.vlgmr.msra.gmra.mrb[0].mxu1 %v284_v20  ;;  %v1784_v20 = vld [vmem:[%s1998_s9 + $0x3e4] ss:$16 sps:$4 sm:$0xff]  }
  0x76   : > { %1120 = vmatpush1.bf16.msra.mxu0 %v1692_v19  ;;  %1202 = vmatpush1.bf16.msra.mxu1 %v1695_v22  ;;  %v1779_v19 = vld [vmem:[%s1998_s9 + $0x3c8] ss:$16 sps:$4 sm:$0xff]   ;;  %v1782_v22 = vld [vmem:[%s1998_s9 + $0x3e0] ss:$16 sps:$4 sm:$0xff]  }
  0x77   : > { %1121 = vmatprep.subr.bf16.mxu0 %v1700_v23  ;;  %1203 = vmatprep.subr.bf16.mxu1 %v1703_v25  ;;  %v1785_v23 = vld [vmem:[%s1998_s9 + $0x3e8] ss:$16 sps:$4 sm:$0xff]   ;;  %v420_v25 = vsub.s32 0, %v2073_v11 }
  0x78   : > { %1151 = vmatprep.mubr.bf16.mxu0 %v287_v26  ;;  %1233 = vmatprep.mubr.bf16.mxu1 %v287_v26  ;;  %v428_v26 = vsub.s32 2, %v2073_v11 }
  0x7a   : > { %1122 = vmatpush1.bf16.msra.mxu0 %v1698_v27  ;;  %1204 = vmatpush1.bf16.msra.mxu1 %v1701_v28  ;;  %v416_v27 = vld [vmem:[%s242_s10] sm:$0xf]  ;;  %v432_v28 = vsub.s32 3, %v2073_v11 }
  0x7b   : > { %1123 = vmatprep.subr.bf16.mxu0 %v1706_v29  ;;  %1205 = vmatprep.subr.bf16.mxu1 %v1709_v30  ;;  %v421_v29 = vrot.slane %v416_v27, %v420_v25  ;;  %v429_v30 = vrot.slane %v416_v27, %v428_v26 }
  0x7e   : > { %1124 = vmatpush1.bf16.msra.mxu0 %v1704_v31  ;;  %1206 = vmatpush1.bf16.msra.mxu1 %v1707_v32  ;;  %v425_v31 = vrot.slane %v416_v27, %v424_v18  ;;  %v433_v32 = vrot.slane %v416_v27, %v432_v28 }
  0x7f   : > { %1125 = vmatprep.subr.bf16.mxu0 %v1712_v33  ;;  %1207 = vmatprep.subr.bf16.mxu1 %v1715_v34 }
  0x82   : > { %1126 = vmatpush1.bf16.msra.mxu0 %v1710_v35  ;;  %1208 = vmatpush1.bf16.msra.mxu1 %v1713_v36 }
  0x83   : > { %1127 = vmatprep.subr.bf16.mxu0 %v1718_v37  ;;  %1209 = vmatprep.subr.bf16.mxu1 %v1721_v38 }
  0x86   : > { %1128 = vmatpush1.bf16.msra.mxu0 %v1716_v39  ;;  %1210 = vmatpush1.bf16.msra.mxu1 %v1719_v40 }
  0x87   : > { %1129 = vmatprep.subr.bf16.mxu0 %v1724_v41  ;;  %1211 = vmatprep.subr.bf16.mxu1 %v1727_v42 }
  0x8a   : > { %1130 = vmatpush1.bf16.msra.mxu0 %v1722_v43  ;;  %1212 = vmatpush1.bf16.msra.mxu1 %v1725_v44 }
  0x8b   : > { %1131 = vmatprep.subr.bf16.mxu0 %v1730_v45  ;;  %1213 = vmatprep.subr.bf16.mxu1 %v1733_v46 }
  0x8e   : > { %1132 = vmatpush1.bf16.msra.mxu0 %v1728_v47  ;;  %1214 = vmatpush1.bf16.msra.mxu1 %v1731_v48 }
  0x8f   : > { %1133 = vmatprep.subr.bf16.mxu0 %v1736_v49  ;;  %1215 = vmatprep.subr.bf16.mxu1 %v1739_v50 }
  0x92   : > { %1134 = vmatpush1.bf16.msra.mxu0 %v1734_v51  ;;  %1216 = vmatpush1.bf16.msra.mxu1 %v1737_v52 }
  0x93   : > { %1135 = vmatprep.subr.bf16.mxu0 %v1742_v53  ;;  %1217 = vmatprep.subr.bf16.mxu1 %v1745_v54 }
  0x96   : > { %1136 = vmatpush1.bf16.msra.mxu0 %v1740_v55  ;;  %1218 = vmatpush1.bf16.msra.mxu1 %v1743_v56 }
  0x97   : > { %1137 = vmatprep.subr.bf16.mxu0 %v1748_v57  ;;  %1219 = vmatprep.subr.bf16.mxu1 %v1751_v58 }
  0x9a   : > { %1138 = vmatpush1.bf16.msra.mxu0 %v1746_v59  ;;  %1220 = vmatpush1.bf16.msra.mxu1 %v1749_v60 }
  0x9b   : > { %1139 = vmatprep.subr.bf16.mxu0 %v1754_v61  ;;  %1221 = vmatprep.subr.bf16.mxu1 %v1757_v62 }
  0x9e   : > { %1140 = vmatpush1.bf16.msra.mxu0 %v1752_v63  ;;  %1222 = vmatpush1.bf16.msra.mxu1 %v1755_v0 }
  0x9f   : > { %1141 = vmatprep.subr.bf16.mxu0 %v1760_v1  ;;  %1223 = vmatprep.subr.bf16.mxu1 %v1763_v2 }
  0xa2   : > { %1142 = vmatpush1.bf16.msra.mxu0 %v1758_v3  ;;  %1224 = vmatpush1.bf16.msra.mxu1 %v1761_v4 }
  0xa3   : > { %1143 = vmatprep.subr.bf16.mxu0 %v1766_v5  ;;  %1225 = vmatprep.subr.bf16.mxu1 %v1769_v6 }
  0xa6   : > { %1144 = vmatpush1.bf16.msra.mxu0 %v1764_v7  ;;  %1226 = vmatpush1.bf16.msra.mxu1 %v1767_v8 }
  0xa7   : > { %1145 = vmatprep.subr.bf16.mxu0 %v1772_v9  ;;  %1227 = vmatprep.subr.bf16.mxu1 %v1775_v10 }
  0xaa   : > { %1146 = vmatpush1.bf16.msra.mxu0 %v1770_v13  ;;  %1228 = vmatpush1.bf16.msra.mxu1 %v1773_v14 }
  0xab   : > { %1147 = vmatprep.subr.bf16.mxu0 %v1778_v15  ;;  %1229 = vmatprep.subr.bf16.mxu1 %v1781_v16 }
  0xae   : > { %1148 = vmatpush1.bf16.msra.mxu0 %v1776_v17  ;;  %1230 = vmatpush1.bf16.msra.mxu1 %v1779_v19 }
  0xaf   : > { %1149 = vmatprep.subr.bf16.mxu0 %v1784_v20  ;;  %1231 = vmatprep.subr.bf16.mxu1 %v1787_v21 }
  0xb2   : > { %1150 = vmatpush1.bf16.msra.mxu0 %v1782_v22  ;;  %1232 = vmatpush1.bf16.msra.mxu1 %v1785_v23 }
  0xb5   : > { %1152 = vmatmul.mubr.bf16.vlgmr.msra.gmra.mrb[0].mxu0 %v286_v24  ;;  %1234 = vmatmul.mubr.bf16.vlgmr.msra.gmra.mrb[0].mxu1 %v286_v24 }
 0x188   : > { %v1153_v33 = vpop.f32.mrb[0].mxu0  ;;  %v1235_v34 = vpop.f32.mrb[0].mxu1 }
 0x189   : > { %v1525_v35 = vadd.f32 %v1153_v33, %v421_v29  ;;  %v1527_v36 = vadd.f32 %v1235_v34, %v429_v30  ;;  %v1155_v37 = vpop.f32.mrb[1].mxu0  ;;  %v1237_v38 = vpop.f32.mrb[1].mxu1 }
 0x18a   : > { %v1526_v39 = vadd.f32 %v1155_v37, %v425_v31  ;;  %v1528_v40 = vadd.f32 %v1237_v38, %v433_v32  ;;  %v1157_v41 = vpop.f32.mrb[2].mxu0  ;;  %v1239_v42 = vpop.f32.mrb[2].mxu1 }
 0x18b   : > { %v1158_v43 = vpop.f32.mrb[3].mxu0  ;;  %v1240_v44 = vpop.f32.mrb[3].mxu1 }
 0x18c   : > { %v1246_v45 = vcombine.low %v1525_v35, %v1526_v39  ;;  %v1247_v11 = vcombine.low %v1527_v36, %v1528_v40 }
 0x18e   : > { %v1254_v46 = vrot.slane %v1246_v45, %v2076_v12  ;;  %v1261_v47 = vrot.slane %v1247_v11, %v2076_v12 }
 0x190   : > { %v1262_v48 = vcombine.low %v1254_v46, %v1261_v47 }
 0x192   : > { %1264 = vst [vmem:[%s252_s18] sm:$0xff] %v1262_v48 }
 0x193 PF: > { %s16_s17 = sadd.s32 1, %s1872_s17   ;;  %s2191_s12 = smov %s1856_s13 }
 0x194   : > { %p13_p9 = scmp.ge.s32.totalorder %s16_s17, 5   ;;  %s2192_s13 = smov %s1860_s14 }
 0x195   : > { %s2193_s14 = smov %s1948_s24  ;;  %s2194_s15 = smov %s1868_s16 }
 0x196   : > { %s2195_s16 = smov %s2197_s19  ;;  %15 = sbr.rel (!%p13_p9) target bundleno = 4 (0x4), region = 78 }
 0x19d   :  { %1295 = vsyncpa [#allocation3], 1 }
 0x19e   :  { %1297 = vsyncpa [#allocation3 + $0x1], 1 }

// kernel: motion_transformer_forward.7
= control target key start
LH: loop header
LB: loop body
LE: loop exit
PB: predicated region body
PF: predicated region fallthrough
CT: control target
= control target key end

     0   :  { %8 = vsyncpa [#allocation3], 0  ;;  %s1520_s0 = inlined_call_operand.vmem [shape: f32[2,512], index: 0, kind: input, shape index: {}]   ;;  %s1521_s1 = inlined_call_operand.hbm [shape: bf16[512,512], index: 1, kind: input, shape index: {}]   ;;  %s1522_s2 = inlined_call_operand.hbm [shape: f32[1,512], index: 2, kind: input, shape index: {}]   ;;  %s1523_s3 = inlined_call_operand.vmem [shape: f32[2,512], index: 3, kind: output, shape index: {}]  }
   0x1   :  { %9 = vsyncpa [#allocation5], 0  ;;  %s1446_s12 = smov [#allocation2]   ;;  %s1398_s16 = scalar_lea.hbm %s1521_s1, 16384 }
   0x2   :  { %s17_s13 = sshll.u32 %s1446_s12, 4  ;;  %p1399_p0 = scmp.ne.s32.totalorder %s1521_s1, %s1398_s16  ;;  %s18_s13 = int_to_ptr.vmem [resolvable:$true] %s17_s13 }
   0x3   :  { %p1402_p1 = scmp.lt.u32.totalorder %s1398_s16, %s1521_s1 }
   0x5   :  { %p1404_p2 = pnand %p1402_p1, %p1399_p0 }
   0x7   :  { %1407 = shalt.err (!%p1404_p2)
}
   0x8   :  { %s1408_s21 = scalar_lea.vmem %s18_s13, 16384  ;;  %p1413_p4 = scmp.lt.s32.totalorder %s18_s13, %s18_s13 }
   0x9   :  { %p1409_p3 = scmp.ne.s32.totalorder %s18_s13, %s1408_s21  ;;  %p1414_p5 = scmp.lt.s32.totalorder %s1408_s21, %s1408_s21 }
   0xb   :  { %p1415_p6 = por %p1414_p5, %p1413_p4 }
   0xd   :  { %p1416_p7 = pnand %p1415_p6, %p1409_p3 }
   0xf   :  { %1419 = shalt.err (!%p1416_p7)
}
  0x10   :  { %s1447_s22 = smov 256   ;;  %s1448_s23 = smov 16  }
  0x11   :  { %23 = dma.hbm_to_vmem [thread:$0]  %s1521_s1, 16384, %s18_s13, [#allocation3], %s1447_s22, %s1447_s22, %s1448_s23  }
  0x12   :  { %s1449_s26 = smov [#allocation4]   ;;  %s1420_s30 = scalar_lea.hbm %s1522_s2, 64 }
  0x13   :  { %s30_s27 = sshll.u32 %s1449_s26, 4  ;;  %p1421_p8 = scmp.ne.s32.totalorder %s1522_s2, %s1420_s30  ;;  %s31_s27 = int_to_ptr.vmem [resolvable:$true] %s30_s27 }
  0x14   :  { %p1424_p9 = scmp.lt.u32.totalorder %s1420_s30, %s1522_s2 }
  0x16   :  { %p1426_p10 = pnand %p1424_p9, %p1421_p8 }
  0x18   :  { %1429 = shalt.err (!%p1426_p10)
}
  0x19   :  { %s1430_s8 = scalar_lea.vmem %s31_s27, 64  ;;  %p1435_p12 = scmp.lt.s32.totalorder %s31_s27, %s31_s27 }
  0x1a   :  { %p1431_p11 = scmp.ne.s32.totalorder %s31_s27, %s1430_s8  ;;  %p1436_p13 = scmp.lt.s32.totalorder %s1430_s8, %s1430_s8 }
  0x1c   :  { %p1437_p0 = por %p1436_p13, %p1435_p12 }
  0x1e   :  { %p1438_p1 = pnand %p1437_p0, %p1431_p11 }
  0x20   :  { %1441 = shalt.err (!%p1438_p1)
}
  0x21   :  { %33 = dma.hbm_to_vmem [thread:$0]  %s1522_s2, 64, %s31_s27, [#allocation5]  }
  0x22   :  { %1442 = dma.done.wait [#allocation3], 16384  }
  0x23   :  { %1443 = vsyncadd [#allocation3], 4294950912 }
  0x24   :  { %1444 = dma.done.wait [#allocation5], 64  }
  0x25   :  { %1445 = vsyncadd [#allocation5], 4294967232  ;;  %v1202_v0 = vld [vmem:[#allocation2 + $0x4] ss:$16 sps:$4 sm:$0xff]   ;;  %v1204_v1 = vld [vmem:[#allocation2 + $0xc] ss:$16 sps:$4 sm:$0xff]  }
  0x26   :  { %864 = vmatprep.subr.bf16.mxu0 %v1202_v0  ;;  %v1206_v2 = vld [vmem:[#allocation2] ss:$16 sps:$4 sm:$0xff]   ;;  %v1207_v3 = vld [vmem:[#allocation2 + $0x8] ss:$16 sps:$4 sm:$0xff]   ;;  %946 = vmatprep.subr.bf16.mxu1 %v1204_v1  ;;  %v1208_v4 = vld [vmem:[#allocation2 + $0x24] ss:$16 sps:$4 sm:$0xff]  }
  0x27   :  { %865 = vmatpush1.bf16.msra.mxu0 %v1206_v2  ;;  %947 = vmatpush1.bf16.msra.mxu1 %v1207_v3  ;;  %v1210_v5 = vld [vmem:[#allocation2 + $0x2c] ss:$16 sps:$4 sm:$0xff]   ;;  %v1212_v6 = vld [vmem:[#allocation2 + $0x20] ss:$16 sps:$4 sm:$0xff]   ;;  %v1213_v7 = vld [vmem:[#allocation2 + $0x28] ss:$16 sps:$4 sm:$0xff]  }
  0x28   :  { %866 = vmatprep.subr.bf16.mxu0 %v1208_v4  ;;  %948 = vmatprep.subr.bf16.mxu1 %v1210_v5  ;;  %v1214_v8 = vld [vmem:[#allocation2 + $0x44] ss:$16 sps:$4 sm:$0xff]   ;;  %v1216_v9 = vld [vmem:[#allocation2 + $0x4c] ss:$16 sps:$4 sm:$0xff]   ;;  %v1218_v10 = vld [vmem:[#allocation2 + $0x40] ss:$16 sps:$4 sm:$0xff]  }
  0x29   :  { %v1219_v11 = vld [vmem:[#allocation2 + $0x48] ss:$16 sps:$4 sm:$0xff]   ;;  %v1220_v12 = vld [vmem:[#allocation2 + $0x64] ss:$16 sps:$4 sm:$0xff]   ;;  %v1222_v13 = vld [vmem:[#allocation2 + $0x6c] ss:$16 sps:$4 sm:$0xff]  }
  0x2a   :  { %v1224_v14 = vld [vmem:[#allocation2 + $0x60] ss:$16 sps:$4 sm:$0xff]   ;;  %v1225_v15 = vld [vmem:[#allocation2 + $0x68] ss:$16 sps:$4 sm:$0xff]   ;;  %v1226_v16 = vld [vmem:[#allocation2 + $0x84] ss:$16 sps:$4 sm:$0xff]  }
  0x2b   :  { %867 = vmatpush1.bf16.msra.mxu0 %v1212_v6  ;;  %949 = vmatpush1.bf16.msra.mxu1 %v1213_v7  ;;  %v1228_v17 = vld [vmem:[#allocation2 + $0x8c] ss:$16 sps:$4 sm:$0xff]   ;;  %v1230_v18 = vld [vmem:[#allocation2 + $0x80] ss:$16 sps:$4 sm:$0xff]   ;;  %v1231_v19 = vld [vmem:[#allocation2 + $0x88] ss:$16 sps:$4 sm:$0xff]   ;;  %v53_v7 = vlaneseq }
  0x2c   :  { %868 = vmatprep.subr.bf16.mxu0 %v1214_v8  ;;  %950 = vmatprep.subr.bf16.mxu1 %v1216_v9  ;;  %v1232_v20 = vld [vmem:[#allocation2 + $0xa4] ss:$16 sps:$4 sm:$0xff]   ;;  %v1234_v21 = vld [vmem:[#allocation2 + $0xac] ss:$16 sps:$4 sm:$0xff]   ;;  %v1236_v22 = vld [vmem:[#allocation2 + $0xa0] ss:$16 sps:$4 sm:$0xff]  }
  0x2d   :  { %v1237_v23 = vld [vmem:[#allocation2 + $0xa8] ss:$16 sps:$4 sm:$0xff]   ;;  %v1238_v24 = vld [vmem:[#allocation2 + $0xc4] ss:$16 sps:$4 sm:$0xff]   ;;  %v1240_v25 = vld [vmem:[#allocation2 + $0xcc] ss:$16 sps:$4 sm:$0xff]  }
  0x2e   :  { %v1242_v26 = vld [vmem:[#allocation2 + $0xc0] ss:$16 sps:$4 sm:$0xff]   ;;  %v1243_v27 = vld [vmem:[#allocation2 + $0xc8] ss:$16 sps:$4 sm:$0xff]   ;;  %v1244_v28 = vld [vmem:[#allocation2 + $0xe4] ss:$16 sps:$4 sm:$0xff]  }
  0x2f   :  { %869 = vmatpush1.bf16.msra.mxu0 %v1218_v10  ;;  %951 = vmatpush1.bf16.msra.mxu1 %v1219_v11  ;;  %v1246_v29 = vld [vmem:[#allocation2 + $0xec] ss:$16 sps:$4 sm:$0xff]   ;;  %v1248_v30 = vld [vmem:[#allocation2 + $0xe0] ss:$16 sps:$4 sm:$0xff]   ;;  %v1249_v31 = vld [vmem:[#allocation2 + $0xe8] ss:$16 sps:$4 sm:$0xff]  }
  0x30   :  { %870 = vmatprep.subr.bf16.mxu0 %v1220_v12  ;;  %952 = vmatprep.subr.bf16.mxu1 %v1222_v13  ;;  %v1250_v32 = vld [vmem:[#allocation2 + $0x104] ss:$16 sps:$4 sm:$0xff]   ;;  %v1252_v33 = vld [vmem:[#allocation2 + $0x10c] ss:$16 sps:$4 sm:$0xff]   ;;  %v1254_v34 = vld [vmem:[#allocation2 + $0x100] ss:$16 sps:$4 sm:$0xff]  }
  0x31   :  { %v1255_v35 = vld [vmem:[#allocation2 + $0x108] ss:$16 sps:$4 sm:$0xff]   ;;  %v1256_v36 = vld [vmem:[#allocation2 + $0x124] ss:$16 sps:$4 sm:$0xff]   ;;  %v1258_v37 = vld [vmem:[#allocation2 + $0x12c] ss:$16 sps:$4 sm:$0xff]  }
  0x32   :  { %v1260_v38 = vld [vmem:[#allocation2 + $0x120] ss:$16 sps:$4 sm:$0xff]   ;;  %v1261_v39 = vld [vmem:[#allocation2 + $0x128] ss:$16 sps:$4 sm:$0xff]   ;;  %v1262_v40 = vld [vmem:[#allocation2 + $0x144] ss:$16 sps:$4 sm:$0xff]  }
  0x33   :  { %871 = vmatpush1.bf16.msra.mxu0 %v1224_v14  ;;  %953 = vmatpush1.bf16.msra.mxu1 %v1225_v15  ;;  %v1264_v41 = vld [vmem:[#allocation2 + $0x14c] ss:$16 sps:$4 sm:$0xff]   ;;  %v1266_v42 = vld [vmem:[#allocation2 + $0x140] ss:$16 sps:$4 sm:$0xff]   ;;  %v1267_v43 = vld [vmem:[#allocation2 + $0x148] ss:$16 sps:$4 sm:$0xff]  }
  0x34   :  { %872 = vmatprep.subr.bf16.mxu0 %v1226_v16  ;;  %954 = vmatprep.subr.bf16.mxu1 %v1228_v17  ;;  %v1268_v44 = vld [vmem:[#allocation2 + $0x164] ss:$16 sps:$4 sm:$0xff]   ;;  %v1270_v45 = vld [vmem:[#allocation2 + $0x16c] ss:$16 sps:$4 sm:$0xff]   ;;  %v1272_v47 = vld [vmem:[#allocation2 + $0x160] ss:$16 sps:$4 sm:$0xff]  }
  0x35   :  { %v40_v46 = vld [vmem:[%s1520_s0] sm:$0xff]  ;;  %v1273_v49 = vld [vmem:[#allocation2 + $0x168] ss:$16 sps:$4 sm:$0xff]   ;;  %v1276_v51 = vld [vmem:[#allocation2 + $0x18c] ss:$16 sps:$4 sm:$0xff]   ;;  %v1498_v11 = vshrl.u32 %v53_v7, 7 }
  0x36   :  { %v41_v48 = vsub.f32 0.0, %v40_v46  ;;  %v1274_v50 = vld [vmem:[#allocation2 + $0x184] ss:$16 sps:$4 sm:$0xff]   ;;  %v1278_v53 = vld [vmem:[#allocation2 + $0x180] ss:$16 sps:$4 sm:$0xff]  }
  0x37   :  { %873 = vmatpush1.bf16.msra.mxu0 %v1230_v18  ;;  %955 = vmatpush1.bf16.msra.mxu1 %v1231_v19  ;;  %v1279_v54 = vld [vmem:[#allocation2 + $0x188] ss:$16 sps:$4 sm:$0xff]   ;;  %v1280_v55 = vld [vmem:[#allocation2 + $0x1a4] ss:$16 sps:$4 sm:$0xff]   ;;  %v1282_v56 = vld [vmem:[#allocation2 + $0x1ac] ss:$16 sps:$4 sm:$0xff]  }
  0x38   :  { %874 = vmatprep.subr.bf16.mxu0 %v1232_v20  ;;  %956 = vmatprep.subr.bf16.mxu1 %v1234_v21  ;;  %v42_v52 = vmul.f32 1.442695, %v41_v48  ;;  %v1284_v57 = vld [vmem:[#allocation2 + $0x1a0] ss:$16 sps:$4 sm:$0xff]   ;;  %v1285_v58 = vld [vmem:[#allocation2 + $0x1a8] ss:$16 sps:$4 sm:$0xff]  }
  0x39   :  { %v1286_v59 = vld [vmem:[#allocation2 + $0x1c4] ss:$16 sps:$4 sm:$0xff]   ;;  %v1288_v60 = vld [vmem:[#allocation2 + $0x1cc] ss:$16 sps:$4 sm:$0xff]   ;;  %v1290_v61 = vld [vmem:[#allocation2 + $0x1c0] ss:$16 sps:$4 sm:$0xff]  }
  0x3a   :  { %1394 = vpow2.f32 %v42_v52  ;;  %v1291_v62 = vld [vmem:[#allocation2 + $0x1c8] ss:$16 sps:$4 sm:$0xff]   ;;  %v1292_v0 = vld [vmem:[#allocation2 + $0x1e4] ss:$16 sps:$4 sm:$0xff]   ;;  %v1294_v1 = vld [vmem:[#allocation2 + $0x1ec] ss:$16 sps:$4 sm:$0xff]  }
  0x3b   :  { %875 = vmatpush1.bf16.msra.mxu0 %v1236_v22  ;;  %957 = vmatpush1.bf16.msra.mxu1 %v1237_v23  ;;  %v1296_v3 = vld [vmem:[#allocation2 + $0x1e0] ss:$16 sps:$4 sm:$0xff]   ;;  %v1297_v4 = vld [vmem:[#allocation2 + $0x1e8] ss:$16 sps:$4 sm:$0xff]   ;;  %v1450_v5 = vmov 1983009808  }
  0x3c   :  { %876 = vmatprep.subr.bf16.mxu0 %v1238_v24  ;;  %958 = vmatprep.subr.bf16.mxu1 %v1240_v25  ;;  %v51_v6 = vunpack.c.l.s4 %v1450_v5  ;;  %v1300_v8 = vld [vmem:[#allocation2 + $0x204] ss:$16 sps:$4 sm:$0xff]   ;;  %v1303_v9 = vld [vmem:[#allocation2 + $0x20c] ss:$16 sps:$4 sm:$0xff]   ;;  %v1298_v19 = vld [vmem:[#allocation2 + $0x200] ss:$16 sps:$4 sm:$0xff]  }
  0x3d   :  { %v1301_v22 = vld [vmem:[#allocation2 + $0x208] ss:$16 sps:$4 sm:$0xff]   ;;  %v1306_v23 = vld [vmem:[#allocation2 + $0x224] ss:$16 sps:$4 sm:$0xff]   ;;  %v1309_v25 = vld [vmem:[#allocation2 + $0x22c] ss:$16 sps:$4 sm:$0xff]  }
  0x3e   :  { %v52_v10 = vunpack.c.0.s8 %v51_v6  ;;  %v1337_v48 = vld [vmem:[#allocation2 + $0x2c8] ss:$16 sps:$4 sm:$0xff]   ;;  %v1372_v5 = vld [vmem:[#allocation2 + $0x384] ss:$16 sps:$4 sm:$0xff]   ;;  %v1375_v6 = vld [vmem:[#allocation2 + $0x38c] ss:$16 sps:$4 sm:$0xff]  }
  0x3f   :  { %877 = vmatpush1.bf16.msra.mxu0 %v1242_v26  ;;  %959 = vmatpush1.bf16.msra.mxu1 %v1243_v27  ;;  %v1304_v27 = vld [vmem:[#allocation2 + $0x220] ss:$16 sps:$4 sm:$0xff]   ;;  %v1343_v52 = vld [vmem:[#allocation2 + $0x2e8] ss:$16 sps:$4 sm:$0xff]  }
  0x40   :  { %878 = vmatprep.subr.bf16.mxu0 %v1244_v28  ;;  %960 = vmatprep.subr.bf16.mxu1 %v1246_v29  ;;  %v1501_v12 = vsub.s32 %v52_v10, %v1498_v11  ;;  %v1307_v28 = vld [vmem:[#allocation2 + $0x228] ss:$16 sps:$4 sm:$0xff]   ;;  %v1312_v29 = vld [vmem:[#allocation2 + $0x244] ss:$16 sps:$4 sm:$0xff]   ;;  %v1370_v7 = vld [vmem:[#allocation2 + $0x380] ss:$16 sps:$4 sm:$0xff]  }
  0x41   :  { %v1381_v10 = vld [vmem:[#allocation2 + $0x3ac] ss:$16 sps:$4 sm:$0xff]  }
  0x43   :  { %879 = vmatpush1.bf16.msra.mxu0 %v1248_v30  ;;  %961 = vmatpush1.bf16.msra.mxu1 %v1249_v31  ;;  %v1315_v30 = vld [vmem:[#allocation2 + $0x24c] ss:$16 sps:$4 sm:$0xff]   ;;  %v1310_v31 = vld [vmem:[#allocation2 + $0x240] ss:$16 sps:$4 sm:$0xff]  }
  0x44   :  { %880 = vmatprep.subr.bf16.mxu0 %v1250_v32  ;;  %962 = vmatprep.subr.bf16.mxu1 %v1252_v33  ;;  %v1395_v63 = vpop.eup %1394  ;;  %v1313_v32 = vld [vmem:[#allocation2 + $0x248] ss:$16 sps:$4 sm:$0xff]   ;;  %v1318_v33 = vld [vmem:[#allocation2 + $0x264] ss:$16 sps:$4 sm:$0xff]  }
  0x45   :  { %v44_v2 = vadd.f32 1.0, %v1395_v63  ;;  %v1358_v63 = vld [vmem:[#allocation2 + $0x340] ss:$16 sps:$4 sm:$0xff]  }
  0x47   :  { %881 = vmatpush1.bf16.msra.mxu0 %v1254_v34  ;;  %963 = vmatpush1.bf16.msra.mxu1 %v1255_v35  ;;  %1396 = vrcp.f32 %v44_v2  ;;  %v1321_v34 = vld [vmem:[#allocation2 + $0x26c] ss:$16 sps:$4 sm:$0xff]   ;;  %v1316_v35 = vld [vmem:[#allocation2 + $0x260] ss:$16 sps:$4 sm:$0xff]  }
  0x48   :  { %882 = vmatprep.subr.bf16.mxu0 %v1256_v36  ;;  %964 = vmatprep.subr.bf16.mxu1 %v1258_v37  ;;  %v1319_v36 = vld [vmem:[#allocation2 + $0x268] ss:$16 sps:$4 sm:$0xff]   ;;  %v1324_v37 = vld [vmem:[#allocation2 + $0x284] ss:$16 sps:$4 sm:$0xff]   ;;  %v1369_v2 = vld [vmem:[#allocation2 + $0x36c] ss:$16 sps:$4 sm:$0xff]  }
  0x4b   :  { %883 = vmatpush1.bf16.msra.mxu0 %v1260_v38  ;;  %965 = vmatpush1.bf16.msra.mxu1 %v1261_v39  ;;  %v1327_v38 = vld [vmem:[#allocation2 + $0x28c] ss:$16 sps:$4 sm:$0xff]   ;;  %v1322_v39 = vld [vmem:[#allocation2 + $0x280] ss:$16 sps:$4 sm:$0xff]  }
  0x4c   :  { %884 = vmatprep.subr.bf16.mxu0 %v1262_v40  ;;  %966 = vmatprep.subr.bf16.mxu1 %v1264_v41  ;;  %v1325_v40 = vld [vmem:[#allocation2 + $0x288] ss:$16 sps:$4 sm:$0xff]   ;;  %v1330_v41 = vld [vmem:[#allocation2 + $0x2a4] ss:$16 sps:$4 sm:$0xff]  }
  0x4f   :  { %885 = vmatpush1.bf16.msra.mxu0 %v1266_v42  ;;  %967 = vmatpush1.bf16.msra.mxu1 %v1267_v43  ;;  %v1333_v42 = vld [vmem:[#allocation2 + $0x2ac] ss:$16 sps:$4 sm:$0xff]   ;;  %v1328_v43 = vld [vmem:[#allocation2 + $0x2a0] ss:$16 sps:$4 sm:$0xff]  }
  0x50   :  { %886 = vmatprep.subr.bf16.mxu0 %v1268_v44  ;;  %968 = vmatprep.subr.bf16.mxu1 %v1270_v45  ;;  %v1331_v44 = vld [vmem:[#allocation2 + $0x2a8] ss:$16 sps:$4 sm:$0xff]   ;;  %v1336_v45 = vld [vmem:[#allocation2 + $0x2c4] ss:$16 sps:$4 sm:$0xff]  }
  0x51   :  { %v1397_v13 = vpop.eup %1396 }
  0x52   :  { %v47_v14 = vmul.f32 %v1397_v13, %v40_v46  ;;  %v1339_v46 = vld [vmem:[#allocation2 + $0x2cc] ss:$16 sps:$4 sm:$0xff]   ;;  %v1376_v13 = vld [vmem:[#allocation2 + $0x3a0] ss:$16 sps:$4 sm:$0xff]  }
  0x53   :  { %887 = vmatpush1.bf16.msra.mxu0 %v1272_v47  ;;  %969 = vmatpush1.bf16.msra.mxu1 %v1273_v49  ;;  %v1334_v47 = vld [vmem:[#allocation2 + $0x2c0] ss:$16 sps:$4 sm:$0xff]   ;;  %v1342_v49 = vld [vmem:[#allocation2 + $0x2e4] ss:$16 sps:$4 sm:$0xff]  }
  0x54   :  { %888 = vmatprep.subr.bf16.mxu0 %v1274_v50  ;;  %970 = vmatprep.subr.bf16.mxu1 %v1276_v51  ;;  %v49_v15 = vcombine.high %v47_v14, %v47_v14  ;;  %v56_v16 = vrot.slane %v47_v14, %v1501_v12  ;;  %v1345_v50 = vld [vmem:[#allocation2 + $0x2ec] ss:$16 sps:$4 sm:$0xff]   ;;  %v1340_v51 = vld [vmem:[#allocation2 + $0x2e0] ss:$16 sps:$4 sm:$0xff]   ;;  %v1379_v14 = vld [vmem:[#allocation2 + $0x3a8] ss:$16 sps:$4 sm:$0xff]  }
  0x56   :  { %v64_v17 = vcombine.high %v56_v16, %v56_v16  ;;  %v1505_v18 = vrot.slane %v49_v15, %v1501_v12  ;;  %v70_v20 = vpack.c.bf16 %v56_v16, %v56_v16  ;;  %v1384_v15 = vld [vmem:[#allocation2 + $0x3c4] ss:$16 sps:$4 sm:$0xff]   ;;  %v1387_v16 = vld [vmem:[#allocation2 + $0x3cc] ss:$16 sps:$4 sm:$0xff]  }
  0x57   :  { %889 = vmatpush1.bf16.msra.mxu0 %v1278_v53  ;;  %971 = vmatpush1.bf16.msra.mxu1 %v1279_v54  ;;  %v1348_v53 = vld [vmem:[#allocation2 + $0x304] ss:$16 sps:$4 sm:$0xff]   ;;  %v1351_v54 = vld [vmem:[#allocation2 + $0x30c] ss:$16 sps:$4 sm:$0xff]  }
  0x58   :  { %890 = vmatprep.subr.bf16.mxu0 %v1280_v55  ;;  %972 = vmatprep.subr.bf16.mxu1 %v1282_v56  ;;  %v71_v21 = vpack.c.bf16 %v64_v17, %v64_v17  ;;  %v65_v24 = vcombine.high %v1505_v18, %v1505_v18  ;;  %v1346_v55 = vld [vmem:[#allocation2 + $0x300] ss:$16 sps:$4 sm:$0xff]   ;;  %v1349_v56 = vld [vmem:[#allocation2 + $0x308] ss:$16 sps:$4 sm:$0xff]  }
  0x59   :  { %v1382_v17 = vld [vmem:[#allocation2 + $0x3c0] ss:$16 sps:$4 sm:$0xff]  }
  0x5a   :  { %896 = vmatprep.mubr.bf16.mxu0 %v71_v21  ;;  %978 = vmatprep.mubr.bf16.mxu1 %v71_v21  ;;  %v73_v26 = vpack.c.bf16 %v65_v24, %v65_v24  ;;  %v1393_v21 = vld [vmem:[#allocation2 + $0x3ec] ss:$16 sps:$4 sm:$0xff]   ;;  %v72_v24 = vpack.c.bf16 %v1505_v18, %v1505_v18 }
  0x5b   :  { %891 = vmatpush1.bf16.msra.mxu0 %v1284_v57  ;;  %973 = vmatpush1.bf16.msra.mxu1 %v1285_v58  ;;  %v1354_v57 = vld [vmem:[#allocation2 + $0x324] ss:$16 sps:$4 sm:$0xff]   ;;  %v1357_v58 = vld [vmem:[#allocation2 + $0x32c] ss:$16 sps:$4 sm:$0xff]  }
  0x5c   :  { %892 = vmatprep.subr.bf16.mxu0 %v1286_v59  ;;  %974 = vmatprep.subr.bf16.mxu1 %v1288_v60  ;;  %v1352_v59 = vld [vmem:[#allocation2 + $0x320] ss:$16 sps:$4 sm:$0xff]   ;;  %v1355_v60 = vld [vmem:[#allocation2 + $0x328] ss:$16 sps:$4 sm:$0xff]  }
  0x5f   :  { %893 = vmatpush1.bf16.msra.mxu0 %v1290_v61  ;;  %975 = vmatpush1.bf16.msra.mxu1 %v1291_v62  ;;  %v1360_v61 = vld [vmem:[#allocation2 + $0x344] ss:$16 sps:$4 sm:$0xff]   ;;  %v1363_v62 = vld [vmem:[#allocation2 + $0x34c] ss:$16 sps:$4 sm:$0xff]  }
  0x60   :  { %894 = vmatprep.subr.bf16.mxu0 %v1292_v0  ;;  %976 = vmatprep.subr.bf16.mxu1 %v1294_v1  ;;  %v1361_v0 = vld [vmem:[#allocation2 + $0x348] ss:$16 sps:$4 sm:$0xff]   ;;  %v1366_v1 = vld [vmem:[#allocation2 + $0x364] ss:$16 sps:$4 sm:$0xff]  }
  0x63   :  { %895 = vmatpush1.bf16.msra.mxu0 %v1296_v3  ;;  %977 = vmatpush1.bf16.msra.mxu1 %v1297_v4  ;;  %v1364_v3 = vld [vmem:[#allocation2 + $0x360] ss:$16 sps:$4 sm:$0xff]   ;;  %v1367_v4 = vld [vmem:[#allocation2 + $0x368] ss:$16 sps:$4 sm:$0xff]  }
  0x64   :  { %905 = vmatprep.subr.bf16.mxu0 %v1300_v8  ;;  %987 = vmatprep.subr.bf16.mxu1 %v1303_v9  ;;  %v1373_v8 = vld [vmem:[#allocation2 + $0x388] ss:$16 sps:$4 sm:$0xff]   ;;  %v1378_v9 = vld [vmem:[#allocation2 + $0x3a4] ss:$16 sps:$4 sm:$0xff]  }
  0x66   :  { %897 = vmatmul.mubr.bf16.vlgmr.msra.gmra.mrb[0].mxu0 %v70_v20  ;;  %979 = vmatmul.mubr.bf16.vlgmr.msra.gmra.mrb[0].mxu1 %v70_v20  ;;  %v1390_v20 = vld [vmem:[#allocation2 + $0x3e4] ss:$16 sps:$4 sm:$0xff]  }
  0x67   :  { %906 = vmatpush1.bf16.msra.mxu0 %v1298_v19  ;;  %988 = vmatpush1.bf16.msra.mxu1 %v1301_v22  ;;  %v1385_v19 = vld [vmem:[#allocation2 + $0x3c8] ss:$16 sps:$4 sm:$0xff]   ;;  %v1388_v22 = vld [vmem:[#allocation2 + $0x3e0] ss:$16 sps:$4 sm:$0xff]  }
  0x68   :  { %907 = vmatprep.subr.bf16.mxu0 %v1306_v23  ;;  %989 = vmatprep.subr.bf16.mxu1 %v1309_v25  ;;  %v1391_v23 = vld [vmem:[#allocation2 + $0x3e8] ss:$16 sps:$4 sm:$0xff]   ;;  %v206_v25 = vsub.s32 0, %v1498_v11 }
  0x69   :  { %937 = vmatprep.mubr.bf16.mxu0 %v73_v26  ;;  %1019 = vmatprep.mubr.bf16.mxu1 %v73_v26  ;;  %v214_v26 = vsub.s32 2, %v1498_v11 }
  0x6b   :  { %908 = vmatpush1.bf16.msra.mxu0 %v1304_v27  ;;  %990 = vmatpush1.bf16.msra.mxu1 %v1307_v28  ;;  %v202_v27 = vld [vmem:[#allocation4] sm:$0xf]  ;;  %v210_v28 = vsub.s32 1, %v1498_v11 }
  0x6c   :  { %909 = vmatprep.subr.bf16.mxu0 %v1312_v29  ;;  %991 = vmatprep.subr.bf16.mxu1 %v1315_v30  ;;  %v218_v29 = vsub.s32 3, %v1498_v11  ;;  %v207_v30 = vrot.slane %v202_v27, %v206_v25 }
  0x6f   :  { %910 = vmatpush1.bf16.msra.mxu0 %v1310_v31  ;;  %992 = vmatpush1.bf16.msra.mxu1 %v1313_v32  ;;  %v215_v31 = vrot.slane %v202_v27, %v214_v26  ;;  %v211_v32 = vrot.slane %v202_v27, %v210_v28 }
  0x70   :  { %911 = vmatprep.subr.bf16.mxu0 %v1318_v33  ;;  %993 = vmatprep.subr.bf16.mxu1 %v1321_v34  ;;  %v219_v33 = vrot.slane %v202_v27, %v218_v29 }
  0x73   :  { %912 = vmatpush1.bf16.msra.mxu0 %v1316_v35  ;;  %994 = vmatpush1.bf16.msra.mxu1 %v1319_v36 }
  0x74   :  { %913 = vmatprep.subr.bf16.mxu0 %v1324_v37  ;;  %995 = vmatprep.subr.bf16.mxu1 %v1327_v38 }
  0x77   :  { %914 = vmatpush1.bf16.msra.mxu0 %v1322_v39  ;;  %996 = vmatpush1.bf16.msra.mxu1 %v1325_v40 }
  0x78   :  { %915 = vmatprep.subr.bf16.mxu0 %v1330_v41  ;;  %997 = vmatprep.subr.bf16.mxu1 %v1333_v42 }
  0x7b   :  { %916 = vmatpush1.bf16.msra.mxu0 %v1328_v43  ;;  %998 = vmatpush1.bf16.msra.mxu1 %v1331_v44 }
  0x7c   :  { %917 = vmatprep.subr.bf16.mxu0 %v1336_v45  ;;  %999 = vmatprep.subr.bf16.mxu1 %v1339_v46 }
  0x7f   :  { %918 = vmatpush1.bf16.msra.mxu0 %v1334_v47  ;;  %1000 = vmatpush1.bf16.msra.mxu1 %v1337_v48 }
  0x80   :  { %919 = vmatprep.subr.bf16.mxu0 %v1342_v49  ;;  %1001 = vmatprep.subr.bf16.mxu1 %v1345_v50 }
  0x83   :  { %920 = vmatpush1.bf16.msra.mxu0 %v1340_v51  ;;  %1002 = vmatpush1.bf16.msra.mxu1 %v1343_v52 }
  0x84   :  { %921 = vmatprep.subr.bf16.mxu0 %v1348_v53  ;;  %1003 = vmatprep.subr.bf16.mxu1 %v1351_v54 }
  0x87   :  { %922 = vmatpush1.bf16.msra.mxu0 %v1346_v55  ;;  %1004 = vmatpush1.bf16.msra.mxu1 %v1349_v56 }
  0x88   :  { %923 = vmatprep.subr.bf16.mxu0 %v1354_v57  ;;  %1005 = vmatprep.subr.bf16.mxu1 %v1357_v58 }
  0x8b   :  { %924 = vmatpush1.bf16.msra.mxu0 %v1352_v59  ;;  %1006 = vmatpush1.bf16.msra.mxu1 %v1355_v60 }
  0x8c   :  { %925 = vmatprep.subr.bf16.mxu0 %v1360_v61  ;;  %1007 = vmatprep.subr.bf16.mxu1 %v1363_v62 }
  0x8f   :  { %926 = vmatpush1.bf16.msra.mxu0 %v1358_v63  ;;  %1008 = vmatpush1.bf16.msra.mxu1 %v1361_v0 }
  0x90   :  { %927 = vmatprep.subr.bf16.mxu0 %v1366_v1  ;;  %1009 = vmatprep.subr.bf16.mxu1 %v1369_v2 }
  0x93   :  { %928 = vmatpush1.bf16.msra.mxu0 %v1364_v3  ;;  %1010 = vmatpush1.bf16.msra.mxu1 %v1367_v4 }
  0x94   :  { %929 = vmatprep.subr.bf16.mxu0 %v1372_v5  ;;  %1011 = vmatprep.subr.bf16.mxu1 %v1375_v6 }
  0x97   :  { %930 = vmatpush1.bf16.msra.mxu0 %v1370_v7  ;;  %1012 = vmatpush1.bf16.msra.mxu1 %v1373_v8 }
  0x98   :  { %931 = vmatprep.subr.bf16.mxu0 %v1378_v9  ;;  %1013 = vmatprep.subr.bf16.mxu1 %v1381_v10 }
  0x9b   :  { %932 = vmatpush1.bf16.msra.mxu0 %v1376_v13  ;;  %1014 = vmatpush1.bf16.msra.mxu1 %v1379_v14 }
  0x9c   :  { %933 = vmatprep.subr.bf16.mxu0 %v1384_v15  ;;  %1015 = vmatprep.subr.bf16.mxu1 %v1387_v16 }
  0x9f   :  { %934 = vmatpush1.bf16.msra.mxu0 %v1382_v17  ;;  %1016 = vmatpush1.bf16.msra.mxu1 %v1385_v19 }
  0xa0   :  { %935 = vmatprep.subr.bf16.mxu0 %v1390_v20  ;;  %1017 = vmatprep.subr.bf16.mxu1 %v1393_v21 }
  0xa3   :  { %936 = vmatpush1.bf16.msra.mxu0 %v1388_v22  ;;  %1018 = vmatpush1.bf16.msra.mxu1 %v1391_v23 }
  0xa6   :  { %938 = vmatmul.mubr.bf16.vlgmr.msra.gmra.mrb[0].mxu0 %v72_v24  ;;  %1020 = vmatmul.mubr.bf16.vlgmr.msra.gmra.mrb[0].mxu1 %v72_v24 }
 0x179   :  { %v939_v34 = vpop.f32.mrb[0].mxu0  ;;  %v1021_v35 = vpop.f32.mrb[0].mxu1 }
 0x17a   :  { %v1185_v18 = vadd.f32 %v939_v34, %v207_v30  ;;  %v1187_v36 = vadd.f32 %v1021_v35, %v215_v31  ;;  %v941_v37 = vpop.f32.mrb[1].mxu0  ;;  %v1023_v38 = vpop.f32.mrb[1].mxu1 }
 0x17b   :  { %v1186_v39 = vadd.f32 %v941_v37, %v211_v32  ;;  %v1188_v40 = vadd.f32 %v1023_v38, %v219_v33  ;;  %v943_v41 = vpop.f32.mrb[2].mxu0  ;;  %v1025_v42 = vpop.f32.mrb[2].mxu1 }
 0x17c   :  { %v944_v43 = vpop.f32.mrb[3].mxu0  ;;  %v1026_v44 = vpop.f32.mrb[3].mxu1 }
 0x17d   :  { %v1032_v45 = vcombine.low %v1185_v18, %v1186_v39  ;;  %v1033_v46 = vcombine.low %v1187_v36, %v1188_v40 }
 0x17f   :  { %v1040_v11 = vrot.slane %v1032_v45, %v1501_v12  ;;  %v1047_v47 = vrot.slane %v1033_v46, %v1501_v12 }
 0x181   :  { %v1048_v48 = vcombine.low %v1040_v11, %v1047_v47 }
 0x183   :  { %1050 = vst [vmem:[%s1523_s3] sm:$0xff] %v1048_v48 }
 0x184   :  { %1055 = vsyncpa [#allocation3], 1 }
 0x185   :  { %1056 = vsyncpa [#allocation5], 1 }

// kernel: motion_transformer_forward.11
= control target key start
LH: loop header
LB: loop body
LE: loop exit
PB: predicated region body
PF: predicated region fallthrough
CT: control target
= control target key end

     0   :  { %vm141_vm0 = vcmask 97280   ;;  %s268_s1 = inlined_call_operand.vmem [shape: bf16[128,12], index: 1, kind: input, shape index: {}]   ;;  %s269_s0 = inlined_call_operand.vmem [shape: f32[32,128], index: 0, kind: input, shape index: {}]   ;;  %s270_s2 = inlined_call_operand.vmem [shape: f32[1,12], index: 2, kind: input, shape index: {}]   ;;  %s271_s3 = inlined_call_operand.vmem [shape: f32[32,12], index: 3, kind: output, shape index: {}]  }
   0x1   :  { %v189_v0 = vld [vmem:[%s268_s1] sm:$0xff]   ;;  %v190_v1 = vld [vmem:[%s268_s1 + $0x8] sm:$0xff]   ;;  %v191_v2 = vld [vmem:[%s268_s1 + $0x10] sm:$0xff]  }
   0x2   :  { %169 = vmatprep.subr.bf16.mxu0 %v189_v0  ;;  %v192_v3 = vld [vmem:[%s268_s1 + $0x18] sm:$0xff]   ;;  %v15_v4 = vld [vmem:[%s269_s0] sm:$0xff]  ;;  %v16_v5 = vld [vmem:[%s269_s0 + $0x8] sm:$0xff] }
   0x3   :  { %170 = vmatpush3.bf16.msra.mxu0 %v189_v0  ;;  %v19_v6 = vpack.c.bf16 %v16_v5, %v15_v4  ;;  %v193_v7 = vld [vmem:[%s268_s1 + $0x20] sm:$0xff]   ;;  %v194_v8 = vld [vmem:[%s268_s1 + $0x28] sm:$0xff]   ;;  %v195_v9 = vld [vmem:[%s268_s1 + $0x30] sm:$0xff]  }
   0x4   :  { %171 = vmatprep.subr.bf16.mxu0 %v190_v1  ;;  %v196_v10 = vld [vmem:[%s268_s1 + $0x38] sm:$0xff]   ;;  %v17_v11 = vld [vmem:[%s269_s0 + $0x10] sm:$0xff]  ;;  %v150_v14 = vld [vmem:[%s270_s2] ss:$0 sm:$0xff] }
   0x5   :  { %185 = vmatprep.mubr.bf16.mxu0 %v19_v6  ;;  %v18_v12 = vld [vmem:[%s269_s0 + $0x18] sm:$0xff] }
   0x6   :  { %v20_v13 = vpack.c.bf16 %v18_v12, %v17_v11 }
   0x7   :  { %172 = vmatpush3.bf16.msra.mxu0 %v190_v1 }
   0x8   :  { %173 = vmatprep.subr.bf16.mxu0 %v191_v2 }
   0xb   :  { %174 = vmatpush3.bf16.msra.mxu0 %v191_v2 }
   0xc   :  { %175 = vmatprep.subr.bf16.mxu0 %v192_v3 }
   0xf   :  { %176 = vmatpush3.bf16.msra.mxu0 %v192_v3 }
  0x10   :  { %177 = vmatprep.subr.bf16.mxu0 %v193_v7 }
  0x13   :  { %178 = vmatpush3.bf16.msra.mxu0 %v193_v7 }
  0x14   :  { %179 = vmatprep.subr.bf16.mxu0 %v194_v8 }
  0x17   :  { %180 = vmatpush3.bf16.msra.mxu0 %v194_v8 }
  0x18   :  { %181 = vmatprep.subr.bf16.mxu0 %v195_v9 }
  0x1b   :  { %182 = vmatpush3.bf16.msra.mxu0 %v195_v9 }
  0x1c   :  { %183 = vmatprep.subr.bf16.mxu0 %v196_v10 }
  0x1f   :  { %184 = vmatpush3.bf16.msra.mxu0 %v196_v10 }
  0x22   :  { %186 = vmatmul.mubr.bf16.vlgmr.msra.gmra.mrb[0].mxu0 %v20_v13 }
  0xf5   :  { %v187_v15 = vpop.f32.mrb[0].mxu0 }
  0xf6   :  { %v135_v16 = vadd.f32 %v187_v15, %v150_v14  ;;  %v126_v17 = vpop.f32.mrb[1].mxu0 }
  0xf7   :  { %v127_v18 = vadd.f32 %v150_v14, %v126_v17  ;;  %v188_v19 = vpop.f32.mrb[2].mxu0 }
  0xf8   :  { %144 = vst.msk [vmem:[%s271_s3 + $0x10] sm:$0xff] %vm141_vm0, %v135_v16  ;;  %v138_v20 = vadd.f32 %v188_v19, %v150_v14  ;;  %v129_v21 = vpop.f32.mrb[3].mxu0 }
  0xf9   :  { %142 = vst.msk [vmem:[%s271_s3] sm:$0xff] %vm141_vm0, %v127_v18  ;;  %v130_v22 = vadd.f32 %v150_v14, %v129_v21 }
  0xfa   :  { %145 = vst.msk [vmem:[%s271_s3 + $0x18] sm:$0xff] %vm141_vm0, %v138_v20 }
  0xfb   :  { %143 = vst.msk [vmem:[%s271_s3 + $0x8] sm:$0xff] %vm141_vm0, %v130_v22 }

// kernel: motion_transformer_forward.10
= control target key start
LH: loop header
LB: loop body
LE: loop exit
PB: predicated region body
PF: predicated region fallthrough
CT: control target
= control target key end

     0   :  { %s4828_s25 = smov 0   ;;  %s4830_s26 = smov 0   ;;  %s5474_s0 = inlined_call_operand.vmem [shape: f32[2,16,128], index: 0, kind: input, shape index: {}, may-alias: {0,21}]   ;;  %s5475_s1 = inlined_call_operand.vmem [shape: f32[2,8,128], index: 1, kind: input, shape index: {}]   ;;  %s5476_s2 = inlined_call_operand.vmem [shape: f32[4,6,128], index: 2, kind: input, shape index: {}]   ;;  %s5477_s3 = inlined_call_operand.vmem [shape: f32[2,10,128], index: 3, kind: input, shape index: {}]   ;;  %s5478_s4 = inlined_call_operand.vmem [shape: f32[2,2,128], index: 4, kind: input, shape index: {}]   ;;  %s5479_s5 = inlined_call_operand.vmem [shape: bf16[2,128,384], index: 5, kind: input, shape index: {}]   ;;  %s5480_s6 = inlined_call_operand.vmem [shape: f32[2,1,384], index: 6, kind: input, shape index: {}]   ;;  %s5481_s7 = inlined_call_operand.vmem [shape: bf16[2,128,128], index: 7, kind: input, shape index: {}]   ;;  %s5482_s8 = inlined_call_operand.vmem [shape: f32[2,1,128], index: 8, kind: input, shape index: {}]   ;;  %s5483_s9 = inlined_call_operand.vmem [shape: bf16[2,128,128], index: 9, kind: input, shape index: {}]   ;;  %s5484_s10 = inlined_call_operand.vmem [shape: f32[2,1,128], index: 10, kind: input, shape index: {}]   ;;  %s5485_s11 = inlined_call_operand.vmem [shape: bf16[2,128,256], index: 11, kind: input, shape index: {}]   ;;  %s5486_s12 = inlined_call_operand.vmem [shape: f32[2,1,256], index: 12, kind: input, shape index: {}]   ;;  %s5487_s13 = inlined_call_operand.vmem [shape: bf16[2,128,128], index: 13, kind: input, shape index: {}]   ;;  %s5488_s14 = inlined_call_operand.vmem [shape: f32[2,1,128], index: 14, kind: input, shape index: {}]   ;;  %s5489_s15 = inlined_call_operand.vmem [shape: bf16[2,128,256], index: 15, kind: input, shape index: {}]   ;;  %s5490_s16 = inlined_call_operand.vmem [shape: f32[2,1,256], index: 16, kind: input, shape index: {}]   ;;  %s5491_s17 = inlined_call_operand.vmem [shape: bf16[2,256,128], index: 17, kind: input, shape index: {}]   ;;  %s5492_s18 = inlined_call_operand.vmem [shape: f32[2,1,128], index: 18, kind: input, shape index: {}]   ;;  %s5493_s19 = inlined_call_operand.vmem [shape: bf16[2,128,128], index: 19, kind: input, shape index: {}]   ;;  %s5494_s20 = inlined_call_operand.vmem [shape: f32[2,1,128], index: 20, kind: input, shape index: {}]   ;;  %s5495_s21 = inlined_call_operand.vmem [shape: f32[2,16,128], index: 21, kind: output, shape index: {}, may-alias: {0,21}]  }
   0x1   :  { %5507 = sst [smem:[#allocation16_spill]] %s5474_s0  ;;  %s4832_s27 = smov 0  }
   0x2   :  { %5508 = sst [smem:[#allocation17_spill]] %s5475_s1 }
   0x3   :  { %5509 = sst [smem:[#allocation18_spill]] %s5476_s2  ;;  %s4826_s2 = smov 0  }
   0x4   :  { %5510 = sst [smem:[#allocation19_spill]] %s5477_s3  ;;  %s4834_s3 = smov 0  }
   0x5   :  { %5511 = sst [smem:[#allocation20_spill]] %s5478_s4 }
   0x6   :  { %5512 = sst [smem:[#allocation21_spill]] %s5479_s5 }
   0x7   :  { %5513 = sst [smem:[#allocation22_spill]] %s5480_s6 }
   0x8   :  { %5514 = sst [smem:[#allocation23_spill]] %s5481_s7 }
   0x9   :  { %5515 = sst [smem:[#allocation24_spill]] %s5483_s9 }
   0xa   :  { %5516 = sst [smem:[#allocation25_spill]] %s5484_s10 }
   0xb   :  { %5517 = sst [smem:[#allocation26_spill]] %s5485_s11 }
   0xc   :  { %5518 = sst [smem:[#allocation27_spill]] %s5487_s13 }
   0xd   :  { %5519 = sst [smem:[#allocation28_spill]] %s5488_s14 }
   0xe   :  { %5520 = sst [smem:[#allocation29_spill]] %s5489_s15 }
   0xf   :  { %5521 = sst [smem:[#allocation30_spill]] %s5491_s17 }
  0x10   :  { %5522 = sst [smem:[#allocation31_spill]] %s5492_s18 }
  0x11   :  { %5523 = sst [smem:[#allocation32_spill]] %s5493_s19 }
  0x12   :  { %5524 = sst [smem:[#allocation33_spill]] %s5494_s20 }
  0x13   :  { %5525 = sst [smem:[#allocation34_spill]] %s5495_s21 }
  0x14 LB: > { %5526 = sst [smem:[#allocation3_spill]] %s4692_s2  ;;  %s40_s28 = sadd.s32 1, %s4700_s26  ;;  %s4708_s3 = sphi %s4834_s3, %s31_s3   ;;  %s4704_s27 = sphi %s4832_s27, %s5581_s27   ;;  %s4700_s26 = sphi %s4830_s26, %s5580_s26   ;;  %s4696_s25 = sphi %s4828_s25, %s5579_s25   ;;  %s4692_s2 = sphi %s4826_s2, %s5578_s2  }
  0x15   : > { %5527 = sst [smem:[#allocation4_spill]] %s4700_s26  ;;  %s43_s29 = sadd.s32 1, %s4704_s27 }
  0x16   : > { %5528 = sst [smem:[#allocation5_spill]] %s4704_s27  ;;  %p41_p0 = scmp.ge.s32.totalorder %s40_s28, 2 }
  0x17   : > { %5529 = sst [smem:[#allocation6_spill]] %s4708_s3  ;;  %p3911_p1 = scmp.ge.s32.totalorder %s4708_s3, 1 }
  0x18   : > { %p791_p2 = scmp.lt.s32.totalorder %s4708_s3, 5  ;;  %s5583_s28 = smov (%p41_p0, %s40_s28), 0 }
  0x19   : > { %5530 = sst [smem:[#allocation7_spill]] %s5583_s28  ;;  %s5585_s29 = smov (!%p41_p0, %s43_s29), %s4704_s27 }
  0x1a   : > { %p792_p3 = pnand %p3911_p1, %p791_p2  ;;  %p45_p4 = scmp.ge.s32.totalorder %s5585_s29, 2 }
  0x1c   : > { %s5587_s29 = smov (%p45_p4, %s5585_s29), 0  ;;  %795 = sbr.rel (%p792_p3) target bundleno = 5798 (0x16a6), region = 104 }
  0x1d   : > { %5531 = sst [smem:[#allocation8_spill]] %s5587_s29 }
  0x23   : > { %p937_p5 = scmp.lt.s32.totalorder %s4696_s25, 1  ;;  %s3915_s0 = sshll.u32 %s4696_s25, 1 }
  0x24   : > { %s947_s4 = sadd.s32 %s4692_s2, %s3915_s0  ;;  %p954_p7 = scmp.lt.s32.totalorder %s4692_s2, 1 }
  0x25   : > { %s5589_s25 = smov (!%p937_p5, %s4696_s25), 1  ;;  %p948_p6 = scmp.lt.s32.totalorder %s947_s4, 3 }
  0x26   : > { %s4067_s30 = sshll.u32 %s5589_s25, 4  ;;  %s3914_s5 = sshll.u32 %s5589_s25, 3 }
  0x27   : > { %s5532_s1 = sld [smem:[#allocation16_spill]]  ;;  %s5534_s29 = sld [smem:[#allocation17_spill]] }
  0x28   : > { %s5591_s4 = smov (!%p948_p6, %s947_s4), 3  ;;  %s5536_s21 = sld [smem:[#allocation34_spill]] }
  0x29   : > { %s4871_s3 = scalar_select %p954_p7, %s4692_s2, 1 }
  0x2a   : > { %s3916_s25 = sshll.u32 %s5591_s4, 3  ;;  %s5540_s2 = sld [smem:[#allocation19_spill]] }
  0x2b   : > { %s4890_s19 = sshll.u32 %s4871_s3, 1  ;;  %s4373_s27 = smul.u32 3, %s4871_s3 }
  0x2c   : > { %s5544_s7 = sld [smem:[#allocation23_spill]]  ;;  %s5545_s6 = sld [smem:[#allocation22_spill]] }
  0x2d   : > { %s4863_s24 = scalar_lea.vmem %s5532_s1, %s4067_s30  ;;  %s4868_s26 = scalar_lea.vmem %s5534_s29, %s3914_s5 }
  0x2e   : > { %5533 = sst [smem:[#allocation9_spill]] %s4863_s24  ;;  %s4876_s23 = scalar_lea.vmem %s5536_s21, %s4067_s30 }
  0x2f   : > { %5535 = sst [smem:[#allocation10_spill]] %s4868_s26  ;;  %s5538_s29 = sld [smem:[#allocation18_spill]] }
  0x30   : > { %5537 = sst [smem:[#allocation11_spill]] %s4876_s23  ;;  %s4068_s1 = sshll.u32 %s4871_s3, 4 }
  0x31   : > { %s4887_s20 = scalar_lea.vmem %s5540_s2, %s4068_s1  ;;  %s4372_s21 = smul.u32 192, %s4871_s3 }
  0x32   : > { %5541 = sst [smem:[#allocation13_spill]] %s4887_s20  ;;  %s4912_s0 = scalar_lea.vmem %s5545_s6, %s4373_s27 }
  0x33   : > { %s5546_s9 = sld [smem:[#allocation24_spill]]  ;;  %s4071_s2 = sshll.u32 %s4871_s3, 7 }
  0x34   : > { %s5548_s11 = sld [smem:[#allocation26_spill]]  ;;  %s5549_s13 = sld [smem:[#allocation27_spill]] }
  0x35   : > { %s4881_s5 = scalar_lea.vmem %s5538_s29, %s3916_s25  ;;  %s4069_s25 = sshll.u32 %s4871_s3, 6 }
  0x36   : > { %5539 = sst [smem:[#allocation12_spill]] %s4881_s5  ;;  %s5543_s5 = sld [smem:[#allocation21_spill]] }
  0x37   : > { %s4907_s1 = scalar_lea.vmem %s5544_s7, %s4069_s25  ;;  %s5552_s15 = sld [smem:[#allocation29_spill]] }
  0x38   : > { %s1013_s27 = scalar_lea.vmem %s5490_s16, %s4890_s19  ;;  %s5558_s7 = sld [smem:[#allocation3_spill]] }
  0x3a   : > { %s4935_s6 = scalar_lea.vmem %s5548_s11, %s4071_s2  ;;  %s4940_s17 = scalar_lea.vmem %s5549_s13, %s4069_s25 }
  0x3b   : > { %5550 = sst [smem:[#allocation14_spill]] %s4940_s17  ;;  %s5554_s11 = sld [smem:[#allocation30_spill]] }
  0x3c   : > { %s4902_s26 = scalar_lea.vmem %s5543_s5, %s4372_s21  ;;  %s4921_s21 = scalar_lea.vmem %s5546_s9, %s4069_s25 }
  0x3d   : > { %s4949_s9 = scalar_lea.vmem %s5552_s15, %s4071_s2  ;;  %s5555_s13 = sld [smem:[#allocation31_spill]] }
  0x3e   : > { %5553 = sst [smem:[#allocation15_spill]] %s4949_s9  ;;  %s5556_s5 = sld [smem:[#allocation32_spill]] }
  0x3f   : > { %s5557_s15 = sld [smem:[#allocation33_spill]]  ;;  %p3939_p8 = scmp.ne.s32.totalorder %s5558_s7, 0 }
  0x40   : > { %s5559_s24 = sld [smem:[#allocation9_spill]] (!%p3939_p8) }
  0x41   : > { %s4958_s10 = scalar_lea.vmem %s5554_s11, %s4071_s2  ;;  %1039 = sbr.rel (%p3939_p8) target bundleno = 73 (0x49), region = 108 }
  0x42   : > { %s5560_s11 = sld [smem:[#allocation11_spill]] (!%p3939_p8) }
  0x43   : > { %s1021_s17 = scalar_lea.vmem %s5555_s13, %s4871_s3 }
  0x44   : > { %s4967_s14 = scalar_lea.vmem %s5556_s5, %s4069_s25 }
  0x45   : > { %s1029_s9 = scalar_lea.vmem %s5557_s15, %s4871_s3 }
  0x46   : > { %v1040_v0 = vld [vmem:[%s5559_s24] sm:$0xff] (!%p3939_p8)  ;;  %v1041_v1 = vld [vmem:[%s5559_s24 + $0x8] sm:$0xff] (!%p3939_p8) }
  0x48   : > { %1042 = vst [vmem:[%s5560_s11] sm:$0xff] %v1040_v0  ;;  %1043 = vst [vmem:[%s5560_s11 + $0x8] sm:$0xff] %v1041_v1 }
  0x49 PF: > { %s5561_s13 = sld [smem:[#allocation11_spill]]  ;;  %v4420_v4 = vld [vmem:[%s4902_s26 + $0x4] ss:$12 sps:$4 sm:$0xff]   ;;  %v4422_v5 = vld [vmem:[%s4902_s26] ss:$12 sps:$4 sm:$0xff]   ;;  %v4710_v6 = vmov 0.0   ;;  %v1073_v42 = vlaneseq  ;;  %s5565_s4 = scalar_lea.vmem %s5482_s8, %s4871_s3 }
  0x4a   : > { %4176 = vmatprep.subr.bf16.mxu1 %v4710_v6  ;;  %v4423_v7 = vld [vmem:[%s4902_s26 + $0x8] ss:$12 sps:$4 sm:$0xff]   ;;  %1263 = vmatprep.subr.bf16.mxu0 %v4420_v4  ;;  %v4426_v17 = vld [vmem:[%s4902_s26 + $0x18] ss:$12 sps:$4 sm:$0xff]   ;;  %v4427_v18 = vld [vmem:[%s4902_s26 + $0x20] ss:$12 sps:$4 sm:$0xff]   ;;  %s5568_s29 = scalar_lea.vmem %s5486_s12, %s4890_s19 }
  0x4b   : > { %v4424_v8 = vld [vmem:[%s4902_s26 + $0x1c] ss:$12 sps:$4 sm:$0xff]   ;;  %1264 = vmatpush1.bf16.msra.mxu0 %v4422_v5  ;;  %4177 = vmatpush3.bf16.msra.mxu1 %v4423_v7  ;;  %v4428_v19 = vld [vmem:[%s4902_s26 + $0x34] ss:$12 sps:$4 sm:$0xff]   ;;  %v4431_v21 = vld [vmem:[%s4902_s26 + $0x38] ss:$12 sps:$4 sm:$0xff]  }
  0x4c   : > { %1265 = vmatprep.subr.bf16.mxu0 %v4424_v8  ;;  %4178 = vmatprep.subr.bf16.mxu1 %v4710_v6  ;;  %v4430_v20 = vld [vmem:[%s4902_s26 + $0x30] ss:$12 sps:$4 sm:$0xff]   ;;  %v4432_v22 = vld [vmem:[%s4902_s26 + $0x4c] ss:$12 sps:$4 sm:$0xff]   ;;  %v4434_v23 = vld [vmem:[%s4902_s26 + $0x48] ss:$12 sps:$4 sm:$0xff]  }
  0x4d   : > { %v4435_v24 = vld [vmem:[%s4902_s26 + $0x50] ss:$12 sps:$4 sm:$0xff]   ;;  %v4438_v26 = vld [vmem:[%s4902_s26 + $0x60] ss:$12 sps:$4 sm:$0xff]   ;;  %v4439_v27 = vld [vmem:[%s4902_s26 + $0x68] ss:$12 sps:$4 sm:$0xff]  }
  0x4e   : > { %v4436_v25 = vld [vmem:[%s4902_s26 + $0x64] ss:$12 sps:$4 sm:$0xff]   ;;  %v4440_v28 = vld [vmem:[%s4902_s26 + $0x7c] ss:$12 sps:$4 sm:$0xff]   ;;  %v4443_v30 = vld [vmem:[%s4902_s26 + $0x80] ss:$12 sps:$4 sm:$0xff]  }
  0x4f   : > { %v1044_v2 = vld [vmem:[%s5561_s13] sm:$0xff]  ;;  %v1045_v3 = vld [vmem:[%s5561_s13 + $0x8] sm:$0xff]  ;;  %1266 = vmatpush1.bf16.msra.mxu0 %v4426_v17  ;;  %4179 = vmatpush3.bf16.msra.mxu1 %v4427_v18  ;;  %v4711_v32 = vmov 0   ;;  %vm4712_vm0 = vmmov 0   ;;  %v4446_v33 = vld [vmem:[%s4902_s26 + $0x90] ss:$12 sps:$4 sm:$0xff]  }
  0x50   : > { %1050 = vadd.xlane.f32.xlu0 %v1044_v2  ;;  %4180 = vmatprep.subr.bf16.mxu1 %v4710_v6  ;;  %v4442_v29 = vld [vmem:[%s4902_s26 + $0x78] ss:$12 sps:$4 sm:$0xff]   ;;  %v4444_v31 = vld [vmem:[%s4902_s26 + $0x94] ss:$12 sps:$4 sm:$0xff]   ;;  %v4451_v37 = vld [vmem:[%s4902_s26 + $0xb0] ss:$12 sps:$4 sm:$0xff]  }
  0x51   : > { %1267 = vmatprep.subr.bf16.mxu0 %v4428_v19  ;;  %1295 = vmatprep.mubr.bf16.mxu0 %v4711_v32  ;;  %v4447_v34 = vld [vmem:[%s4902_s26 + $0x98] ss:$12 sps:$4 sm:$0xff]   ;;  %v4450_v36 = vld [vmem:[%s4902_s26 + $0xa8] ss:$12 sps:$4 sm:$0xff]   ;;  %s5562_s15 = sld [smem:[#allocation13_spill]]  ;;  %v5025_v45 = vshrl.u32 %v1073_v42, 7 }
  0x52   : > { %4192 = vmatprep.mubr.msk.bf16.mxu1 %vm4712_vm0, %v4710_v6  ;;  %v4448_v35 = vld [vmem:[%s4902_s26 + $0xac] ss:$12 sps:$4 sm:$0xff]   ;;  %v1118_v61 = vld [vmem:[%s4912_s0] sm:$0x7]  ;;  %vm1350_vm1 = vcmask 261120   ;;  %s4713_s25 = smov 96  }
  0x53   : > { %1268 = vmatpush1.bf16.msra.mxu0 %v4430_v20  ;;  %4181 = vmatpush3.bf16.msra.mxu1 %v4431_v21  ;;  %v5028_v46 = vsub.s32 0, %v5025_v45  ;;  %v5037_v51 = vsub.s32 1, %v5025_v45  ;;  %v5047_v60 = vsub.s32 2, %v5025_v45  ;;  %s4714_s26 = smov 64   ;;  %s4715_s0 = smov 32   ;;  %vm1398_vm2 = vcmask 130048  }
  0x54   : > { %1052 = vadd.xlane.f32.xlu0 %v1045_v3  ;;  %4182 = vmatprep.subr.bf16.mxu1 %v4710_v6  ;;  %vm1600_vm3 = vcmask 523520   ;;  %vm1732_vm4 = vcmask 785920   ;;  %vm1864_vm5 = vcmask 1048320   ;;  %s5563_s2 = sld [smem:[#allocation10_spill]]  ;;  %s5564_s20 = sld [smem:[#allocation12_spill]]  ;;  %vm2441_vm6 = vcmask 1043456  }
  0x55   : > { %1269 = vmatprep.subr.bf16.mxu0 %v4432_v22  ;;  %v1123_v62 = vrot.slane %v1118_v61, %v5028_v46  ;;  %v1131_v63 = vrot.slane %v1118_v61, %v5047_v60  ;;  %s5566_s22 = sld [smem:[#allocation20_spill]]  ;;  %s5569_s24 = sld [smem:[#allocation25_spill]]  ;;  %vm2414_vm7 = vcmask 64512  }
  0x57   : > { %1270 = vmatpush1.bf16.msra.mxu0 %v4434_v23  ;;  %4183 = vmatpush3.bf16.msra.mxu1 %v4435_v24  ;;  %v5031_v47 = vld [vmem:[%s5562_s15] sm:$0xff] }
  0x58   : > { %4184 = vmatprep.subr.bf16.mxu1 %v4710_v6  ;;  %1271 = vmatprep.subr.bf16.mxu0 %v4436_v25  ;;  %v1076_v50 = vrot.slane %v5031_v47, %v5028_v46  ;;  %v1082_v55 = vrot.slane %v5031_v47, %v5037_v51 }
  0x5b   : > { %1272 = vmatpush1.bf16.msra.mxu0 %v4438_v26  ;;  %4185 = vmatpush3.bf16.msra.mxu1 %v4439_v27  ;;  %s5567_s23 = scalar_lea.vmem %s5566_s22, %s4890_s19  ;;  %s5570_s11 = scalar_lea.vmem %s5569_s24, %s4871_s3 }
  0x5c   : > { %1273 = vmatprep.subr.bf16.mxu0 %v4440_v28  ;;  %4186 = vmatprep.subr.bf16.mxu1 %v4710_v6 }
  0x5f   : > { %1274 = vmatpush1.bf16.msra.mxu0 %v4442_v29  ;;  %4187 = vmatpush3.bf16.msra.mxu1 %v4443_v30 }
  0x60   : > { %1275 = vmatprep.subr.bf16.mxu0 %v4444_v31  ;;  %4188 = vmatprep.subr.bf16.mxu1 %v4710_v6 }
  0x63   : > { %1276 = vmatpush1.bf16.msra.mxu0 %v4446_v33  ;;  %4189 = vmatpush3.bf16.msra.mxu1 %v4447_v34 }
  0x64   : > { %1277 = vmatprep.subr.bf16.mxu0 %v4448_v35  ;;  %4190 = vmatprep.subr.bf16.mxu1 %v4710_v6 }
  0x67   : > { %1278 = vmatpush1.bf16.msra.mxu0 %v4450_v36  ;;  %4191 = vmatpush3.bf16.msra.mxu1 %v4451_v37 }
  0x68   : > { %4202 = vmatprep.subr.bf16.mxu1 %v4710_v6  ;;  %4196 = vmatprep.subr.bf16.mxu0 %v4710_v6 }
  0xdd   : > { %v1051_v9 = vpop.xlane.xlu0 %1050 }
  0xde   : > { %v1055_v10 = vmul.f32 0.0078125, %v1051_v9 }
  0xe0   : > { %v4986_v11 = vsub.f32 %v1044_v2, %v1055_v10  ;;  %v1127_v2 = vrot.slane %v1118_v61, %v5037_v51 }
  0xe1   : > { %v1053_v12 = vpop.xlane.xlu0 %1052 }
  0xe2   : > { %v1056_v13 = vmul.f32 0.0078125, %v1053_v12  ;;  %v1059_v14 = vmul.f32 %v4986_v11, %v4986_v11 }
  0xe4   : > { %v4990_v15 = vsub.f32 %v1045_v3, %v1056_v13  ;;  %1061 = vadd.xlane.f32.xlu1 %v1059_v14 }
  0xe6   : > { %v1060_v16 = vmul.f32 %v4990_v15, %v4990_v15 }
  0xe8   : > { %1063 = vadd.xlane.f32.xlu1 %v1060_v16 }
 0x171   : > { %v1062_v38 = vpop.xlane.xlu1 %1061 }
 0x172   : > { %v1065_v39 = vmul.f32 0.0078125, %v1062_v38 }
 0x174   : > { %v1067_v40 = vadd.f32 1e-05, %v1065_v39 }
 0x175   : > { %v1064_v41 = vpop.xlane.xlu1 %1063 }
 0x176   : > { %4548 = vrsqrt.f32 %v1067_v40  ;;  %v1066_v43 = vmul.f32 0.0078125, %v1064_v41 }
 0x178   : > { %v1068_v44 = vadd.f32 1e-05, %v1066_v43 }
 0x17a   : > { %4550 = vrsqrt.f32 %v1068_v44 }
 0x180   : > { %v4549_v48 = vpop.eup %4548 }
 0x181   : > { %v1071_v49 = vmul.f32 %v4549_v48, %v4986_v11 }
 0x183   : > { %v1077_v54 = vmul.f32 %v1076_v50, %v1071_v49 }
 0x184   : > { %v4551_v52 = vpop.eup %4550 }
 0x185   : > { %v1072_v53 = vmul.f32 %v4551_v52, %v4990_v15  ;;  %v1083_v57 = vadd.f32 %v1082_v55, %v1077_v54 }
 0x187   : > { %v1078_v56 = vmul.f32 %v1076_v50, %v1072_v53 }
 0x189   : > { %v1084_v58 = vadd.f32 %v1082_v55, %v1078_v56 }
 0x18b   : > { %v1085_v59 = vpack.c.bf16 %v1084_v58, %v1083_v57 }
 0x18d   : > { %1296 = vmatmul.mubr.bf16.vlgmr.msra.gmra.mrb[0].mxu0 %v1085_v59  ;;  %4193 = vmatmul.mubr.bf16.vlgmr.msra.gmra.mrb[0].mxu1 %v1085_v59 }
 0x18e   : > { %4198 = vmatprep.mubr.msk.bf16.mxu0 %vm4712_vm0, %v4710_v6  ;;  %4204 = vmatprep.mubr.msk.bf16.mxu1 %vm4712_vm0, %v4710_v6 }
 0x260   : > { %v1297_v0 = vpop.f32.mrb[0].mxu0  ;;  %v1340_v1 = vpop.f32.mrb[0].mxu1 }
 0x261   : > { %v1299_v3 = vpop.f32.mrb[1].mxu0  ;;  %v4194_v4 = vpop.f32.mrb[1].mxu1  ;;  %v1298_v8 = vadd.f32 %v1297_v0, %v1123_v62  ;;  %v1341_v9 = vadd.f32 %v1340_v1, %v1131_v63 }
 0x262   : > { %v1301_v5 = vpop.f32.mrb[2].mxu0  ;;  %v1343_v7 = vpop.f32.mrb[2].mxu1  ;;  %v1300_v14 = vadd.f32 %v1299_v3, %v1127_v2 }
 0x263   : > { %v1302_v10 = vadd.f32 %v1301_v5, %v1123_v62  ;;  %v1344_v11 = vadd.f32 %v1343_v7, %v1131_v63  ;;  %v1303_v12 = vpop.f32.mrb[3].mxu0  ;;  %v4195_v13 = vpop.f32.mrb[3].mxu1 }
 0x264   : > { %v1304_v15 = vadd.f32 %v1303_v12, %v1127_v2 }
 0x265   : > { %v1347_v16 = vpack.c.bf16 %v1302_v10, %v1298_v8  ;;  %v5053_v17 = vpack.c.bf16 %v1344_v11, %v1341_v9 }
 0x266   : > { %v1348_v18 = vpack.c.bf16 %v1304_v15, %v1300_v14 }
 0x267   : > { %4203 = vmatpush3.bf16.msra.mxu1 %v5053_v17  ;;  %1469 = vrot.lane.b32.xlu1 %v1347_v16, %s4713_s25 }
 0x268   : > { %1472 = vrot.lane.b32.xlu0 %v1348_v18, %s4713_s25  ;;  %v1355_v19 = vsel %vm1350_vm1, %v1348_v18, 0  ;;  %4214 = vmatprep.subr.bf16.mxu1 %v4710_v6 }
 0x269   : > { %4197 = vmatpush3.bf16.xpose.msra.mxu0 %v1355_v19 }
 0x26a   : > { %4208 = vmatprep.subr.bf16.mxu0 %v4710_v6 }
 0x26b   : > { %1605 = vrot.lane.b32.xlu1 %v1348_v18, %s4714_s26 }
 0x26c   : > { %1737 = vrot.lane.b32.xlu0 %v1348_v18, %s4715_s0 }
 0x26f   : > { %1603 = vrot.lane.b32.xlu1 %v1347_v16, %s4714_s26 }
 0x270   : > { %4199 = vmatmul.mubr.msk.bf16.vlgmr.msra.gmra.mrb[4].mxu0 %vm1350_vm1, %v1347_v16 }
 0x271   : > { %4210 = vmatprep.mubr.msk.bf16.mxu0 %vm4712_vm0, %v4710_v6 }
 0x273   : > { %1735 = vrot.lane.b32.xlu1 %v1347_v16, %s4715_s0 }
 0x2d9   : > { %v1470_v20 = vpop.permute.xlu1 %1469 }
 0x2da   : > { %v1473_v21 = vpop.permute.xlu0 %1472 }
 0x2db   : > { %v1478_v22 = vsel %vm1350_vm1, %v1473_v21, 0 }
 0x2dc   : > { %4209 = vmatpush3.bf16.xpose.msra.mxu0 %v1478_v22 }
 0x2dd   : > { %4220 = vmatprep.subr.bf16.mxu0 %v4710_v6  ;;  %v1606_v23 = vpop.permute.xlu1 %1605 }
 0x2de   : > { %v1611_v24 = vsel %vm1350_vm1, %v1606_v23, 0  ;;  %v1738_v25 = vpop.permute.xlu0 %1737 }
 0x2df   : > { %v1743_v27 = vsel %vm1350_vm1, %v1738_v25, 0 }
 0x2e1   : > { %v1604_v26 = vpop.permute.xlu1 %1603 }
 0x2e3   : > { %4211 = vmatmul.mubr.msk.bf16.vlgmr.msra.gmra.mrb[8].mxu0 %vm1350_vm1, %v1470_v20 }
 0x2e4   : > { %4221 = vmatpush3.bf16.xpose.msra.mxu0 %v1611_v24  ;;  %4222 = vmatprep.mubr.msk.bf16.mxu0 %vm4712_vm0, %v4710_v6 }
 0x2e5   : > { %4232 = vmatprep.subr.bf16.mxu0 %v4710_v6  ;;  %v1736_v28 = vpop.permute.xlu1 %1735 }
 0x2eb   : > { %4223 = vmatmul.mubr.msk.bf16.vlgmr.msra.gmra.mrb[12].mxu0 %vm1350_vm1, %v1604_v26 }
 0x2ec   : > { %4233 = vmatpush3.bf16.xpose.msra.mxu0 %v1743_v27  ;;  %4234 = vmatprep.mubr.msk.bf16.mxu0 %vm4712_vm0, %v4710_v6 }
 0x2ed   : > { %4244 = vmatprep.subr.bf16.mxu0 %v4710_v6 }
 0x2f3   : > { %4235 = vmatmul.mubr.msk.bf16.vlgmr.msra.gmra.mrb[16].mxu0 %vm1350_vm1, %v1736_v28 }
 0x2f4   : > { %4260 = vmatprep.mubr.msk.bf16.mxu0 %vm4712_vm0, %v4710_v6 }
 0x343   : > { %v1391_v29 = vpop.f32.mrb[4].mxu0 }
 0x344   : > { %v4200_v30 = vpop.f32.mrb[5].mxu0  ;;  %v1399_v31 = vsel %vm1398_vm2, %v1391_v29, -inf }
 0x345   : > { %1400 = vmax.xlane.f32.xlu0 %v1399_v31  ;;  %v1394_v33 = vpop.f32.mrb[6].mxu0 }
 0x346   : > { %v4201_v34 = vpop.f32.mrb[7].mxu0  ;;  %v1402_v35 = vsel %vm1398_vm2, %v1394_v33, -inf }
 0x347   : > { %1403 = vmax.xlane.f32.xlu1 %v1402_v35 }
 0x3b6   : > { %v1514_v36 = vpop.f32.mrb[8].mxu0 }
 0x3b7   : > { %v4212_v37 = vpop.f32.mrb[9].mxu0  ;;  %v1521_v38 = vsel %vm1398_vm2, %v1514_v36, -inf }
 0x3b8   : > { %1522 = vmax.xlane.f32.xlu0 %v1521_v38  ;;  %v1517_v39 = vpop.f32.mrb[10].mxu0 }
 0x3b9   : > { %v4213_v40 = vpop.f32.mrb[11].mxu0  ;;  %v1524_v41 = vsel %vm1398_vm2, %v1517_v39, -inf }
 0x3bc   : > { %1525 = vmax.xlane.f32.xlu0 %v1524_v41 }
 0x3be   : > { %v1647_v42 = vpop.f32.mrb[12].mxu0 }
 0x3bf   : > { %v4224_v43 = vpop.f32.mrb[13].mxu0  ;;  %v1654_v44 = vsel %vm1398_vm2, %v1647_v42, -inf }
 0x3c0   : > { %1655 = vmax.xlane.f32.xlu0 %v1654_v44  ;;  %v1650_v48 = vpop.f32.mrb[14].mxu0 }
 0x3c1   : > { %v4225_v49 = vpop.f32.mrb[15].mxu0  ;;  %v1657_v50 = vsel %vm1398_vm2, %v1650_v48, -inf }
 0x3c2   : > { %1658 = vmax.xlane.f32.xlu1 %v1657_v50 }
 0x3c6   : > { %v1779_v52 = vpop.f32.mrb[16].mxu0 }
 0x3c7   : > { %v4236_v53 = vpop.f32.mrb[17].mxu0  ;;  %v1786_v54 = vsel %vm1398_vm2, %v1779_v52, -inf }
 0x3c8   : > { %1787 = vmax.xlane.f32.xlu0 %v1786_v54  ;;  %v5090_v55 = vpop.f32.mrb[18].mxu0 }
 0x3c9   : > { %v4237_v56 = vpop.f32.mrb[19].mxu0  ;;  %v1789_v57 = vsel %vm1398_vm2, %v5090_v55, -inf }
 0x3ca   : > { %1790 = vmax.xlane.f32.xlu1 %v1789_v57 }
 0x3d2   : > { %v1401_v58 = vpop.xlane.xlu0 %1400 }
 0x3d3   : > { %v1405_v59 = vsub.f32 %v1391_v29, %v1401_v58 }
 0x3d4   : > { %v1404_v61 = vpop.xlane.xlu1 %1403 }
 0x3d5   : > { %v1407_v62 = vmul.f32 1.442695, %v1405_v59  ;;  %v1406_v63 = vsub.f32 %v1394_v33, %v1404_v61 }
 0x3d7   : > { %4552 = vpow2.f32 %v1407_v62  ;;  %v1409_v0 = vmul.f32 1.442695, %v1406_v63 }
 0x3d9   : > { %4554 = vpow2.f32 %v1409_v0 }
 0x3e1   : > { %v4553_v1 = vpop.eup %4552 }
 0x3e2   : > { %v1411_v2 = vsel %vm1398_vm2, %v4553_v1, 0.0 }
 0x3e3   : > { %v4555_v3 = vpop.eup %4554  ;;  %1412 = vadd.xlane.f32.xlu0 %v1411_v2 }
 0x3e4   : > { %v1414_v4 = vsel %vm1398_vm2, %v4555_v3, 0.0 }
 0x3e5   : > { %1415 = vadd.xlane.f32.xlu1 %v1414_v4 }
 0x445   : > { %v1523_v5 = vpop.xlane.xlu0 %1522 }
 0x446   : > { %v1527_v7 = vsub.f32 %v1514_v36, %v1523_v5 }
 0x448   : > { %v1529_v8 = vmul.f32 1.442695, %v1527_v7 }
 0x449   : > { %v1526_v9 = vpop.xlane.xlu0 %1525 }
 0x44a   : > { %4556 = vpow2.f32 %v1529_v8  ;;  %v1528_v10 = vsub.f32 %v1517_v39, %v1526_v9 }
 0x44c   : > { %v1531_v11 = vmul.f32 1.442695, %v1528_v10 }
 0x44d   : > { %v1656_v12 = vpop.xlane.xlu0 %1655 }
 0x44e   : > { %4558 = vpow2.f32 %v1531_v11  ;;  %v1660_v13 = vsub.f32 %v1647_v42, %v1656_v12 }
 0x44f   : > { %v1659_v14 = vpop.xlane.xlu1 %1658 }
 0x450   : > { %v1662_v15 = vmul.f32 1.442695, %v1660_v13  ;;  %v1661_v16 = vsub.f32 %v1650_v48, %v1659_v14 }
 0x452   : > { %4560 = vpow2.f32 %v1662_v15  ;;  %v1664_v18 = vmul.f32 1.442695, %v1661_v16 }
 0x454   : > { %v4557_v19 = vpop.eup %4556  ;;  %4562 = vpow2.f32 %v1664_v18 }
 0x455   : > { %v1788_v20 = vpop.xlane.xlu0 %1787  ;;  %v1533_v21 = vsel %vm1398_vm2, %v4557_v19, 0.0 }
 0x456   : > { %v1792_v22 = vsub.f32 %v1779_v52, %v1788_v20  ;;  %1534 = vadd.xlane.f32.xlu0 %v1533_v21 }
 0x457   : > { %v1791_v33 = vpop.xlane.xlu1 %1790 }
 0x458   : > { %v4559_v23 = vpop.eup %4558  ;;  %v1794_v24 = vmul.f32 1.442695, %v1792_v22  ;;  %v1793_v40 = vsub.f32 %v5090_v55, %v1791_v33 }
 0x459   : > { %v1536_v25 = vsel %vm1398_vm2, %v4559_v23, 0.0 }
 0x45a   : > { %4564 = vpow2.f32 %v1794_v24  ;;  %1537 = vadd.xlane.f32.xlu1 %v1536_v25  ;;  %v1796_v42 = vmul.f32 1.442695, %v1793_v40 }
 0x45c   : > { %v4561_v26 = vpop.eup %4560 }
 0x45d   : > { %v1666_v27 = vsel %vm1398_vm2, %v4561_v26, 0.0 }
 0x45e   : > { %v4563_v28 = vpop.eup %4562  ;;  %1667 = vadd.xlane.f32.xlu0 %v1666_v27 }
 0x45f   : > { %v1669_v29 = vsel %vm1398_vm2, %v4563_v28, 0.0 }
 0x460   : > { %1670 = vadd.xlane.f32.xlu1 %v1669_v29 }
 0x464   : > { %v4565_v30 = vpop.eup %4564 }
 0x465   : > { %v1798_v31 = vsel %vm1398_vm2, %v4565_v30, 0.0 }
 0x466   : > { %1799 = vadd.xlane.f32.xlu0 %v1798_v31 }
 0x470   : > { %v1413_v34 = vpop.xlane.xlu0 %1412 }
 0x471   : > { %4566 = vrcp.f32 %v1413_v34  ;;  %1677 = vrot.lane.b32.xlu1 %v5053_v17, %s4714_s26 }
 0x472   : > { %v1416_v35 = vpop.xlane.xlu1 %1415 }
 0x473   : > { %4568 = vrcp.f32 %v1416_v35 }
 0x474   : > { %4570 = vpow2.f32 %v1796_v42 }
 0x47b   : > { %v4567_v36 = vpop.eup %4566 }
 0x47c   : > { %1545 = vrot.lane.b32.xlu0 %v5053_v17, %s4713_s25  ;;  %v1419_v38 = vmul.f32 %v4567_v36, %v4553_v1 }
 0x47d   : > { %v4569_v37 = vpop.eup %4568 }
 0x47e   : > { %v1420_v39 = vmul.f32 %v4569_v37, %v4555_v3  ;;  %v4571_v43 = vpop.eup %4570 }
 0x47f   : > { %v1801_v44 = vsel %vm1398_vm2, %v4571_v43, 0.0 }
 0x480   : > { %v1421_v41 = vpack.c.bf16 %v1420_v39, %v1419_v38 }
 0x482   : > { %4205 = vmatmul.mubr.msk.bf16.vlgmr.msra.gmra.mrb[4].mxu1 %vm1398_vm2, %v1421_v41 }
 0x483   : > { %4216 = vmatprep.mubr.msk.bf16.mxu1 %vm4712_vm0, %v4710_v6 }
 0x495   : > { %1802 = vadd.xlane.f32.xlu1 %v1801_v44  ;;  %v4452_v44 = vld [vmem:[%s4907_s1] sm:$0xff]  }
 0x496   : > { %4245 = vmatpush3.bf16.msra.mxu0 %v4452_v44 }
 0x497   : > { %4246 = vmatprep.subr.bf16.mxu0 %v4710_v6 }
 0x4a6   : > { %1809 = vrot.lane.b32.xlu1 %v5053_v17, %s4715_s0 }
 0x4e3   : > { %v1535_v48 = vpop.xlane.xlu0 %1534 }
 0x4e7   : > { %v1538_v49 = vpop.xlane.xlu1 %1537 }
 0x4e8   : > { %4572 = vrcp.f32 %v1538_v49  ;;  %v4454_v49 = vld [vmem:[%s4907_s1 + $0x10] sm:$0xff]  }
 0x4e9   : > { %4574 = vrcp.f32 %v1535_v48  ;;  %v4453_v48 = vld [vmem:[%s4907_s1 + $0x8] sm:$0xff]  }
 0x4ea   : > { %4247 = vmatpush3.bf16.msra.mxu0 %v4453_v48 }
 0x4eb   : > { %v1668_v52 = vpop.xlane.xlu0 %1667  ;;  %4248 = vmatprep.subr.bf16.mxu0 %v4710_v6 }
 0x4ed   : > { %v1671_v50 = vpop.xlane.xlu1 %1670 }
 0x4ee   : > { %4576 = vrcp.f32 %v1671_v50  ;;  %4249 = vmatpush3.bf16.msra.mxu0 %v4454_v49  ;;  %v4455_v50 = vld [vmem:[%s4907_s1 + $0x18] sm:$0xff]   ;;  %v4666_v49 = vld [vmem:[%s5561_s13] sm:$0xff] }
 0x4ef   : > { %4578 = vrcp.f32 %v1668_v52  ;;  %4250 = vmatprep.subr.bf16.mxu0 %v4710_v6  ;;  %v4456_v52 = vld [vmem:[%s4907_s1 + $0x20] sm:$0xff]  }
 0x4f1   : > { %v1678_v17 = vpop.permute.xlu1 %1677 }
 0x4f2   : > { %v4573_v53 = vpop.eup %4572  ;;  %4251 = vmatpush3.bf16.msra.mxu0 %v4455_v50 }
 0x4f3   : > { %v1800_v54 = vpop.xlane.xlu0 %1799  ;;  %v4575_v55 = vpop.eup %4574  ;;  %v1542_v56 = vmul.f32 %v4573_v53, %v4559_v23  ;;  %4252 = vmatprep.subr.bf16.mxu0 %v4710_v6  ;;  %v4457_v53 = vld [vmem:[%s4907_s1 + $0x28] sm:$0xff]  }
 0x4f4   : > { %v1541_v57 = vmul.f32 %v4575_v55, %v4557_v19  ;;  %4580 = vrcp.f32 %v1800_v54  ;;  %v4458_v54 = vld [vmem:[%s4907_s1 + $0x30] sm:$0xff]   ;;  %v4459_v55 = vld [vmem:[%s4907_s1 + $0x38] sm:$0xff]   ;;  %s5573_s1 = sld [smem:[#allocation28_spill]] }
 0x4f6   : > { %v1543_v59 = vpack.c.bf16 %v1542_v56, %v1541_v57  ;;  %4253 = vmatpush3.bf16.msra.mxu0 %v4456_v52  ;;  %v2079_v56 = vld [vmem:[%s5563_s2] sm:$0xff] }
 0x4f7   : > { %v1546_v58 = vpop.permute.xlu0 %1545  ;;  %4254 = vmatprep.subr.bf16.mxu0 %v4710_v6 }
 0x4f8   : > { %4215 = vmatpush3.bf16.msra.mxu1 %v1546_v58  ;;  %v4577_v61 = vpop.eup %4576 }
 0x4f9   : > { %4226 = vmatprep.subr.bf16.mxu1 %v4710_v6  ;;  %v4579_v62 = vpop.eup %4578  ;;  %v1675_v63 = vmul.f32 %v4577_v61, %v4563_v28 }
 0x4fa   : > { %v1674_v0 = vmul.f32 %v4579_v62, %v4561_v26  ;;  %4255 = vmatpush3.bf16.msra.mxu0 %v4457_v53  ;;  %s5574_s5 = scalar_lea.vmem %s5573_s1, %s4871_s3 }
 0x4fb   : > { %4217 = vmatmul.mubr.msk.bf16.vlgmr.msra.gmra.mrb[8].mxu1 %vm1398_vm2, %v1543_v59  ;;  %4256 = vmatprep.subr.bf16.mxu0 %v4710_v6 }
 0x4fc   : > { %4227 = vmatpush3.bf16.msra.mxu1 %v1678_v17  ;;  %4228 = vmatprep.mubr.msk.bf16.mxu1 %vm4712_vm0, %v4710_v6  ;;  %v1676_v1 = vpack.c.bf16 %v1675_v63, %v1674_v0  ;;  %v5155_v63 = vld [vmem:[%s5564_s20] sm:$0x3f]  ;;  %v1916_v0 = vsub.s32 3, %v5025_v45 }
 0x4fd   : > { %4238 = vmatprep.subr.bf16.mxu1 %v4710_v6 }
 0x4fe   : > { %v4581_v4 = vpop.eup %4580  ;;  %4257 = vmatpush3.bf16.msra.mxu0 %v4458_v54  ;;  %v4667_v54 = vld [vmem:[%s5561_s13 + $0x8] sm:$0xff] }
 0x4ff   : > { %v1806_v7 = vmul.f32 %v4581_v4, %v4565_v30  ;;  %4258 = vmatprep.subr.bf16.mxu0 %v4710_v6 }
 0x502   : > { %4259 = vmatpush3.bf16.msra.mxu0 %v4459_v55 }
 0x503   : > { %4229 = vmatmul.mubr.msk.bf16.vlgmr.msra.gmra.mrb[12].mxu1 %vm1398_vm2, %v1676_v1  ;;  %v1911_v1 = vrot.slane %v5031_v47, %v5047_v60 }
 0x504   : > { %4240 = vmatprep.mubr.msk.bf16.mxu1 %vm4712_vm0, %v4710_v6 }
 0x522   : > { %v1803_v2 = vpop.xlane.xlu1 %1802 }
 0x523   : > { %4582 = vrcp.f32 %v1803_v2  ;;  %v5161_v2 = vadd.f32 1.0, %v5155_v63 }
 0x526   : > { %v1810_v3 = vpop.permute.xlu1 %1809 }
 0x527   : > { %4239 = vmatpush3.bf16.msra.mxu1 %v1810_v3 }
 0x528   : > { %4264 = vmatprep.subr.bf16.mxu1 %v4710_v6 }
 0x52d   : > { %v4583_v5 = vpop.eup %4582 }
 0x52e   : > { %v1807_v8 = vmul.f32 %v4583_v5, %v4571_v43  ;;  %v1917_v5 = vrot.slane %v5031_v47, %v1916_v0 }
 0x530   : > { %v1808_v9 = vpack.c.bf16 %v1807_v8, %v1806_v7  ;;  %v1924_v8 = vrot.slane %v5161_v2, %v5028_v46 }
 0x532   : > { %4241 = vmatmul.mubr.msk.bf16.vlgmr.msra.gmra.mrb[16].mxu1 %vm1398_vm2, %v1808_v9 }
 0x533   : > { %4280 = vmatprep.mubr.msk.bf16.mxu1 %vm4712_vm0, %v4710_v6 }
 0x555   : > { %v1459_v10 = vpop.f32.mrb[4].mxu1 }
 0x556   : > { %1466 = vst.msk [vmem:[#allocation2] sm:$0xff] %vm1350_vm1, %v1459_v10  ;;  %v4206_v11 = vpop.f32.mrb[5].mxu1 }
 0x557   : > { %v1462_v12 = vpop.f32.mrb[6].mxu1 }
 0x558   : > { %1467 = vst.msk [vmem:[#allocation2 + $0x8] sm:$0xff] %vm1350_vm1, %v1462_v12  ;;  %v4207_v13 = vpop.f32.mrb[7].mxu1  ;;  %v1930_v12 = vrot.slane %v5155_v63, %v5037_v51 }
 0x5ce   : > { %v1585_v14 = vpop.f32.mrb[8].mxu1 }
 0x5cf   : > { %1594 = vrot.lane.b32.xlu1 %v1585_v14, %s4715_s0  ;;  %v4218_v15 = vpop.f32.mrb[9].mxu1 }
 0x5d0   : > { %v1588_v16 = vpop.f32.mrb[10].mxu1 }
 0x5d1   : > { %1596 = vrot.lane.b32.xlu0 %v1588_v16, %s4715_s0  ;;  %v4219_v18 = vpop.f32.mrb[11].mxu1 }
 0x5d6   : > { %v1717_v19 = vpop.f32.mrb[12].mxu1 }
 0x5d7   : > { %1726 = vrot.lane.b32.xlu1 %v1717_v19, %s4714_s26  ;;  %v4230_v20 = vpop.f32.mrb[13].mxu1 }
 0x5d8   : > { %v1720_v21 = vpop.f32.mrb[14].mxu1 }
 0x5d9   : > { %1728 = vrot.lane.b32.xlu0 %v1720_v21, %s4714_s26  ;;  %v4231_v22 = vpop.f32.mrb[15].mxu1 }
 0x605   : > { %v1849_v23 = vpop.f32.mrb[16].mxu1 }
 0x606   : > { %1858 = vrot.lane.b32.xlu1 %v1849_v23, %s4713_s25  ;;  %v4242_v24 = vpop.f32.mrb[17].mxu1 }
 0x607   : > { %v1852_v25 = vpop.f32.mrb[18].mxu1 }
 0x608   : > { %1860 = vrot.lane.b32.xlu0 %v1852_v25, %s4713_s25  ;;  %v4243_v26 = vpop.f32.mrb[19].mxu1 }
 0x641   : > { %v1595_v27 = vpop.permute.xlu1 %1594 }
 0x642   : > { %1601 = vst.msk [vmem:[#allocation2] sm:$0xff] %vm1600_vm3, %v1595_v27 }
 0x643   : > { %v1597_v28 = vpop.permute.xlu0 %1596 }
 0x644   : > { %1602 = vst.msk [vmem:[#allocation2 + $0x8] sm:$0xff] %vm1600_vm3, %v1597_v28 }
 0x649   : > { %v1727_v29 = vpop.permute.xlu1 %1726 }
 0x64a   : > { %1733 = vst.msk [vmem:[#allocation2] sm:$0xff] %vm1732_vm4, %v1727_v29 }
 0x64b   : > { %v1729_v30 = vpop.permute.xlu0 %1728 }
 0x64c   : > { %1734 = vst.msk [vmem:[#allocation2 + $0x8] sm:$0xff] %vm1732_vm4, %v1729_v30 }
 0x678   : > { %v1859_v31 = vpop.permute.xlu1 %1858 }
 0x679   : > { %1865 = vst.msk [vmem:[#allocation2] sm:$0xff] %vm1864_vm5, %v1859_v31 }
 0x67a   : > { %v1861_v33 = vpop.permute.xlu0 %1860 }
 0x67b   : > { %1866 = vst.msk [vmem:[#allocation2 + $0x8] sm:$0xff] %vm1864_vm5, %v1861_v33 }
 0x680   : > { %v1867_v34 = vld [vmem:[#allocation2] sm:$0xff] }
 0x681   : > { %1886 = vadd.xlane.f32.xlu1 %v1867_v34 }
 0x682   : > { %v1868_v35 = vld [vmem:[#allocation2 + $0x8] sm:$0xff] }
 0x683   : > { %1888 = vadd.xlane.f32.xlu0 %v1868_v35 }
 0x685   : > { %2080 = vadd.xlane.f32.xlu1 %v2079_v56 }
 0x70e   : > { %v1887_v36 = vpop.xlane.xlu1 %1886 }
 0x70f   : > { %v1890_v37 = vmul.f32 0.0078125, %v1887_v36  ;;  %v4465_v36 = vld [vmem:[%s4935_s6 + $0x14] ss:$8 sps:$4 sm:$0xff]  }
 0x710   : > { %v1889_v38 = vpop.xlane.xlu0 %1888 }
 0x711   : > { %v1892_v39 = vsub.f32 %v1867_v34, %v1890_v37  ;;  %v1891_v40 = vmul.f32 0.0078125, %v1889_v38  ;;  %v4460_v34 = vld [vmem:[%s4935_s6] ss:$8 sps:$4 sm:$0xff]   ;;  %v4463_v37 = vld [vmem:[%s4935_s6 + $0x10] ss:$8 sps:$4 sm:$0xff]  }
 0x712   : > { %v2081_v38 = vpop.xlane.xlu1 %2080 }
 0x713   : > { %v1893_v41 = vsub.f32 %v1868_v35, %v1891_v40  ;;  %v1894_v42 = vmul.f32 %v1892_v39, %v1892_v39  ;;  %v4462_v35 = vld [vmem:[%s4935_s6 + $0x4] ss:$8 sps:$4 sm:$0xff]   ;;  %v3972_v40 = vld [vmem:[%s5565_s4] ss:$0 sm:$0xff] }
 0x714   : > { %2323 = vmatprep.subr.bf16.mxu0 %v4462_v35  ;;  %v4489_v35 = vld [vmem:[%s4921_s21 + $0x28] sm:$0xff]  }
 0x715   : > { %1896 = vadd.xlane.f32.xlu0 %v1894_v42  ;;  %v1895_v43 = vmul.f32 %v1893_v41, %v1893_v41 }
 0x719   : > { %1898 = vadd.xlane.f32.xlu0 %v1895_v43 }
 0x7a2   : > { %v1897_v57 = vpop.xlane.xlu0 %1896 }
 0x7a3   : > { %v1900_v58 = vmul.f32 0.0078125, %v1897_v57 }
 0x7a5   : > { %v1902_v59 = vadd.f32 1e-05, %v1900_v58  ;;  %v4466_v58 = vld [vmem:[%s4935_s6 + $0x20] ss:$8 sps:$4 sm:$0xff]  }
 0x7a6   : > { %v1899_v61 = vpop.xlane.xlu0 %1898 }
 0x7a7   : > { %4584 = vrsqrt.f32 %v1902_v59  ;;  %v1901_v17 = vmul.f32 0.0078125, %v1899_v61  ;;  %v4471_v59 = vld [vmem:[%s4935_s6 + $0x34] ss:$8 sps:$4 sm:$0xff]   ;;  %v4469_v61 = vld [vmem:[%s4935_s6 + $0x30] ss:$8 sps:$4 sm:$0xff]  }
 0x7a9   : > { %v1903_v62 = vadd.f32 1e-05, %v1901_v17  ;;  %v4472_v17 = vld [vmem:[%s4935_s6 + $0x40] ss:$8 sps:$4 sm:$0xff]  }
 0x7ab   : > { %4586 = vrsqrt.f32 %v1903_v62  ;;  %v4474_v62 = vld [vmem:[%s4935_s6 + $0x44] ss:$8 sps:$4 sm:$0xff]  }
 0x7b1   : > { %v4585_v3 = vpop.eup %4584 }
 0x7b2   : > { %v1906_v4 = vmul.f32 %v4585_v3, %v1892_v39  ;;  %v2082_v39 = vmul.f32 0.0078125, %v2081_v38  ;;  %v4475_v3 = vld [vmem:[%s4935_s6 + $0x50] ss:$8 sps:$4 sm:$0xff]  }
 0x7b4   : > { %v1912_v7 = vmul.f32 %v1911_v1, %v1906_v4  ;;  %v2083_v44 = vsub.f32 %v2079_v56, %v2082_v39  ;;  %v4468_v56 = vld [vmem:[%s4935_s6 + $0x24] ss:$8 sps:$4 sm:$0xff]  }
 0x7b5   : > { %v4587_v9 = vpop.eup %4586  ;;  %v4480_v4 = vld [vmem:[%s4935_s6 + $0x64] ss:$8 sps:$4 sm:$0xff]  }
 0x7b6   : > { %v1907_v10 = vmul.f32 %v4587_v9, %v1893_v41  ;;  %v1918_v11 = vadd.f32 %v1917_v5, %v1912_v7  ;;  %v2084_v57 = vmul.f32 %v2083_v44, %v2083_v44  ;;  %v4483_v7 = vld [vmem:[%s4935_s6 + $0x74] ss:$8 sps:$4 sm:$0xff]   ;;  %v4484_v9 = vld [vmem:[%s4921_s21] sm:$0xff]  }
 0x7b7   : > { %4265 = vmatpush3.bf16.msra.mxu1 %v4484_v9 }
 0x7b8   : > { %v1913_v13 = vmul.f32 %v1911_v1, %v1907_v10  ;;  %v1925_v14 = vmul.f32 %v1924_v8, %v1918_v11  ;;  %v4477_v1 = vld [vmem:[%s4935_s6 + $0x54] ss:$8 sps:$4 sm:$0xff]   ;;  %v4485_v10 = vld [vmem:[%s4921_s21 + $0x8] sm:$0xff]   ;;  %4266 = vmatprep.subr.bf16.mxu1 %v4710_v6 }
 0x7ba   : > { %v1919_v15 = vadd.f32 %v1917_v5, %v1913_v13  ;;  %v1931_v16 = vadd.f32 %v1930_v12, %v1925_v14  ;;  %v4478_v5 = vld [vmem:[%s4935_s6 + $0x60] ss:$8 sps:$4 sm:$0xff]  }
 0x7bb   : > { %4267 = vmatpush3.bf16.msra.mxu1 %v4485_v10 }
 0x7bc   : > { %v1926_v18 = vmul.f32 %v1924_v8, %v1919_v15  ;;  %v1933_v19 = vsub.f32 0.0, %v1931_v16  ;;  %v4481_v8 = vld [vmem:[%s4935_s6 + $0x70] ss:$8 sps:$4 sm:$0xff]   ;;  %4268 = vmatprep.subr.bf16.mxu1 %v4710_v6 }
 0x7be   : > { %v1932_v20 = vadd.f32 %v1930_v12, %v1926_v18  ;;  %v1935_v21 = vmul.f32 1.442695, %v1933_v19 }
 0x7c0   : > { %v1934_v22 = vsub.f32 0.0, %v1932_v20  ;;  %4588 = vpow2.f32 %v1935_v21 }
 0x7c2   : > { %v1937_v23 = vmul.f32 1.442695, %v1934_v22 }
 0x7c4   : > { %4590 = vpow2.f32 %v1937_v23  ;;  %v1049_v23 = vld [vmem:[%s5567_s23] sm:$0x3] }
 0x7ca   : > { %v4589_v24 = vpop.eup %4588 }
 0x7cb   : > { %v1939_v25 = vadd.f32 1.0, %v4589_v24  ;;  %v2094_v24 = vrot.slane %v1049_v23, %v5028_v46 }
 0x7cd   : > { %4592 = vrcp.f32 %v1939_v25 }
 0x7ce   : > { %v4591_v26 = vpop.eup %4590 }
 0x7cf   : > { %v1940_v27 = vadd.f32 1.0, %v4591_v26 }
 0x7d1   : > { %4594 = vrcp.f32 %v1940_v27  ;;  %v2099_v27 = vrot.slane %v1049_v23, %v5037_v51 }
 0x7d7   : > { %v4593_v28 = vpop.eup %4592 }
 0x7d8   : > { %v1945_v30 = vmul.f32 %v4593_v28, %v1931_v16  ;;  %v4486_v28 = vld [vmem:[%s4921_s21 + $0x10] sm:$0xff]  }
 0x7d9   : > { %4269 = vmatpush3.bf16.msra.mxu1 %v4486_v28 }
 0x7da   : > { %4270 = vmatprep.subr.bf16.mxu1 %v4710_v6 }
 0x7db   : > { %v4595_v29 = vpop.eup %4594 }
 0x7dc   : > { %v1946_v31 = vmul.f32 %v4595_v29, %v1932_v20 }
 0x7de   : > { %v1947_v33 = vpack.c.bf16 %v1946_v31, %v1945_v30  ;;  %v4487_v31 = vld [vmem:[%s4921_s21 + $0x18] sm:$0xff]  }
 0x7df   : > { %4271 = vmatpush3.bf16.msra.mxu1 %v4487_v31 }
 0x7e0   : > { %4261 = vmatmul.mubr.bf16.vlgmr.msra.gmra.mrb[20].mxu0 %v1947_v33  ;;  %4272 = vmatprep.subr.bf16.mxu1 %v4710_v6 }
 0x7e1   : > { %2355 = vmatprep.mubr.bf16.mxu0 %v4711_v32  ;;  %2324 = vmatpush1.bf16.msra.mxu0 %v4460_v34  ;;  %v4488_v34 = vld [vmem:[%s4921_s21 + $0x20] sm:$0xff]  }
 0x7e2   : > { %2325 = vmatprep.subr.bf16.mxu0 %v4465_v36  ;;  %v4490_v36 = vld [vmem:[%s4921_s21 + $0x30] sm:$0xff]  }
 0x7e3   : > { %4273 = vmatpush3.bf16.msra.mxu1 %v4488_v34 }
 0x7e4   : > { %4274 = vmatprep.subr.bf16.mxu1 %v4710_v6 }
 0x7e5   : > { %2326 = vmatpush1.bf16.msra.mxu0 %v4463_v37  ;;  %v4491_v37 = vld [vmem:[%s4921_s21 + $0x38] sm:$0xff]  }
 0x7e6   : > { %2327 = vmatprep.subr.bf16.mxu0 %v4468_v56 }
 0x7e7   : > { %4275 = vmatpush3.bf16.msra.mxu1 %v4489_v35 }
 0x7e8   : > { %4276 = vmatprep.subr.bf16.mxu1 %v4710_v6 }
 0x7e9   : > { %2328 = vmatpush1.bf16.msra.mxu0 %v4466_v58 }
 0x7ea   : > { %2329 = vmatprep.subr.bf16.mxu0 %v4471_v59 }
 0x7eb   : > { %4277 = vmatpush3.bf16.msra.mxu1 %v4490_v36 }
 0x7ec   : > { %4278 = vmatprep.subr.bf16.mxu1 %v4710_v6 }
 0x7ed   : > { %2330 = vmatpush1.bf16.msra.mxu0 %v4469_v61 }
 0x7ee   : > { %2331 = vmatprep.subr.bf16.mxu0 %v4474_v62 }
 0x7ef   : > { %4279 = vmatpush3.bf16.msra.mxu1 %v4491_v37 }
 0x7f0   : > { %4284 = vmatprep.subr.bf16.mxu1 %v4710_v6 }
 0x7f1   : > { %2332 = vmatpush1.bf16.msra.mxu0 %v4472_v17 }
 0x7f2   : > { %2333 = vmatprep.subr.bf16.mxu0 %v4477_v1  ;;  %v2231_v1 = vld [vmem:[%s5568_s29] sm:$0x3] }
 0x7f5   : > { %2334 = vmatpush1.bf16.msra.mxu0 %v4475_v3  ;;  %v2236_v3 = vrot.slane %v2231_v1, %v5028_v46 }
 0x7f6   : > { %2335 = vmatprep.subr.bf16.mxu0 %v4480_v4  ;;  %v2240_v4 = vrot.slane %v2231_v1, %v5037_v51 }
 0x7f9   : > { %2336 = vmatpush1.bf16.msra.mxu0 %v4478_v5 }
 0x7fa   : > { %2337 = vmatprep.subr.bf16.mxu0 %v4483_v7 }
 0x7fd   : > { %2338 = vmatpush1.bf16.msra.mxu0 %v4481_v8 }
 0x7fe   : > { %4308 = vmatprep.subr.bf16.mxu0 %v4710_v6 }
 0x8b3   : > { %v2036_v41 = vpop.f32.mrb[20].mxu0 }
 0x8b4   : > { %v2037_v42 = vadd.f32 %v3972_v40, %v2036_v41  ;;  %v4262_v43 = vpop.f32.mrb[21].mxu0 }
 0x8b5   : > { %v2039_v48 = vpop.f32.mrb[22].mxu0 }
 0x8b6   : > { %v5181_v50 = vadd.f32 %v4666_v49, %v2037_v42  ;;  %v2040_v52 = vadd.f32 %v3972_v40, %v2039_v48  ;;  %v4263_v53 = vpop.f32.mrb[23].mxu0  ;;  %v2075_v49 = vsub.s32 5, %v5025_v45 }
 0x8b8   : > { %v5184_v55 = vadd.f32 %v4667_v54, %v2040_v52  ;;  %2045 = vadd.xlane.f32.xlu0 %v5181_v50  ;;  %v2076_v58 = vrot.slane %v5031_v47, %v2075_v49 }
 0x8ba   : > { %2047 = vadd.xlane.f32.xlu1 %v5184_v55 }
 0x8bc   : > { %2085 = vadd.xlane.f32.xlu0 %v2084_v57 }
 0x945   : > { %v2046_v11 = vpop.xlane.xlu0 %2045 }
 0x946   : > { %v2049_v12 = vmul.f32 0.0078125, %v2046_v11 }
 0x947   : > { %v2048_v13 = vpop.xlane.xlu1 %2047 }
 0x948   : > { %v2051_v14 = vsub.f32 %v5181_v50, %v2049_v12  ;;  %v2050_v15 = vmul.f32 0.0078125, %v2048_v13  ;;  %v3981_v13 = vld [vmem:[%s5570_s11] ss:$0 sm:$0xff] }
 0x949   : > { %v2086_v16 = vpop.xlane.xlu0 %2085 }
 0x94a   : > { %v2052_v18 = vsub.f32 %v5184_v55, %v2050_v15  ;;  %v2087_v19 = vmul.f32 0.0078125, %v2086_v16  ;;  %v2053_v20 = vmul.f32 %v2051_v14, %v2051_v14 }
 0x94c   : > { %v2088_v21 = vadd.f32 1e-05, %v2087_v19  ;;  %2055 = vadd.xlane.f32.xlu1 %v2053_v20  ;;  %v2054_v22 = vmul.f32 %v2052_v18, %v2052_v18 }
 0x94e   : > { %4596 = vrsqrt.f32 %v2088_v21  ;;  %2057 = vadd.xlane.f32.xlu0 %v2054_v22 }
 0x958   : > { %v4597_v25 = vpop.eup %4596 }
 0x959   : > { %v2090_v26 = vmul.f32 %v4597_v25, %v2083_v44  ;;  %v2069_v44 = vsub.s32 4, %v5025_v45 }
 0x95b   : > { %v2095_v29 = vmul.f32 %v2094_v24, %v2090_v26  ;;  %v2070_v48 = vrot.slane %v5031_v47, %v2069_v44 }
 0x95d   : > { %v2100_v30 = vadd.f32 %v2099_v27, %v2095_v29 }
 0x95f   : > { %v2214_v33 = vpack.c.bf16 %v2100_v30, %v2100_v30 }
 0x961   : > { %2356 = vmatmul.mubr.bf16.vlgmr.msra.gmra.mrb[24].mxu0 %v2214_v33 }
 0x962   : > { %4310 = vmatprep.mubr.msk.bf16.mxu0 %vm4712_vm0, %v4710_v6 }
 0x9d9   : > { %v2056_v38 = vpop.xlane.xlu1 %2055 }
 0x9da   : > { %v2059_v39 = vmul.f32 0.0078125, %v2056_v38 }
 0x9db   : > { %v2058_v40 = vpop.xlane.xlu0 %2057 }
 0x9dc   : > { %v2061_v41 = vadd.f32 1e-05, %v2059_v39  ;;  %v2060_v42 = vmul.f32 0.0078125, %v2058_v40 }
 0x9de   : > { %4598 = vrsqrt.f32 %v2061_v41  ;;  %v2062_v43 = vadd.f32 1e-05, %v2060_v42 }
 0x9e0   : > { %4600 = vrsqrt.f32 %v2062_v43 }
 0x9e8   : > { %v4599_v52 = vpop.eup %4598 }
 0x9e9   : > { %v2065_v53 = vmul.f32 %v4599_v52, %v2051_v14 }
 0x9ea   : > { %v4601_v54 = vpop.eup %4600 }
 0x9eb   : > { %v2066_v57 = vmul.f32 %v4601_v54, %v2052_v18  ;;  %v2071_v56 = vmul.f32 %v2070_v48, %v2065_v53 }
 0x9ed   : > { %v2072_v59 = vmul.f32 %v2070_v48, %v2066_v57  ;;  %v2077_v61 = vadd.f32 %v2076_v58, %v2071_v56 }
 0x9ef   : > { %v2078_v17 = vadd.f32 %v2076_v58, %v2072_v59 }
 0x9f1   : > { %v2101_v62 = vpack.c.bf16 %v2078_v17, %v2077_v61 }
 0x9f3   : > { %4281 = vmatmul.mubr.bf16.vlgmr.msra.gmra.mrb[20].mxu1 %v2101_v62 }
 0x9f4   : > { %4286 = vmatprep.mubr.msk.bf16.mxu1 %vm4712_vm0, %v4710_v6 }
 0xa34   : > { %v2357_v5 = vpop.f32.mrb[24].mxu0 }
 0xa35   : > { %v2358_v47 = vadd.f32 %v2357_v5, %v2236_v3  ;;  %v2359_v7 = vpop.f32.mrb[25].mxu0 }
 0xa36   : > { %v2360_v8 = vadd.f32 %v2359_v7, %v2240_v4  ;;  %v2361_v9 = vpop.f32.mrb[26].mxu0 }
 0xa37   : > { %v2365_v10 = vpack.c.bf16 %v2358_v47, %v2358_v47  ;;  %v2362_v11 = vpop.f32.mrb[27].mxu0 }
 0xa38   : > { %v5252_v18 = vpack.c.bf16 %v2360_v8, %v2360_v8 }
 0xa39   : > { %v2371_v12 = vsel %vm1350_vm1, %v2365_v10, 0 }
 0xa3a   : > { %4285 = vmatpush3.bf16.xpose.msra.mxu1 %v2371_v12  ;;  %v2443_v23 = vsel %vm2441_vm6, %v5252_v18, 0 }
 0xa3b   : > { %4290 = vmatprep.subr.bf16.mxu1 %v4710_v6 }
 0xac6   : > { %v2207_v14 = vpop.f32.mrb[20].mxu1 }
 0xac7   : > { %v4282_v15 = vpop.f32.mrb[21].mxu1  ;;  %v2208_v19 = vadd.f32 %v3981_v13, %v2207_v14 }
 0xac8   : > { %v2210_v16 = vpop.f32.mrb[22].mxu1 }
 0xac9   : > { %v2211_v20 = vadd.f32 %v3981_v13, %v2210_v16  ;;  %v4283_v21 = vpop.f32.mrb[23].mxu1 }
 0xacb   : > { %v2364_v22 = vpack.c.bf16 %v2211_v20, %v2208_v19 }
 0xacd   : > { %4287 = vmatmul.mubr.msk.bf16.vlgmr.msra.gmra.mrb[24].mxu1 %vm1350_vm1, %v2364_v22 }
 0xace   : > { %4291 = vmatpush3.bf16.msra.mxu1 %v2443_v23  ;;  %4292 = vmatprep.mubr.msk.bf16.mxu1 %vm4712_vm0, %v4710_v6 }
 0xacf   : > { %4296 = vmatprep.subr.bf16.mxu1 %v4710_v6 }
 0xba0   : > { %v2407_v24 = vpop.f32.mrb[24].mxu1 }
 0xba1   : > { %v4288_v25 = vpop.f32.mrb[25].mxu1  ;;  %v2415_v26 = vsel %vm2414_vm7, %v2407_v24, -inf }
 0xba2   : > { %2416 = vmax.xlane.f32.xlu1 %v2415_v26  ;;  %v2410_v27 = vpop.f32.mrb[26].mxu1 }
 0xba3   : > { %v4289_v28 = vpop.f32.mrb[27].mxu1  ;;  %v2418_v29 = vsel %vm2414_vm7, %v2410_v27, -inf }
 0xba4   : > { %2419 = vmax.xlane.f32.xlu0 %v2418_v29 }
 0xc2f   : > { %v2417_v30 = vpop.xlane.xlu1 %2416 }
 0xc30   : > { %v2421_v31 = vsub.f32 %v2407_v24, %v2417_v30 }
 0xc31   : > { %v2420_v33 = vpop.xlane.xlu0 %2419 }
 0xc32   : > { %v2423_v34 = vmul.f32 1.442695, %v2421_v31  ;;  %v2422_v35 = vsub.f32 %v2410_v27, %v2420_v33 }
 0xc34   : > { %4602 = vpow2.f32 %v2423_v34  ;;  %v2425_v36 = vmul.f32 1.442695, %v2422_v35 }
 0xc36   : > { %4604 = vpow2.f32 %v2425_v36 }
 0xc3e   : > { %v4603_v37 = vpop.eup %4602 }
 0xc3f   : > { %v2427_v38 = vsel %vm2414_vm7, %v4603_v37, 0.0 }
 0xc40   : > { %v4605_v39 = vpop.eup %4604  ;;  %2428 = vadd.xlane.f32.xlu1 %v2427_v38 }
 0xc41   : > { %v2430_v40 = vsel %vm2414_vm7, %v4605_v39, 0.0 }
 0xc42   : > { %2431 = vadd.xlane.f32.xlu0 %v2430_v40 }
 0xc51   : > { %2492 = vrot.lane.b32.xlu1 %v2365_v10, %s4713_s25 }
 0xc55   : > { %2626 = vrot.lane.b32.xlu1 %v2365_v10, %s4714_s26 }
 0xc58   : > { %2489 = vrot.lane.b32.xlu0 %v2364_v22, %s4713_s25 }
 0xc59   : > { %2624 = vrot.lane.b32.xlu1 %v2364_v22, %s4714_s26 }
 0xc5c   : > { %2757 = vrot.lane.b32.xlu0 %v2364_v22, %s4715_s0 }
 0xc5d   : > { %2759 = vrot.lane.b32.xlu1 %v2365_v10, %s4715_s0 }
 0xccd   : > { %v2429_v41 = vpop.xlane.xlu1 %2428 }
 0xcce   : > { %4606 = vrcp.f32 %v2429_v41 }
 0xccf   : > { %v2432_v42 = vpop.xlane.xlu0 %2431 }
 0xcd0   : > { %4608 = vrcp.f32 %v2432_v42 }
 0xcd1   : > { %v2493_v43 = vpop.permute.xlu1 %2492 }
 0xcd2   : > { %v2498_v62 = vsel %vm1350_vm1, %v2493_v43, 0 }
 0xcd3   : > { %v2490_v1 = vpop.permute.xlu0 %2489 }
 0xcd5   : > { %v2627_v48 = vpop.permute.xlu1 %2626 }
 0xcd6   : > { %v2632_v52 = vsel %vm1350_vm1, %v2627_v48, 0 }
 0xcd7   : > { %4309 = vmatpush3.bf16.xpose.msra.mxu0 %v2632_v52  ;;  %v2758_v3 = vpop.permute.xlu0 %2757 }
 0xcd8   : > { %v4607_v53 = vpop.eup %4606  ;;  %4320 = vmatprep.subr.bf16.mxu0 %v4710_v6 }
 0xcd9   : > { %v2625_v54 = vpop.permute.xlu1 %2624  ;;  %v2435_v56 = vmul.f32 %v4607_v53, %v4603_v37 }
 0xcda   : > { %v4609_v57 = vpop.eup %4608 }
 0xcdb   : > { %v2436_v58 = vmul.f32 %v4609_v57, %v4605_v39 }
 0xcdd   : > { %v2760_v59 = vpop.permute.xlu1 %2759  ;;  %v2437_v61 = vpack.c.bf16 %v2436_v58, %v2435_v56 }
 0xcde   : > { %v2765_v17 = vsel %vm1350_vm1, %v2760_v59, 0  ;;  %4311 = vmatmul.mubr.msk.bf16.vlgmr.msra.gmra.mrb[28].mxu0 %vm1350_vm1, %v2625_v54 }
 0xcdf   : > { %4293 = vmatmul.mubr.msk.bf16.vlgmr.msra.gmra.mrb[28].mxu1 %vm2414_vm7, %v2437_v61  ;;  %4321 = vmatpush3.bf16.xpose.msra.mxu0 %v2765_v17 }
 0xce0   : > { %4297 = vmatpush3.bf16.xpose.msra.mxu1 %v2498_v62  ;;  %4322 = vmatprep.mubr.msk.bf16.mxu0 %vm4712_vm0, %v4710_v6 }
 0xce1   : > { %4298 = vmatprep.mubr.msk.bf16.mxu1 %vm4712_vm0, %v4710_v6  ;;  %4302 = vmatprep.subr.bf16.mxu1 %v4710_v6 }
 0xce2   : > { %4332 = vmatprep.subr.bf16.mxu0 %v4710_v6 }
 0xce6   : > { %4323 = vmatmul.mubr.msk.bf16.vlgmr.msra.gmra.mrb[32].mxu0 %vm1350_vm1, %v2758_v3 }
 0xce7   : > { %4299 = vmatmul.mubr.msk.bf16.vlgmr.msra.gmra.mrb[32].mxu1 %vm1350_vm1, %v2490_v1  ;;  %4348 = vmatprep.mubr.msk.bf16.mxu0 %vm4712_vm0, %v4710_v6 }
 0xce8   : > { %4304 = vmatprep.mubr.msk.bf16.mxu1 %vm4712_vm0, %v4710_v6 }
 0xdb1   : > { %v2668_v4 = vpop.f32.mrb[28].mxu0 }
 0xdb2   : > { %v2479_v5 = vpop.f32.mrb[28].mxu1  ;;  %v4312_v47 = vpop.f32.mrb[29].mxu0  ;;  %v2675_v25 = vsel %vm2414_vm7, %v2668_v4, -inf }
 0xdb3   : > { %2486 = vst.msk [vmem:[#allocation2] sm:$0xff] %vm1350_vm1, %v2479_v5  ;;  %v4294_v7 = vpop.f32.mrb[29].mxu1  ;;  %v2671_v8 = vpop.f32.mrb[30].mxu0 }
 0xdb4   : > { %v2482_v9 = vpop.f32.mrb[30].mxu1  ;;  %v4313_v10 = vpop.f32.mrb[31].mxu0  ;;  %v2678_v26 = vsel %vm2414_vm7, %v2671_v8, -inf }
 0xdb5   : > { %2487 = vst.msk [vmem:[#allocation2 + $0x8] sm:$0xff] %vm1350_vm1, %v2482_v9  ;;  %v4295_v11 = vpop.f32.mrb[31].mxu1 }
 0xdb9   : > { %v2801_v12 = vpop.f32.mrb[32].mxu0 }
 0xdba   : > { %v2534_v13 = vpop.f32.mrb[32].mxu1  ;;  %v4324_v14 = vpop.f32.mrb[33].mxu0  ;;  %v2808_v24 = vsel %vm2414_vm7, %v2801_v12, -inf }
 0xdbb   : > { %v4300_v15 = vpop.f32.mrb[33].mxu1  ;;  %v2804_v16 = vpop.f32.mrb[34].mxu0  ;;  %v2541_v19 = vsel %vm2414_vm7, %v2534_v13, -inf }
 0xdbc   : > { %v4325_v20 = vpop.f32.mrb[35].mxu0  ;;  %2542 = vmax.xlane.f32.xlu1 %v2541_v19  ;;  %v2537_v21 = vpop.f32.mrb[34].mxu1  ;;  %v2811_v27 = vsel %vm2414_vm7, %v2804_v16, -inf }
 0xdbd   : > { %v4301_v22 = vpop.f32.mrb[35].mxu1  ;;  %v2544_v23 = vsel %vm2414_vm7, %v2537_v21, -inf }
 0xdbe   : > { %2545 = vmax.xlane.f32.xlu0 %v2544_v23 }
 0xdc0   : > { %2809 = vmax.xlane.f32.xlu1 %v2808_v24 }
 0xdc2   : > { %2676 = vmax.xlane.f32.xlu0 %v2675_v25 }
 0xdc6   : > { %2679 = vmax.xlane.f32.xlu0 %v2678_v26 }
 0xdca   : > { %2812 = vmax.xlane.f32.xlu0 %v2811_v27 }
 0xe49   : > { %v2543_v28 = vpop.xlane.xlu1 %2542 }
 0xe4a   : > { %v2547_v35 = vsub.f32 %v2534_v13, %v2543_v28 }
 0xe4b   : > { %v2546_v29 = vpop.xlane.xlu0 %2545 }
 0xe4c   : > { %v2548_v36 = vsub.f32 %v2537_v21, %v2546_v29  ;;  %v2549_v41 = vmul.f32 1.442695, %v2547_v35 }
 0xe4d   : > { %v2810_v30 = vpop.xlane.xlu1 %2809 }
 0xe4e   : > { %v2814_v31 = vsub.f32 %v2801_v12, %v2810_v30  ;;  %v2551_v42 = vmul.f32 1.442695, %v2548_v36 }
 0xe4f   : > { %v2677_v33 = vpop.xlane.xlu0 %2676 }
 0xe50   : > { %v2681_v34 = vsub.f32 %v2668_v4, %v2677_v33  ;;  %v2816_v37 = vmul.f32 1.442695, %v2814_v31 }
 0xe52   : > { %v2683_v38 = vmul.f32 1.442695, %v2681_v34 }
 0xe53   : > { %v2680_v39 = vpop.xlane.xlu0 %2679 }
 0xe54   : > { %4610 = vpow2.f32 %v2683_v38  ;;  %v2682_v40 = vsub.f32 %v2671_v8, %v2680_v39 }
 0xe55   : > { %4612 = vpow2.f32 %v2816_v37 }
 0xe56   : > { %v2685_v43 = vmul.f32 1.442695, %v2682_v40 }
 0xe57   : > { %v2813_v48 = vpop.xlane.xlu0 %2812 }
 0xe58   : > { %4614 = vpow2.f32 %v2685_v43  ;;  %v2815_v52 = vsub.f32 %v2804_v16, %v2813_v48 }
 0xe59   : > { %4616 = vpow2.f32 %v2549_v41 }
 0xe5a   : > { %4618 = vpow2.f32 %v2551_v42  ;;  %v2818_v53 = vmul.f32 1.442695, %v2815_v52 }
 0xe5c   : > { %4620 = vpow2.f32 %v2818_v53 }
 0xe5e   : > { %v4611_v54 = vpop.eup %4610 }
 0xe5f   : > { %v2687_v57 = vsel %vm2414_vm7, %v4611_v54, 0.0  ;;  %v4613_v56 = vpop.eup %4612 }
 0xe60   : > { %2688 = vadd.xlane.f32.xlu1 %v2687_v57  ;;  %v2820_v61 = vsel %vm2414_vm7, %v4613_v56, 0.0 }
 0xe62   : > { %v4615_v58 = vpop.eup %4614 }
 0xe63   : > { %v4617_v59 = vpop.eup %4616  ;;  %v2690_v17 = vsel %vm2414_vm7, %v4615_v58, 0.0 }
 0xe64   : > { %v4619_v62 = vpop.eup %4618  ;;  %2821 = vadd.xlane.f32.xlu1 %v2820_v61  ;;  %2691 = vadd.xlane.f32.xlu0 %v2690_v17  ;;  %v2553_v1 = vsel %vm2414_vm7, %v4617_v59, 0.0 }
 0xe65   : > { %v2556_v3 = vsel %vm2414_vm7, %v4619_v62, 0.0 }
 0xe66   : > { %v4621_v4 = vpop.eup %4620 }
 0xe67   : > { %v2823_v5 = vsel %vm2414_vm7, %v4621_v4, 0.0 }
 0xe68   : > { %2554 = vadd.xlane.f32.xlu1 %v2553_v1  ;;  %2557 = vadd.xlane.f32.xlu0 %v2556_v3 }
 0xe6c   : > { %2824 = vadd.xlane.f32.xlu0 %v2823_v5 }
 0xe79   : > { %2565 = vrot.lane.b32.xlu1 %v5252_v18, %s4713_s25 }
 0xe7d   : > { %2831 = vrot.lane.b32.xlu1 %v5252_v18, %s4715_s0 }
 0xe82   : > { %2698 = vrot.lane.b32.xlu0 %v5252_v18, %s4714_s26 }
 0xeed   : > { %v2689_v47 = vpop.xlane.xlu1 %2688 }
 0xef1   : > { %v2822_v7 = vpop.xlane.xlu1 %2821  ;;  %v2692_v8 = vpop.xlane.xlu0 %2691 }
 0xef5   : > { %v2555_v9 = vpop.xlane.xlu1 %2554  ;;  %v2558_v10 = vpop.xlane.xlu0 %2557 }
 0xef6   : > { %4622 = vrcp.f32 %v2555_v9 }
 0xef7   : > { %4624 = vrcp.f32 %v2558_v10 }
 0xef8   : > { %4626 = vrcp.f32 %v2692_v8 }
 0xef9   : > { %v2566_v11 = vpop.permute.xlu1 %2565  ;;  %4628 = vrcp.f32 %v2689_v47  ;;  %v2825_v13 = vpop.xlane.xlu0 %2824 }
 0xefa   : > { %v2571_v12 = vsel %vm2441_vm6, %v2566_v11, 0  ;;  %4630 = vrcp.f32 %v2825_v13 }
 0xefb   : > { %4303 = vmatpush3.bf16.msra.mxu1 %v2571_v12  ;;  %4632 = vrcp.f32 %v2822_v7 }
 0xefc   : > { %4314 = vmatprep.subr.bf16.mxu1 %v4710_v6 }
 0xefd   : > { %v2699_v19 = vpop.permute.xlu0 %2698  ;;  %v2832_v26 = vpop.permute.xlu1 %2831 }
 0xefe   : > { %v2704_v22 = vsel %vm2441_vm6, %v2699_v19, 0  ;;  %v2837_v29 = vsel %vm2441_vm6, %v2832_v26, 0 }
 0xf00   : > { %v4623_v14 = vpop.eup %4622 }
 0xf01   : > { %v4625_v15 = vpop.eup %4624  ;;  %v2561_v16 = vmul.f32 %v4623_v14, %v4617_v59 }
 0xf02   : > { %v2562_v18 = vmul.f32 %v4625_v15, %v4619_v62  ;;  %v4627_v21 = vpop.eup %4626 }
 0xf03   : > { %v4629_v23 = vpop.eup %4628  ;;  %v2696_v24 = vmul.f32 %v4627_v21, %v4615_v58 }
 0xf04   : > { %v2563_v20 = vpack.c.bf16 %v2562_v18, %v2561_v16  ;;  %v2695_v25 = vmul.f32 %v4629_v23, %v4611_v54  ;;  %v4631_v28 = vpop.eup %4630 }
 0xf05   : > { %v4633_v30 = vpop.eup %4632  ;;  %v2829_v31 = vmul.f32 %v4631_v28, %v4621_v4 }
 0xf06   : > { %4305 = vmatmul.mubr.msk.bf16.vlgmr.msra.gmra.mrb[36].mxu1 %vm2414_vm7, %v2563_v20  ;;  %v2697_v27 = vpack.c.bf16 %v2696_v24, %v2695_v25  ;;  %v2828_v33 = vmul.f32 %v4633_v30, %v4613_v56 }
 0xf07   : > { %4315 = vmatpush3.bf16.msra.mxu1 %v2704_v22  ;;  %4316 = vmatprep.mubr.msk.bf16.mxu1 %vm4712_vm0, %v4710_v6 }
 0xf08   : > { %4326 = vmatprep.subr.bf16.mxu1 %v4710_v6  ;;  %v2830_v34 = vpack.c.bf16 %v2829_v31, %v2828_v33 }
 0xf0e   : > { %4317 = vmatmul.mubr.msk.bf16.vlgmr.msra.gmra.mrb[40].mxu1 %vm2414_vm7, %v2697_v27 }
 0xf0f   : > { %4327 = vmatpush3.bf16.msra.mxu1 %v2837_v29  ;;  %4328 = vmatprep.mubr.msk.bf16.mxu1 %vm4712_vm0, %v4710_v6 }
 0xf16   : > { %4329 = vmatmul.mubr.msk.bf16.vlgmr.msra.gmra.mrb[44].mxu1 %vm2414_vm7, %v2830_v34 }
 0xf17   : > { %3241 = vmatprep.mubr.bf16.mxu1 %v4711_v32 }
 0xfd9   : > { %v2607_v35 = vpop.f32.mrb[36].mxu1 }
 0xfda   : > { %2616 = vrot.lane.b32.xlu1 %v2607_v35, %s4715_s0  ;;  %v4306_v36 = vpop.f32.mrb[37].mxu1 }
 0xfdb   : > { %v2610_v37 = vpop.f32.mrb[38].mxu1 }
 0xfdc   : > { %v4307_v38 = vpop.f32.mrb[39].mxu1 }
 0xfdd   : > { %v2939_v38 = vsub.s32 7, %v5025_v45 }
 0xfde   : > { %2618 = vrot.lane.b32.xlu1 %v2610_v37, %s4715_s0  ;;  %v2933_v37 = vsub.s32 6, %v5025_v45 }
 0xfe1   : > { %v2740_v39 = vpop.f32.mrb[40].mxu1 }
 0xfe2   : > { %2749 = vrot.lane.b32.xlu0 %v2740_v39, %s4714_s26  ;;  %v4318_v40 = vpop.f32.mrb[41].mxu1  ;;  %v4668_v39 = vld [vmem:[%s5562_s15] sm:$0xff] }
 0xfe3   : > { %v2743_v41 = vpop.f32.mrb[42].mxu1  ;;  %v2934_v40 = vrot.slane %v4668_v39, %v2933_v37  ;;  %v4535_v37 = vld [vmem:[%s4958_s10 + $0x28] sm:$0xff]  }
 0xfe4   : > { %2751 = vrot.lane.b32.xlu1 %v2743_v41, %s4714_s26  ;;  %v4319_v42 = vpop.f32.mrb[43].mxu1  ;;  %s5571_s26 = sld [smem:[#allocation14_spill]] }
 0xfe9   : > { %v2873_v43 = vpop.f32.mrb[44].mxu1 }
 0xfea   : > { %2882 = vrot.lane.b32.xlu0 %v2873_v43, %s4713_s25  ;;  %v4330_v32 = vpop.f32.mrb[45].mxu1  ;;  %v4492_v9 = vld [vmem:[%s5571_s26] sm:$0xff]   ;;  %v4493_v10 = vld [vmem:[%s5571_s26 + $0x8] sm:$0xff]   ;;  %v4494_v11 = vld [vmem:[%s5571_s26 + $0x10] sm:$0xff]   ;;  %v2940_v43 = vrot.slane %v4668_v39, %v2939_v38 }
 0xfeb   : > { %v2876_v48 = vpop.f32.mrb[46].mxu1  ;;  %4333 = vmatpush3.bf16.msra.mxu0 %v4492_v9  ;;  %v4495_v12 = vld [vmem:[%s5571_s26 + $0x18] sm:$0xff]   ;;  %v4496_v13 = vld [vmem:[%s5571_s26 + $0x20] sm:$0xff]   ;;  %v4497_v14 = vld [vmem:[%s5571_s26 + $0x28] sm:$0xff]   ;;  %v2946_v32 = vrot.slane %v5161_v2, %v5047_v60 }
 0xfec   : > { %2884 = vrot.lane.b32.xlu1 %v2876_v48, %s4713_s25  ;;  %v4331_v52 = vpop.f32.mrb[47].mxu1  ;;  %4334 = vmatprep.subr.bf16.mxu0 %v4710_v6  ;;  %s5572_s25 = sld [smem:[#allocation15_spill]]  ;;  %v4498_v15 = vld [vmem:[%s5571_s26 + $0x30] sm:$0xff]   ;;  %v4499_v16 = vld [vmem:[%s5571_s26 + $0x38] sm:$0xff]  }
 0xfed   : > { %v4536_v38 = vld [vmem:[%s4958_s10 + $0x70] sm:$0xff]  }
 0xfee   : > { %v4537_v39 = vld [vmem:[%s4958_s10 + $0x30] sm:$0xff]  }
 0xfef   : > { %4335 = vmatpush3.bf16.msra.mxu0 %v4493_v10 }
 0xff0   : > { %4336 = vmatprep.subr.bf16.mxu0 %v4710_v6 }
 0xff2   : > { %v4500_v18 = vld [vmem:[%s5572_s25] ss:$8 sps:$4 sm:$0xff]   ;;  %v4502_v19 = vld [vmem:[%s5572_s25 + $0x4] ss:$8 sps:$4 sm:$0xff]   ;;  %v4505_v20 = vld [vmem:[%s5572_s25 + $0x14] ss:$8 sps:$4 sm:$0xff]  }
 0xff3   : > { %4337 = vmatpush3.bf16.msra.mxu0 %v4494_v11  ;;  %3209 = vmatprep.subr.bf16.mxu1 %v4502_v19  ;;  %v4503_v21 = vld [vmem:[%s5572_s25 + $0x10] ss:$8 sps:$4 sm:$0xff]   ;;  %v4508_v22 = vld [vmem:[%s5572_s25 + $0x24] ss:$8 sps:$4 sm:$0xff]   ;;  %v4506_v23 = vld [vmem:[%s5572_s25 + $0x20] ss:$8 sps:$4 sm:$0xff]  }
 0xff4   : > { %4338 = vmatprep.subr.bf16.mxu0 %v4710_v6  ;;  %3210 = vmatpush1.bf16.msra.mxu1 %v4500_v18  ;;  %v4511_v24 = vld [vmem:[%s5572_s25 + $0x34] ss:$8 sps:$4 sm:$0xff]   ;;  %v4509_v25 = vld [vmem:[%s5572_s25 + $0x30] ss:$8 sps:$4 sm:$0xff]   ;;  %v4514_v26 = vld [vmem:[%s5572_s25 + $0x44] ss:$8 sps:$4 sm:$0xff]  }
 0xff5   : > { %3211 = vmatprep.subr.bf16.mxu1 %v4505_v20  ;;  %v4512_v27 = vld [vmem:[%s5572_s25 + $0x40] ss:$8 sps:$4 sm:$0xff]   ;;  %v4517_v28 = vld [vmem:[%s5572_s25 + $0x54] ss:$8 sps:$4 sm:$0xff]   ;;  %v4515_v29 = vld [vmem:[%s5572_s25 + $0x50] ss:$8 sps:$4 sm:$0xff]  }
 0xff7   : > { %4339 = vmatpush3.bf16.msra.mxu0 %v4495_v12  ;;  %v4520_v12 = vld [vmem:[%s5572_s25 + $0x64] ss:$8 sps:$4 sm:$0xff]  }
 0xff8   : > { %4340 = vmatprep.subr.bf16.mxu0 %v4710_v6  ;;  %3212 = vmatpush1.bf16.msra.mxu1 %v4503_v21 }
 0xff9   : > { %3213 = vmatprep.subr.bf16.mxu1 %v4508_v22 }
 0xffb   : > { %4341 = vmatpush3.bf16.msra.mxu0 %v4496_v13  ;;  %v4518_v13 = vld [vmem:[%s5572_s25 + $0x60] ss:$8 sps:$4 sm:$0xff]  }
 0xffc   : > { %4342 = vmatprep.subr.bf16.mxu0 %v4710_v6  ;;  %3214 = vmatpush1.bf16.msra.mxu1 %v4506_v23 }
 0xffd   : > { %3215 = vmatprep.subr.bf16.mxu1 %v4511_v24 }
 0xfff   : > { %4343 = vmatpush3.bf16.msra.mxu0 %v4497_v14  ;;  %v4523_v14 = vld [vmem:[%s5572_s25 + $0x74] ss:$8 sps:$4 sm:$0xff]  }
0x1000   : > { %4344 = vmatprep.subr.bf16.mxu0 %v4710_v6  ;;  %3216 = vmatpush1.bf16.msra.mxu1 %v4509_v25 }
0x1001   : > { %3217 = vmatprep.subr.bf16.mxu1 %v4514_v26 }
0x1003   : > { %4345 = vmatpush3.bf16.msra.mxu0 %v4498_v15  ;;  %v4521_v15 = vld [vmem:[%s5572_s25 + $0x70] ss:$8 sps:$4 sm:$0xff]  }
0x1004   : > { %4346 = vmatprep.subr.bf16.mxu0 %v4710_v6  ;;  %3218 = vmatpush1.bf16.msra.mxu1 %v4512_v27  ;;  %v4524_v27 = vld [vmem:[%s4958_s10 + $0x40] sm:$0xff]  }
0x1005   : > { %3219 = vmatprep.subr.bf16.mxu1 %v4517_v28  ;;  %v4525_v28 = vld [vmem:[%s4958_s10] sm:$0xff]  }
0x1007   : > { %4347 = vmatpush3.bf16.msra.mxu0 %v4499_v16  ;;  %v4014_v16 = vld [vmem:[%s5574_s5] ss:$0 sm:$0xff] }
0x1008   : > { %3220 = vmatpush1.bf16.msra.mxu1 %v4515_v29  ;;  %4145 = vmatprep.subr.bf16.mxu0 %v4524_v27  ;;  %v4527_v29 = vld [vmem:[%s4958_s10 + $0x8] sm:$0xff]  }
0x1009   : > { %3221 = vmatprep.subr.bf16.mxu1 %v4520_v12 }
0x100c   : > { %3222 = vmatpush1.bf16.msra.mxu1 %v4518_v13 }
0x100d   : > { %3223 = vmatprep.subr.bf16.mxu1 %v4523_v14 }
0x1010   : > { %3224 = vmatpush1.bf16.msra.mxu1 %v4521_v15 }
0x1011   : > { %4352 = vmatprep.subr.bf16.mxu1 %v4710_v6 }
0x104c   : > { %v2617_v53 = vpop.permute.xlu1 %2616 }
0x104d   : > { %2622 = vst.msk [vmem:[#allocation2] sm:$0xff] %vm1600_vm3, %v2617_v53 }
0x1050   : > { %v2619_v54 = vpop.permute.xlu1 %2618 }
0x1051   : > { %2623 = vst.msk [vmem:[#allocation2 + $0x8] sm:$0xff] %vm1600_vm3, %v2619_v54 }
0x1054   : > { %v2750_v57 = vpop.permute.xlu0 %2749 }
0x1055   : > { %2755 = vst.msk [vmem:[#allocation2] sm:$0xff] %vm1732_vm4, %v2750_v57  ;;  %v2952_v57 = vrot.slane %v5155_v63, %v1916_v0 }
0x1056   : > { %v2752_v56 = vpop.permute.xlu1 %2751 }
0x1057   : > { %2756 = vst.msk [vmem:[#allocation2 + $0x8] sm:$0xff] %vm1732_vm4, %v2752_v56 }
0x105c   : > { %v2883_v58 = vpop.permute.xlu0 %2882 }
0x105d   : > { %2888 = vst.msk [vmem:[#allocation2] sm:$0xff] %vm1864_vm5, %v2883_v58 }
0x105e   : > { %v2885_v59 = vpop.permute.xlu1 %2884 }
0x105f   : > { %2889 = vst.msk [vmem:[#allocation2 + $0x8] sm:$0xff] %vm1864_vm5, %v2885_v59 }
0x1064   : > { %v2890_v61 = vld [vmem:[#allocation2] sm:$0xff] }
0x1065   : > { %2909 = vadd.xlane.f32.xlu0 %v2890_v61 }
0x1066   : > { %v2891_v17 = vld [vmem:[#allocation2 + $0x8] sm:$0xff] }
0x1067   : > { %2911 = vadd.xlane.f32.xlu1 %v2891_v17 }
0x10f2   : > { %v2910_v62 = vpop.xlane.xlu0 %2909 }
0x10f3   : > { %v2913_v1 = vmul.f32 0.0078125, %v2910_v62 }
0x10f4   : > { %v2912_v3 = vpop.xlane.xlu1 %2911 }
0x10f5   : > { %v5333_v4 = vsub.f32 %v2890_v61, %v2913_v1  ;;  %v2914_v5 = vmul.f32 0.0078125, %v2912_v3 }
0x10f7   : > { %v5335_v47 = vsub.f32 %v2891_v17, %v2914_v5  ;;  %v2917_v7 = vmul.f32 %v5333_v4, %v5333_v4 }
0x10f9   : > { %2919 = vadd.xlane.f32.xlu0 %v2917_v7  ;;  %v2918_v8 = vmul.f32 %v5335_v47, %v5335_v47 }
0x10fd   : > { %2921 = vadd.xlane.f32.xlu0 %v2918_v8 }
0x1186   : > { %v2920_v30 = vpop.xlane.xlu0 %2919 }
0x1187   : > { %v2923_v31 = vmul.f32 0.0078125, %v2920_v30  ;;  %v4529_v30 = vld [vmem:[%s4958_s10 + $0x10] sm:$0xff]  }
0x1189   : > { %v2925_v33 = vadd.f32 1e-05, %v2923_v31  ;;  %v4530_v31 = vld [vmem:[%s4958_s10 + $0x58] sm:$0xff]  }
0x118a   : > { %v2922_v34 = vpop.xlane.xlu0 %2921 }
0x118b   : > { %4634 = vrsqrt.f32 %v2925_v33  ;;  %v2924_v35 = vmul.f32 0.0078125, %v2922_v34  ;;  %v4531_v33 = vld [vmem:[%s4958_s10 + $0x18] sm:$0xff]   ;;  %v4532_v34 = vld [vmem:[%s4958_s10 + $0x60] sm:$0xff]  }
0x118d   : > { %v2926_v36 = vadd.f32 1e-05, %v2924_v35  ;;  %v4533_v35 = vld [vmem:[%s4958_s10 + $0x20] sm:$0xff]  }
0x118f   : > { %4636 = vrsqrt.f32 %v2926_v36  ;;  %v4534_v36 = vld [vmem:[%s4958_s10 + $0x68] sm:$0xff]  }
0x1195   : > { %v4635_v41 = vpop.eup %4634 }
0x1196   : > { %v2929_v42 = vmul.f32 %v4635_v41, %v5333_v4  ;;  %v4539_v41 = vld [vmem:[%s4958_s10 + $0x38] sm:$0xff]  }
0x1198   : > { %v2935_v48 = vmul.f32 %v2934_v40, %v2929_v42  ;;  %v3083_v42 = vld [vmem:[%s1013_s27] sm:$0x3] }
0x1199   : > { %v4637_v52 = vpop.eup %4636 }
0x119a   : > { %v2930_v53 = vmul.f32 %v4637_v52, %v5335_v47  ;;  %v2941_v54 = vadd.f32 %v2940_v43, %v2935_v48 }
0x119c   : > { %v2936_v56 = vmul.f32 %v2934_v40, %v2930_v53  ;;  %v2947_v58 = vmul.f32 %v2946_v32, %v2941_v54  ;;  %v4538_v40 = vld [vmem:[%s4958_s10 + $0x78] sm:$0xff]  }
0x119e   : > { %v2942_v59 = vadd.f32 %v2940_v43, %v2936_v56  ;;  %v2953_v61 = vadd.f32 %v2952_v57, %v2947_v58  ;;  %v3122_v43 = vrot.slane %v3083_v42, %v5028_v46 }
0x11a0   : > { %v2948_v17 = vmul.f32 %v2946_v32, %v2942_v59  ;;  %v2955_v62 = vsub.f32 0.0, %v2953_v61  ;;  %v3126_v32 = vrot.slane %v3083_v42, %v5037_v51 }
0x11a2   : > { %v2954_v1 = vadd.f32 %v2952_v57, %v2948_v17  ;;  %v2957_v3 = vmul.f32 1.442695, %v2955_v62 }
0x11a4   : > { %v2956_v4 = vsub.f32 0.0, %v2954_v1  ;;  %4638 = vpow2.f32 %v2957_v3 }
0x11a6   : > { %v2959_v60 = vmul.f32 1.442695, %v2956_v4 }
0x11a8   : > { %4640 = vpow2.f32 %v2959_v60 }
0x11ae   : > { %v4639_v5 = vpop.eup %4638 }
0x11af   : > { %v2961_v47 = vadd.f32 1.0, %v4639_v5 }
0x11b1   : > { %4642 = vrcp.f32 %v2961_v47 }
0x11b2   : > { %v4641_v7 = vpop.eup %4640 }
0x11b3   : > { %v2962_v63 = vadd.f32 1.0, %v4641_v7 }
0x11b5   : > { %4644 = vrcp.f32 %v2962_v63 }
0x11bb   : > { %v4643_v0 = vpop.eup %4642 }
0x11bc   : > { %v2967_v9 = vmul.f32 %v4643_v0, %v2953_v61 }
0x11bf   : > { %v4645_v8 = vpop.eup %4644 }
0x11c0   : > { %v2968_v10 = vmul.f32 %v4645_v8, %v2954_v1 }
0x11c2   : > { %v2969_v11 = vpack.c.bf16 %v2968_v10, %v2967_v9 }
0x11c4   : > { %4349 = vmatmul.mubr.bf16.vlgmr.msra.gmra.mrb[36].mxu0 %v2969_v11 }
0x11c5   : > { %4146 = vmatpush3.bf16.msra.mxu0 %v4525_v28 }
0x1297   : > { %v3058_v18 = vpop.f32.mrb[36].mxu0 }
0x1298   : > { %v3059_v19 = vadd.f32 %v4014_v16, %v3058_v18  ;;  %v4350_v20 = vpop.f32.mrb[37].mxu0 }
0x1299   : > { %v3061_v21 = vpop.f32.mrb[38].mxu0 }
0x129a   : > { %v3062_v22 = vadd.f32 %v4014_v16, %v3061_v21  ;;  %v4351_v23 = vpop.f32.mrb[39].mxu0  ;;  %v5389_v24 = vadd.f32 %v3059_v19, %v5181_v50  ;;  %v4526_v50 = vld [vmem:[%s4958_s10 + $0x48] sm:$0xff]  }
0x129b   : > { %4147 = vmatprep.subr.bf16.mxu0 %v4526_v50 }
0x129c   : > { %v5392_v25 = vadd.f32 %v3062_v22, %v5184_v55  ;;  %4148 = vmatpush3.bf16.msra.mxu0 %v4527_v29  ;;  %v4528_v55 = vld [vmem:[%s4958_s10 + $0x50] sm:$0xff]  }
0x129d   : > { %4149 = vmatprep.subr.bf16.mxu0 %v4528_v55 }
0x129e   : > { %v3117_v26 = vpack.c.bf16 %v5392_v25, %v5389_v24 }
0x12a0   : > { %3242 = vmatmul.mubr.bf16.vlgmr.msra.gmra.mrb[48].mxu1 %v3117_v26  ;;  %4150 = vmatpush3.bf16.msra.mxu0 %v4529_v30 }
0x12a1   : > { %4368 = vmatprep.mubr.msk.bf16.mxu1 %vm4712_vm0, %v4710_v6  ;;  %4151 = vmatprep.subr.bf16.mxu0 %v4530_v31 }
0x12a4   : > { %4152 = vmatpush3.bf16.msra.mxu0 %v4531_v33 }
0x12a5   : > { %4153 = vmatprep.subr.bf16.mxu0 %v4532_v34 }
0x12a8   : > { %4154 = vmatpush3.bf16.msra.mxu0 %v4533_v35 }
0x12a9   : > { %4155 = vmatprep.subr.bf16.mxu0 %v4534_v36 }
0x12ac   : > { %4156 = vmatpush3.bf16.msra.mxu0 %v4535_v37  ;;  %v4039_v37 = vld [vmem:[%s1021_s17] ss:$0 sm:$0xff] }
0x12ad   : > { %4157 = vmatprep.subr.bf16.mxu0 %v4536_v38 }
0x12b0   : > { %4158 = vmatpush3.bf16.msra.mxu0 %v4537_v39 }
0x12b1   : > { %4159 = vmatprep.subr.bf16.mxu0 %v4538_v40 }
0x12b4   : > { %4160 = vmatpush3.bf16.msra.mxu0 %v4539_v41 }
0x1373   : > { %v3243_v48 = vpop.f32.mrb[48].mxu1 }
0x1374   : > { %v3244_v52 = vadd.f32 %v3243_v48, %v3122_v43  ;;  %v3245_v53 = vpop.f32.mrb[49].mxu1 }
0x1375   : > { %v3246_v54 = vadd.f32 %v3245_v53, %v3126_v32  ;;  %v3247_v57 = vpop.f32.mrb[50].mxu1 }
0x1376   : > { %v3256_v56 = vmul.f32 0.044715, %v3244_v52  ;;  %v3248_v58 = vadd.f32 %v3247_v57, %v3122_v43  ;;  %v3249_v59 = vpop.f32.mrb[51].mxu1  ;;  %v3252_v23 = vmul.f32 0.5, %v3244_v52 }
0x1377   : > { %v3257_v61 = vmul.f32 0.044715, %v3246_v54  ;;  %v3250_v17 = vadd.f32 %v3249_v59, %v3126_v32  ;;  %v3253_v28 = vmul.f32 0.5, %v3246_v54 }
0x1378   : > { %v3260_v62 = vmul.f32 %v3256_v56, %v3244_v52  ;;  %v3258_v1 = vmul.f32 0.044715, %v3248_v58  ;;  %v3254_v26 = vmul.f32 0.5, %v3248_v58 }
0x1379   : > { %v3261_v3 = vmul.f32 %v3257_v61, %v3246_v54  ;;  %v3259_v4 = vmul.f32 0.044715, %v3250_v17  ;;  %v3255_v50 = vmul.f32 0.5, %v3250_v17  ;;  %v4540_v61 = vld [vmem:[%s4967_s14] sm:$0xff]  }
0x137a   : > { %v3264_v60 = vmul.f32 %v3260_v62, %v3244_v52  ;;  %v3262_v5 = vmul.f32 %v3258_v1, %v3248_v58  ;;  %4353 = vmatpush3.bf16.msra.mxu1 %v4540_v61  ;;  %v4542_v62 = vld [vmem:[%s4967_s14 + $0x10] sm:$0xff]   ;;  %v4543_v1 = vld [vmem:[%s4967_s14 + $0x18] sm:$0xff]  }
0x137b   : > { %v3265_v47 = vmul.f32 %v3261_v3, %v3246_v54  ;;  %v3263_v7 = vmul.f32 %v3259_v4, %v3250_v17  ;;  %4354 = vmatprep.subr.bf16.mxu1 %v4710_v6  ;;  %v4544_v3 = vld [vmem:[%s4967_s14 + $0x20] sm:$0xff]   ;;  %v4545_v4 = vld [vmem:[%s4967_s14 + $0x28] sm:$0xff]  }
0x137c   : > { %v3268_v63 = vadd.f32 %v3264_v60, %v3244_v52  ;;  %v3266_v0 = vmul.f32 %v3262_v5, %v3248_v58  ;;  %v4546_v60 = vld [vmem:[%s4967_s14 + $0x30] sm:$0xff]   ;;  %v4547_v5 = vld [vmem:[%s4967_s14 + $0x38] sm:$0xff]  }
0x137d   : > { %v3267_v8 = vmul.f32 %v3263_v7, %v3250_v17  ;;  %v3269_v9 = vadd.f32 %v3265_v47, %v3246_v54 }
0x137e   : > { %v3272_v10 = vmul.f32 0.7978846, %v3268_v63  ;;  %v3270_v11 = vadd.f32 %v3266_v0, %v3248_v58 }
0x137f   : > { %v3271_v12 = vadd.f32 %v3267_v8, %v3250_v17  ;;  %v3273_v13 = vmul.f32 0.7978846, %v3269_v9  ;;  %v4541_v17 = vld [vmem:[%s4967_s14 + $0x8] sm:$0xff]  }
0x1380   : > { %4646 = vtanh.f32 %v3272_v10  ;;  %v3274_v14 = vmul.f32 0.7978846, %v3270_v11  ;;  %4355 = vmatpush3.bf16.msra.mxu1 %v4541_v17  ;;  %v1048_v10 = vld [vmem:[%s5562_s15 + $0x8] sm:$0x3] }
0x1381   : > { %v3275_v15 = vmul.f32 0.7978846, %v3271_v12  ;;  %4648 = vtanh.f32 %v3273_v13  ;;  %4356 = vmatprep.subr.bf16.mxu1 %v4710_v6  ;;  %v3479_v11 = vrot.slane %v1048_v10, %v5028_v46 }
0x1382   : > { %4650 = vtanh.f32 %v3274_v14  ;;  %v3485_v14 = vrot.slane %v1048_v10, %v5037_v51 }
0x1383   : > { %4652 = vtanh.f32 %v3275_v15 }
0x1384   : > { %4357 = vmatpush3.bf16.msra.mxu1 %v4542_v62 }
0x1385   : > { %4358 = vmatprep.subr.bf16.mxu1 %v4710_v6 }
0x1388   : > { %4359 = vmatpush3.bf16.msra.mxu1 %v4543_v1 }
0x1389   : > { %4360 = vmatprep.subr.bf16.mxu1 %v4710_v6 }
0x138a   : > { %v4647_v16 = vpop.eup %4646 }
0x138b   : > { %v4649_v18 = vpop.eup %4648  ;;  %v3280_v19 = vadd.f32 1.0, %v4647_v16 }
0x138c   : > { %v4651_v20 = vpop.eup %4650  ;;  %v3281_v21 = vadd.f32 1.0, %v4649_v18  ;;  %4361 = vmatpush3.bf16.msra.mxu1 %v4544_v3  ;;  %v3491_v18 = vrot.slane %v5161_v2, %v2069_v44 }
0x138d   : > { %v4653_v22 = vpop.eup %4652  ;;  %v3282_v27 = vadd.f32 1.0, %v4651_v20  ;;  %v3284_v55 = vmul.f32 %v3280_v19, %v3252_v23  ;;  %4362 = vmatprep.subr.bf16.mxu1 %v4710_v6 }
0x138e   : > { %v3283_v29 = vadd.f32 1.0, %v4653_v22  ;;  %v3285_v31 = vmul.f32 %v3281_v21, %v3253_v28  ;;  %v4669_v21 = vld [vmem:[%s5564_s20] sm:$0x3f] }
0x138f   : > { %v3286_v30 = vmul.f32 %v3282_v27, %v3254_v26  ;;  %v3497_v22 = vrot.slane %v4669_v21, %v2075_v49 }
0x1390   : > { %v3287_v33 = vmul.f32 %v3283_v29, %v3255_v50  ;;  %4363 = vmatpush3.bf16.msra.mxu1 %v4545_v4 }
0x1391   : > { %v3288_v34 = vpack.c.bf16 %v3286_v30, %v3284_v55  ;;  %4364 = vmatprep.subr.bf16.mxu1 %v4710_v6 }
0x1392   : > { %v3289_v35 = vpack.c.bf16 %v3287_v33, %v3285_v31 }
0x1394   : > { %3424 = vmatprep.mubr.bf16.mxu0 %v3289_v35  ;;  %4365 = vmatpush3.bf16.msra.mxu1 %v4546_v60 }
0x1395   : > { %3425 = vmatmul.mubr.bf16.vlgmr.msra.gmra.mrb[40].mxu0 %v3288_v34  ;;  %4366 = vmatprep.subr.bf16.mxu1 %v4710_v6 }
0x1398   : > { %4367 = vmatpush3.bf16.msra.mxu1 %v4547_v5 }
0x1468   : > { %v4161_v36 = vpop.f32.mrb[40].mxu0 }
0x1469   : > { %v4162_v38 = vpop.f32.mrb[41].mxu0 }
0x146a   : > { %v4163_v39 = vadd.f32 %v4162_v38, %v4161_v36  ;;  %v4164_v40 = vpop.f32.mrb[42].mxu0  ;;  %v4056_v36 = vld [vmem:[%s1029_s9] ss:$0 sm:$0xff] }
0x146b   : > { %v4165_v41 = vpop.f32.mrb[43].mxu0 }
0x146c   : > { %v3427_v42 = vadd.f32 %v4163_v39, %v4039_v37  ;;  %v4166_v43 = vadd.f32 %v4165_v41, %v4164_v40 }
0x146e   : > { %3433 = vst [vmem:[#allocation2] sm:$0xff] %v3427_v42  ;;  %v3430_v32 = vadd.f32 %v4166_v43, %v4039_v37  ;;  %3454 = vadd.xlane.f32.xlu0 %v3427_v42 }
0x1470   : > { %3434 = vst [vmem:[#allocation2 + $0x8] sm:$0xff] %v3430_v32  ;;  %3456 = vadd.xlane.f32.xlu1 %v3430_v32 }
0x14fb   : > { %v3455_v48 = vpop.xlane.xlu0 %3454 }
0x14fc   : > { %v3458_v52 = vmul.f32 0.0078125, %v3455_v48 }
0x14fd   : > { %v3457_v53 = vpop.xlane.xlu1 %3456 }
0x14fe   : > { %v3460_v54 = vsub.f32 %v3427_v42, %v3458_v52  ;;  %v3459_v57 = vmul.f32 0.0078125, %v3457_v53 }
0x1500   : > { %v3461_v56 = vsub.f32 %v3430_v32, %v3459_v57  ;;  %v3462_v58 = vmul.f32 %v3460_v54, %v3460_v54 }
0x1502   : > { %3464 = vadd.xlane.f32.xlu0 %v3462_v58  ;;  %v3463_v59 = vmul.f32 %v3461_v56, %v3461_v56 }
0x1504   : > { %3466 = vadd.xlane.f32.xlu1 %v3463_v59 }
0x158f   : > { %v3465_v47 = vpop.xlane.xlu0 %3464 }
0x1590   : > { %v3468_v7 = vmul.f32 0.0078125, %v3465_v47 }
0x1591   : > { %v3467_v63 = vpop.xlane.xlu1 %3466 }
0x1592   : > { %v3470_v0 = vadd.f32 1e-05, %v3468_v7  ;;  %v3469_v8 = vmul.f32 0.0078125, %v3467_v63 }
0x1594   : > { %4654 = vrsqrt.f32 %v3470_v0  ;;  %v3471_v9 = vadd.f32 1e-05, %v3469_v8 }
0x1596   : > { %4656 = vrsqrt.f32 %v3471_v9 }
0x159e   : > { %v4655_v12 = vpop.eup %4654 }
0x159f   : > { %v3474_v13 = vmul.f32 %v4655_v12, %v3460_v54 }
0x15a0   : > { %v4657_v15 = vpop.eup %4656 }
0x15a1   : > { %v3480_v16 = vmul.f32 %v3479_v11, %v3474_v13  ;;  %v3475_v6 = vmul.f32 %v4657_v15, %v3461_v56 }
0x15a3   : > { %v3481_v19 = vmul.f32 %v3479_v11, %v3475_v6  ;;  %v3486_v20 = vadd.f32 %v3485_v14, %v3480_v16 }
0x15a5   : > { %v3487_v23 = vadd.f32 %v3485_v14, %v3481_v19  ;;  %v3492_v26 = vmul.f32 %v3491_v18, %v3486_v20 }
0x15a7   : > { %v3493_v46 = vmul.f32 %v3491_v18, %v3487_v23  ;;  %v3498_v27 = vadd.f32 %v3497_v22, %v3492_v26 }
0x15a9   : > { %v3499_v28 = vadd.f32 %v3497_v22, %v3493_v46  ;;  %v3500_v50 = vsub.f32 0.0, %v3498_v27 }
0x15ab   : > { %v3501_v51 = vsub.f32 0.0, %v3499_v28  ;;  %v3502_v29 = vmul.f32 1.442695, %v3500_v50 }
0x15ad   : > { %4658 = vpow2.f32 %v3502_v29  ;;  %v3504_v55 = vmul.f32 1.442695, %v3501_v51 }
0x15af   : > { %4660 = vpow2.f32 %v3504_v55 }
0x15b7   : > { %v4659_v30 = vpop.eup %4658 }
0x15b8   : > { %v3506_v2 = vadd.f32 1.0, %v4659_v30 }
0x15b9   : > { %v4661_v44 = vpop.eup %4660 }
0x15ba   : > { %v3507_v31 = vadd.f32 1.0, %v4661_v44  ;;  %4662 = vrcp.f32 %v3506_v2 }
0x15bc   : > { %4664 = vrcp.f32 %v3507_v31 }
0x15c4   : > { %v4663_v45 = vpop.eup %4662 }
0x15c5   : > { %v3512_v33 = vmul.f32 %v4663_v45, %v3498_v27 }
0x15c6   : > { %v4665_v49 = vpop.eup %4664 }
0x15c7   : > { %v3513_v34 = vmul.f32 %v4665_v49, %v3499_v28 }
0x15c9   : > { %v3514_v35 = vpack.c.bf16 %v3513_v34, %v3512_v33 }
0x15cb   : > { %4369 = vmatmul.mubr.bf16.vlgmr.msra.gmra.mrb[52].mxu1 %v3514_v35 }
0x169e   : > { %v3603_v37 = vpop.f32.mrb[52].mxu1 }
0x169f   : > { %v3604_v38 = vadd.f32 %v4056_v36, %v3603_v37  ;;  %v4370_v39 = vpop.f32.mrb[53].mxu1 }
0x16a0   : > { %v3606_v40 = vpop.f32.mrb[54].mxu1 }
0x16a1   : > { %v3610_v41 = vadd.f32 %v3604_v38, %v5389_v24  ;;  %v3607_v42 = vadd.f32 %v4056_v36, %v3606_v40  ;;  %v4371_v43 = vpop.f32.mrb[55].mxu1 }
0x16a3   : > { %3612 = vst [vmem:[%s5561_s13] sm:$0xff] %v3610_v41  ;;  %v3611_v32 = vadd.f32 %v3607_v42, %v5392_v25 }
0x16a5   : > { %3613 = vst [vmem:[%s5561_s13 + $0x8] sm:$0xff] %v3611_v32 }
0x16a6 PF: > { %s5577_s20 = sld [smem:[#allocation6_spill]]  ;;  %s5578_s2 = sld [smem:[#allocation4_spill]] }
0x16a7   : > { %s5579_s25 = sld [smem:[#allocation5_spill]]  ;;  %s5580_s26 = sld [smem:[#allocation7_spill]] }
0x16a8   : > { %s5581_s27 = sld [smem:[#allocation8_spill]] }
0x16ac   : > { %s31_s3 = sadd.s32 1, %s5577_s20  }
0x16ad   : > { %p28_p9 = scmp.ge.s32.totalorder %s31_s3, 6  }
0x16af   :  { %30 = sbr.rel (!%p28_p9) target bundleno = 20 (0x14), region = 198 }

</bundles_post_ra>
